<compile_context>
chip_gen: v7x
topology: tpu7x:2x2x1
jax: 0.10.0
libtpu: 0.0.40
codegen_flags: <defaults>
</compile_context>

<pallas_src>
import math

import jax
import jax.numpy as jnp
from jax.experimental import pallas as pl
from jax.experimental.pallas import tpu as pltpu

HIGHEST = jax.lax.Precision.HIGHEST


# ----------------------------------------------------------------------------
# Weight rotation (parameter setup, plain JAX) — mirrors the PyTorch code 1:1.
# ----------------------------------------------------------------------------
def _get_rotation_matrix(thetas):
    bs, g = thetas.shape
    t = thetas.reshape(-1)
    x = jnp.cos(t)
    y = jnp.sin(t)
    a = x - y
    b = x * y
    c = x + y
    z = jnp.zeros_like(t)
    one = jnp.ones_like(t)

    def build(rows):
        return jnp.stack([jnp.stack(r, axis=0) for r in rows], axis=0)

    rot_pos = build([
        [a, 1 - a, z, z, z, z, z, z, z],
        [z, x - b, b, z, 1 - c + b, y - b, z, z, z],
        [z, z, a, z, z, 1 - a, z, z, z],
        [b, y - b, z, x - b, 1 - c + b, z, z, z, z],
        [z, z, z, z, one, z, z, z, z],
        [z, z, z, z, 1 - c + b, x - b, z, y - b, b],
        [z, z, z, 1 - a, z, z, a, z, z],
        [z, z, z, y - b, 1 - c + b, z, b, x - b, z],
        [z, z, z, z, z, z, z, 1 - a, a],
    ])
    rot_neg = build([
        [c, z, z, 1 - c, z, z, z, z, z],
        [-b, x + b, z, b - y, 1 - a - b, z, z, z, z],
        [z, 1 - c, c, z, z, z, z, z, z],
        [z, z, z, x + b, 1 - a - b, z, -b, b - y, z],
        [z, z, z, z, one, z, z, z, z],
        [z, b - y, -b, z, 1 - a - b, x + b, z, z, z],
        [z, z, z, z, z, z, c, 1 - c, z],
        [z, z, z, z, 1 - a - b, b - y, z, x + b, -b],
        [z, z, z, z, z, 1 - c, z, z, c],
    ])
    mask = (t >= 0).astype(t.dtype)[None, None, :]
    rot = mask * rot_pos + (1.0 - mask) * rot_neg          # [9, 9, bs*g]
    rot = jnp.transpose(rot, (2, 0, 1)).reshape(bs, g, 9, 9)
    return rot


def group_wise_rotate(weights, lambdas, thetas):
    # weights: [1, Cout, Cin, k, k]; lambdas/thetas: [bs, g]
    w = weights[0]
    bs, g = thetas.shape
    Cout, Cin, k, _ = w.shape
    rot = _get_rotation_matrix(thetas)                     # [bs, g, 9, 9]
    rot = rot * lambdas[:, :, None, None]

    B = w.reshape(1, Cout // g, g, Cin, 9, 1).transpose(0, 2, 1, 3, 4, 5)
    a_, b_, c_, d_ = bs, g, 9, 9
    e_, f_ = Cout // g, Cin
    A2 = rot.reshape(a_, b_, c_, d_).transpose(1, 0, 2, 3).reshape(b_, a_ * c_, d_)
    B2 = B.reshape(b_, e_, f_, d_).transpose(0, 3, 1, 2).reshape(b_, d_, e_ * f_)
    result = jnp.matmul(A2, B2, precision=HIGHEST)
    result = result.reshape(b_, a_, c_, e_, f_).transpose(1, 0, 3, 4, 2)
    return result.reshape(bs * Cout, Cin, 3, 3)


# ----------------------------------------------------------------------------
# Fused Pallas kernel: in-VMEM im2col + 3x3 grouped conv (MXU) + mean/max +
# 5x5 conv_squeeze as one small dot + sigmoid gating.  Everything lane-dense
# on HW.
# ----------------------------------------------------------------------------
def _make_fused_kernel(H, W):
    HW = H * W
    PAD = 128  # lane-aligned zero guard band; >= W+1 (3x3) and >= 2W+2 (5x5)

    def kernel(x_ref, w_ref, sqwb_ref, out_ref, xpad_ref, aggpad_ref, aggpat_ref):
        # x_ref     : (Bt, Cin, HW)        bf16 flattened input
        # w_ref     : (Bt, 9, Cout, Cin)   bf16 rotated weights, tap-major
        # sqwb_ref  : (G, 51)              f32 conv_squeeze weights (+bias col)
        # out_ref   : (Bt, Cout, HW)       gated output (bf16)
        # xpad_ref  : (Cin, PAD+HW+PAD)    bf16 zero-guarded 1-D padded input
        # aggpad_ref: (2, PAD+HW+PAD)      f32 zero-guarded mean/max buffer
        # aggpat_ref: (51, HW)             f32 agg-im2col (+ ones row = bias)
        Bt, Cin, _ = x_ref.shape
        Cout = w_ref.shape[2]
        G = sqwb_ref.shape[0]
        rep = Cout // G

        # --- guard bands / bias row: unconditional every step (multi-core
        #     safe on v7x; cheap: a few KiB of aligned stores) --------------
        xpad_ref[:, 0:PAD] = jnp.zeros((Cin, PAD), jnp.bfloat16)
        xpad_ref[:, PAD + HW:PAD + HW + PAD] = jnp.zeros((Cin, PAD), jnp.bfloat16)
        aggpad_ref[:, 0:PAD] = jnp.zeros((2, PAD), jnp.float32)
        aggpad_ref[:, PAD + HW:PAD + HW + PAD] = jnp.zeros((2, PAD), jnp.float32)
        aggpat_ref[50:51, :] = jnp.ones((1, HW), jnp.float32)

        # --- column-validity masks (hoisted; shared by all taps & batches) --
        col = jax.lax.broadcasted_iota(jnp.int32, (1, HW), 1) % W

        def col_mask(dw, dtype):
            return ((col + dw >= 0) & (col + dw < W)).astype(dtype)

        mask3 = [col_mask(dw, jnp.bfloat16) for dw in (-1, 0, 1)]
        mask5 = [col_mask(dw, jnp.float32) for dw in (-2, -1, 0, 1, 2)]

        sqwb = sqwb_ref[...]                               # (G, 51) f32

        for bi in range(Bt):
            # ---- padded input: lane-dense 1-D layout (aligned interior) ----
            xpad_ref[:, PAD:PAD + HW] = x_ref[bi]

            # ---- grouped 3x3 conv: 9 shifted-slice bf16 MXU dots, f32 acc --
            conv = jnp.zeros((Cout, HW), jnp.float32)
            for kh in range(3):
                for kw in range(3):
                    t = kh * 3 + kw
                    s = (kh - 1) * W + (kw - 1)
                    sl = xpad_ref[:, PAD + s:PAD + s + HW] * mask3[kw]  # (Cin,HW)
                    conv = conv + jnp.dot(w_ref[bi, t], sl,
                                          preferred_element_type=jnp.float32)

            # ---- channel mean / max, lane-dense, into zero-guarded buffer --
            mean_a = jnp.sum(conv, axis=0, keepdims=True) * (1.0 / Cout)
            max_a = jnp.max(conv, axis=0, keepdims=True)
            aggpad_ref[:, PAD:PAD + HW] = jnp.concatenate([mean_a, max_a], 0)

            # ---- 5x5 conv_squeeze: agg-im2col (51,HW) + one (G,51) dot -----
            for kh in range(5):
                for kw in range(5):
                    t = kh * 5 + kw
                    s = (kh - 2) * W + (kw - 2)
                    pair = aggpad_ref[:, PAD + s:PAD + s + HW]          # (2,HW)
                    aggpat_ref[2 * t:2 * t + 2, :] = pair * mask5[kw]
            attn = jax.nn.sigmoid(
                jnp.dot(sqwb, aggpat_ref[...],
                        preferred_element_type=jnp.float32))            # (G,HW)

            # ---- gating (repeat_interleave over channel groups) ------------
            if G == 1:
                gated = conv * attn
            else:
                gated = (conv.reshape(G, rep, HW) * attn[:, None, :]
                         ).reshape(Cout, HW)
            out_ref[bi] = gated.astype(out_ref.dtype)

    return kernel


def _pick_batch_tile(bs, max_bt=8):
    bt = 1
    for d in range(1, min(bs, max_bt) + 1):
        if bs % d == 0:
            bt = d
    return bt


# ----------------------------------------------------------------------------
# Forward wrapper
# ----------------------------------------------------------------------------
def gra_conv_forward(x, weight, sq_w, sq_b, alphas, angles, num_groups,
                     out_dtype=jnp.bfloat16):
    bs, Cin, H, W = x.shape
    Cout = weight.shape[1]
    G = num_groups
    HW = H * W
    PAD = 128

    # parameter setup (plain JAX glue)
    rot_w = group_wise_rotate(weight, alphas, angles)      # [bs*Cout, Cin, 3, 3]
    # tap-major per-batch weight slabs: w_mat[b, kh*3+kw, o, i]
    w_mat = rot_w.reshape(bs, Cout, Cin, 3, 3).transpose(0, 3, 4, 1, 2)
    w_mat = w_mat.reshape(bs, 9, Cout, Cin).astype(jnp.bfloat16)

    # lane-dense flattened input (bf16 MXU operand; halves the HBM read)
    x_flat = x.reshape(bs, Cin, HW).astype(jnp.bfloat16)

    # conv_squeeze weights reordered to match the (2*25+1, HW) agg-im2col:
    # column index = tap*2 + {0:mean, 1:max}; bias folded in as last column.
    sqw_mat = jnp.transpose(sq_w.reshape(G, 2, 25), (0, 2, 1)).reshape(G, 50)
    sqwb = jnp.concatenate(
        [sqw_mat, sq_b.reshape(G, 1)], axis=1).astype(jnp.float32)       # (G,51)

    Bt = _pick_batch_tile(bs)
    grid = (bs // Bt,)

    out_flat = pl.pallas_call(
        _make_fused_kernel(H, W),
        out_shape=jax.ShapeDtypeStruct((bs, Cout, HW), out_dtype),
        grid=grid,
        in_specs=[
            pl.BlockSpec((Bt, Cin, HW), lambda b: (b, 0, 0)),
            pl.BlockSpec((Bt, 9, Cout, Cin), lambda b: (b, 0, 0, 0)),
            pl.BlockSpec((G, 51), lambda b: (0, 0)),
        ],
        out_specs=pl.BlockSpec((Bt, Cout, HW), lambda b: (b, 0, 0)),
        scratch_shapes=[
            pltpu.VMEM((Cin, PAD + HW + PAD), jnp.bfloat16),   # padded x
            pltpu.VMEM((2, PAD + HW + PAD), jnp.float32),      # padded mean/max
            pltpu.VMEM((51, HW), jnp.float32),                 # agg im2col
        ],
        # default scoped VMEM limit is ample; do NOT claim all of v7x's 64 MiB
        compiler_params=pltpu.CompilerParams(
            dimension_semantics=("parallel",)),
    )(x_flat, w_mat, sqwb)

    return out_flat.reshape(bs, Cout, H, W)


# ----------------------------------------------------------------------------
# Pure-JAX reference (for correctness check)
# ----------------------------------------------------------------------------
def _reference_forward(x, weight, sq_w, sq_b, alphas, angles, num_groups):
    bs, Cin, H, W = x.shape
    Cout = weight.shape[1]
    rot_w = group_wise_rotate(weight, alphas, angles)      # [bs*Cout, Cin, 3, 3]
    xr = x.reshape(1, bs * Cin, H, W)
    out = jax.lax.conv_general_dilated(
        xr, rot_w, window_strides=(1, 1), padding=((1, 1), (1, 1)),
        dimension_numbers=("NCHW", "OIHW", "NCHW"),
        feature_group_count=bs, precision=HIGHEST)
    out = out.reshape(bs, Cout, H, W)
    avg = jnp.mean(out, axis=1, keepdims=True)
    mx = jnp.max(out, axis=1, keepdims=True)
    agg = jnp.concatenate([avg, mx], axis=1)
    attn = jax.lax.conv_general_dilated(
        agg, sq_w, window_strides=(1, 1), padding=((2, 2), (2, 2)),
        dimension_numbers=("NCHW", "OIHW", "NCHW"), precision=HIGHEST)
    attn = jax.nn.sigmoid(attn + sq_b[None, :, None, None])
    attn = jnp.repeat(attn, Cout // num_groups, axis=1)
    return out * attn


# ----------------------------------------------------------------------------
if __name__ == "__main__":
    bs, Cin, Cout, H, W = 2, 4, 8, 16, 16
    num_groups = 1          # module default; kernel_size=3, agg_ksize=5

    key = jax.random.PRNGKey(0)
    ks = jax.random.split(key, 6)
    x = jax.random.normal(ks[0], (bs, Cin, H, W), jnp.float32)
    # kaiming_normal_(mode='fan_out', relu): std = sqrt(2 / (Cout * 3 * 3))
    weight = jax.random.normal(ks[1], (1, Cout, Cin, 3, 3), jnp.float32) \
        * math.sqrt(2.0 / (Cout * 9))
    # trunc_normal_(std=0.02) approximated by a plain normal; bias ~ small noise
    sq_w = jax.random.normal(ks[2], (num_groups, 2, 5, 5), jnp.float32) * 0.02
    sq_b = jax.random.normal(ks[3], (num_groups,), jnp.float32) * 0.01
    # synthesized outputs of the (external) routing function
    alphas = jax.nn.sigmoid(jax.random.normal(ks[4], (bs, num_groups), jnp.float32))
    angles = (jax.random.uniform(ks[5], (bs, num_groups), jnp.float32) - 0.5) \
        * (2.0 * math.pi)

    out = jax.block_until_ready(
        gra_conv_forward(x, weight, sq_w, sq_b, alphas, angles, num_groups))
    ref = jax.block_until_ready(
        _reference_forward(x, weight, sq_w, sq_b, alphas, angles, num_groups))

    assert out.shape == (bs, Cout, H, W), out.shape
    out32 = out.astype(jnp.float32)
    err = float(jnp.max(jnp.abs(out32 - ref)))
    # bf16 MXU inputs + bf16 output with f32 accumulation (ref runs f32 HIGHEST)
    assert jnp.allclose(out32, ref, atol=3e-2, rtol=3e-2), f"max abs err = {err}"
    print("KERNEL_OK")
</pallas_src>

<mosaic_0001>
module attributes {stable_mosaic.version = 11 : i64} {
  func.func @kernel(%arg0: i32, %arg1: memref<2x4x256xbf16, #tpu.memory_space<vmem>>, %arg2: memref<2x9x8x4xbf16, #tpu.memory_space<vmem>>, %arg3: memref<1x51xf32, #tpu.memory_space<vmem>>, %arg4: memref<2x8x256xbf16, #tpu.memory_space<vmem>>, %arg5: memref<4x512xbf16, #tpu.memory_space<vmem>>, %arg6: memref<2x512xf32, #tpu.memory_space<vmem>>, %arg7: memref<51x256xf32, #tpu.memory_space<vmem>>) attributes {dimension_semantics = [#tpu.dimension_semantics<parallel>], iteration_bounds = array<i64: 1>, scalar_prefetch = 0 : i64, scratch_operands = 3 : i64, tpu.core_type = #tpu.core_type<tc>, window_params = [{transform_indices = @transform_0, window_bounds = array<i64: 2, 4, 256>}, {transform_indices = @transform_1, window_bounds = array<i64: 2, 9, 8, 4>}, {pipeline_mode = #tpu.pipeline_mode<synchronous>, transform_indices = @transform_2, window_bounds = array<i64: 1, 51>}, {transform_indices = @transform_3, window_bounds = array<i64: 2, 8, 256>}]} {
    %cst = arith.constant 0.000000e+00 : bf16
    %0 = vector.broadcast %cst : bf16 to vector<4x128xbf16>
    %c0 = arith.constant 0 : index
    %c0_0 = arith.constant 0 : index
    %1 = vector.load %arg5[%c0, %c0_0] : memref<4x512xbf16, #tpu.memory_space<vmem>>, vector<4x128xbf16>
    tpu.vector_store %arg5[%c0, %c0_0], %0 {strides = array<i32>} : memref<4x512xbf16, #tpu.memory_space<vmem>>, vector<4x128xbf16>,
    %cst_1 = arith.constant 0.000000e+00 : bf16
    %2 = vector.broadcast %cst_1 : bf16 to vector<4x128xbf16>
    %c0_2 = arith.constant 0 : index
    %c384 = arith.constant 384 : index
    %3 = vector.load %arg5[%c0_2, %c384] : memref<4x512xbf16, #tpu.memory_space<vmem>>, vector<4x128xbf16>
    tpu.vector_store %arg5[%c0_2, %c384], %2 {strides = array<i32>} : memref<4x512xbf16, #tpu.memory_space<vmem>>, vector<4x128xbf16>,
    %cst_3 = arith.constant 0.000000e+00 : f32
    %4 = vector.broadcast %cst_3 : f32 to vector<2x128xf32>
    %c0_4 = arith.constant 0 : index
    %c0_5 = arith.constant 0 : index
    %5 = vector.load %arg6[%c0_4, %c0_5] : memref<2x512xf32, #tpu.memory_space<vmem>>, vector<2x128xf32>
    tpu.vector_store %arg6[%c0_4, %c0_5], %4 {strides = array<i32>} : memref<2x512xf32, #tpu.memory_space<vmem>>, vector<2x128xf32>,
    %cst_6 = arith.constant 0.000000e+00 : f32
    %6 = vector.broadcast %cst_6 : f32 to vector<2x128xf32>
    %c0_7 = arith.constant 0 : index
    %c384_8 = arith.constant 384 : index
    %7 = vector.load %arg6[%c0_7, %c384_8] : memref<2x512xf32, #tpu.memory_space<vmem>>, vector<2x128xf32>
    tpu.vector_store %arg6[%c0_7, %c384_8], %6 {strides = array<i32>} : memref<2x512xf32, #tpu.memory_space<vmem>>, vector<2x128xf32>,
    %cst_9 = arith.constant 1.000000e+00 : f32
    %8 = vector.broadcast %cst_9 : f32 to vector<1x256xf32>
    %c50 = arith.constant 50 : index
    %c0_10 = arith.constant 0 : index
    %9 = vector.load %arg7[%c50, %c0_10] : memref<51x256xf32, #tpu.memory_space<vmem>>, vector<1x256xf32>
    tpu.vector_store %arg7[%c50, %c0_10], %8 {strides = array<i32>} : memref<51x256xf32, #tpu.memory_space<vmem>>, vector<1x256xf32>,
    %10 = tpu.iota {dimensions = array<i32: 1>} : vector<1x256xi32>
    %c16_i32 = arith.constant 16 : i32
    %c0_i32 = arith.constant 0 : i32
    %11 = arith.cmpi eq, %c16_i32, %c0_i32 : i32
    %c1_i32 = arith.constant 1 : i32
    %12 = arith.select %11, %c1_i32, %c16_i32 : i32
    %13 = vector.broadcast %12 : i32 to vector<1x256xi32>
    %14 = arith.remsi %10, %13 : vector<1x256xi32>
    %c0_i32_11 = arith.constant 0 : i32
    %15 = vector.broadcast %c0_i32_11 : i32 to vector<1x256xi32>
    %16 = arith.cmpi ne, %14, %15 : vector<1x256xi32>
    %c0_i32_12 = arith.constant 0 : i32
    %17 = vector.broadcast %c0_i32_12 : i32 to vector<1x256xi32>
    %18 = arith.cmpi slt, %14, %17 : vector<1x256xi32>
    %c0_i32_13 = arith.constant 0 : i32
    %19 = arith.cmpi slt, %12, %c0_i32_13 : i32
    %20 = vector.broadcast %19 : i1 to vector<1x256xi1>
    %21 = vector.broadcast %20 : vector<1x256xi1> to vector<1x256xi1>
    %22 = arith.xori %18, %21 : vector<1x256xi1>
    %23 = arith.andi %22, %16 : vector<1x256xi1>
    %24 = vector.broadcast %12 : i32 to vector<1x256xi32>
    %25 = arith.addi %14, %24 : vector<1x256xi32>
    %26 = arith.select %23, %25, %14 : vector<1x256xi1>, vector<1x256xi32>
    %c-1_i32 = arith.constant -1 : i32
    %27 = vector.broadcast %c-1_i32 : i32 to vector<1x256xi32>
    %28 = arith.addi %26, %27 : vector<1x256xi32>
    %c0_i32_14 = arith.constant 0 : i32
    %29 = vector.broadcast %c0_i32_14 : i32 to vector<1x256xi32>
    %30 = arith.cmpi sge, %28, %29 : vector<1x256xi32>
    %c-1_i32_15 = arith.constant -1 : i32
    %31 = vector.broadcast %c-1_i32_15 : i32 to vector<1x256xi32>
    %32 = arith.addi %26, %31 : vector<1x256xi32>
    %c16_i32_16 = arith.constant 16 : i32
    %33 = vector.broadcast %c16_i32_16 : i32 to vector<1x256xi32>
    %34 = arith.cmpi slt, %32, %33 : vector<1x256xi32>
    %35 = arith.andi %30, %34 : vector<1x256xi1>
    %36 = arith.extui %35 : vector<1x256xi1> to vector<1x256xi32>
    %37 = arith.sitofp %36 : vector<1x256xi32> to vector<1x256xf32>
    %38 = arith.truncf %37 : vector<1x256xf32> to vector<1x256xbf16>
    %c0_i32_17 = arith.constant 0 : i32
    %39 = vector.broadcast %c0_i32_17 : i32 to vector<1x256xi32>
    %40 = arith.addi %26, %39 : vector<1x256xi32>
    %c0_i32_18 = arith.constant 0 : i32
    %41 = vector.broadcast %c0_i32_18 : i32 to vector<1x256xi32>
    %42 = arith.cmpi sge, %40, %41 : vector<1x256xi32>
    %c0_i32_19 = arith.constant 0 : i32
    %43 = vector.broadcast %c0_i32_19 : i32 to vector<1x256xi32>
    %44 = arith.addi %26, %43 : vector<1x256xi32>
    %c16_i32_20 = arith.constant 16 : i32
    %45 = vector.broadcast %c16_i32_20 : i32 to vector<1x256xi32>
    %46 = arith.cmpi slt, %44, %45 : vector<1x256xi32>
    %47 = arith.andi %42, %46 : vector<1x256xi1>
    %48 = arith.extui %47 : vector<1x256xi1> to vector<1x256xi32>
    %49 = arith.sitofp %48 : vector<1x256xi32> to vector<1x256xf32>
    %50 = arith.truncf %49 : vector<1x256xf32> to vector<1x256xbf16>
    %c1_i32_21 = arith.constant 1 : i32
    %51 = vector.broadcast %c1_i32_21 : i32 to vector<1x256xi32>
    %52 = arith.addi %26, %51 : vector<1x256xi32>
    %c0_i32_22 = arith.constant 0 : i32
    %53 = vector.broadcast %c0_i32_22 : i32 to vector<1x256xi32>
    %54 = arith.cmpi sge, %52, %53 : vector<1x256xi32>
    %c1_i32_23 = arith.constant 1 : i32
    %55 = vector.broadcast %c1_i32_23 : i32 to vector<1x256xi32>
    %56 = arith.addi %26, %55 : vector<1x256xi32>
    %c16_i32_24 = arith.constant 16 : i32
    %57 = vector.broadcast %c16_i32_24 : i32 to vector<1x256xi32>
    %58 = arith.cmpi slt, %56, %57 : vector<1x256xi32>
    %59 = arith.andi %54, %58 : vector<1x256xi1>
    %60 = arith.extui %59 : vector<1x256xi1> to vector<1x256xi32>
    %61 = arith.sitofp %60 : vector<1x256xi32> to vector<1x256xf32>
    %62 = arith.truncf %61 : vector<1x256xf32> to vector<1x256xbf16>
    %c-2_i32 = arith.constant -2 : i32
    %63 = vector.broadcast %c-2_i32 : i32 to vector<1x256xi32>
    %64 = arith.addi %26, %63 : vector<1x256xi32>
    %c0_i32_25 = arith.constant 0 : i32
    %65 = vector.broadcast %c0_i32_25 : i32 to vector<1x256xi32>
    %66 = arith.cmpi sge, %64, %65 : vector<1x256xi32>
    %c-2_i32_26 = arith.constant -2 : i32
    %67 = vector.broadcast %c-2_i32_26 : i32 to vector<1x256xi32>
    %68 = arith.addi %26, %67 : vector<1x256xi32>
    %c16_i32_27 = arith.constant 16 : i32
    %69 = vector.broadcast %c16_i32_27 : i32 to vector<1x256xi32>
    %70 = arith.cmpi slt, %68, %69 : vector<1x256xi32>
    %71 = arith.andi %66, %70 : vector<1x256xi1>
    %72 = arith.extui %71 : vector<1x256xi1> to vector<1x256xi32>
    %73 = arith.sitofp %72 : vector<1x256xi32> to vector<1x256xf32>
    %c-1_i32_28 = arith.constant -1 : i32
    %74 = vector.broadcast %c-1_i32_28 : i32 to vector<1x256xi32>
    %75 = arith.addi %26, %74 : vector<1x256xi32>
    %c0_i32_29 = arith.constant 0 : i32
    %76 = vector.broadcast %c0_i32_29 : i32 to vector<1x256xi32>
    %77 = arith.cmpi sge, %75, %76 : vector<1x256xi32>
    %c-1_i32_30 = arith.constant -1 : i32
    %78 = vector.broadcast %c-1_i32_30 : i32 to vector<1x256xi32>
    %79 = arith.addi %26, %78 : vector<1x256xi32>
    %c16_i32_31 = arith.constant 16 : i32
    %80 = vector.broadcast %c16_i32_31 : i32 to vector<1x256xi32>
    %81 = arith.cmpi slt, %79, %80 : vector<1x256xi32>
    %82 = arith.andi %77, %81 : vector<1x256xi1>
    %83 = arith.extui %82 : vector<1x256xi1> to vector<1x256xi32>
    %84 = arith.sitofp %83 : vector<1x256xi32> to vector<1x256xf32>
    %c0_i32_32 = arith.constant 0 : i32
    %85 = vector.broadcast %c0_i32_32 : i32 to vector<1x256xi32>
    %86 = arith.addi %26, %85 : vector<1x256xi32>
    %c0_i32_33 = arith.constant 0 : i32
    %87 = vector.broadcast %c0_i32_33 : i32 to vector<1x256xi32>
    %88 = arith.cmpi sge, %86, %87 : vector<1x256xi32>
    %c0_i32_34 = arith.constant 0 : i32
    %89 = vector.broadcast %c0_i32_34 : i32 to vector<1x256xi32>
    %90 = arith.addi %26, %89 : vector<1x256xi32>
    %c16_i32_35 = arith.constant 16 : i32
    %91 = vector.broadcast %c16_i32_35 : i32 to vector<1x256xi32>
    %92 = arith.cmpi slt, %90, %91 : vector<1x256xi32>
    %93 = arith.andi %88, %92 : vector<1x256xi1>
    %94 = arith.extui %93 : vector<1x256xi1> to vector<1x256xi32>
    %95 = arith.sitofp %94 : vector<1x256xi32> to vector<1x256xf32>
    %c1_i32_36 = arith.constant 1 : i32
    %96 = vector.broadcast %c1_i32_36 : i32 to vector<1x256xi32>
    %97 = arith.addi %26, %96 : vector<1x256xi32>
    %c0_i32_37 = arith.constant 0 : i32
    %98 = vector.broadcast %c0_i32_37 : i32 to vector<1x256xi32>
    %99 = arith.cmpi sge, %97, %98 : vector<1x256xi32>
    %c1_i32_38 = arith.constant 1 : i32
    %100 = vector.broadcast %c1_i32_38 : i32 to vector<1x256xi32>
    %101 = arith.addi %26, %100 : vector<1x256xi32>
    %c16_i32_39 = arith.constant 16 : i32
    %102 = vector.broadcast %c16_i32_39 : i32 to vector<1x256xi32>
    %103 = arith.cmpi slt, %101, %102 : vector<1x256xi32>
    %104 = arith.andi %99, %103 : vector<1x256xi1>
    %105 = arith.extui %104 : vector<1x256xi1> to vector<1x256xi32>
    %106 = arith.sitofp %105 : vector<1x256xi32> to vector<1x256xf32>
    %c2_i32 = arith.constant 2 : i32
    %107 = vector.broadcast %c2_i32 : i32 to vector<1x256xi32>
    %108 = arith.addi %26, %107 : vector<1x256xi32>
    %c0_i32_40 = arith.constant 0 : i32
    %109 = vector.broadcast %c0_i32_40 : i32 to vector<1x256xi32>
    %110 = arith.cmpi sge, %108, %109 : vector<1x256xi32>
    %c2_i32_41 = arith.constant 2 : i32
    %111 = vector.broadcast %c2_i32_41 : i32 to vector<1x256xi32>
    %112 = arith.addi %26, %111 : vector<1x256xi32>
    %c16_i32_42 = arith.constant 16 : i32
    %113 = vector.broadcast %c16_i32_42 : i32 to vector<1x256xi32>
    %114 = arith.cmpi slt, %112, %113 : vector<1x256xi32>
    %115 = arith.andi %110, %114 : vector<1x256xi1>
    %116 = arith.extui %115 : vector<1x256xi1> to vector<1x256xi32>
    %117 = arith.sitofp %116 : vector<1x256xi32> to vector<1x256xf32>
    %c0_43 = arith.constant 0 : index
    %c0_44 = arith.constant 0 : index
    %118 = vector.load %arg3[%c0_43, %c0_44] : memref<1x51xf32, #tpu.memory_space<vmem>>, vector<1x51xf32>
    %c0_45 = arith.constant 0 : index
    %c0_46 = arith.constant 0 : index
    %c0_47 = arith.constant 0 : index
    %119 = vector.load %arg1[%c0_45, %c0_46, %c0_47] : memref<2x4x256xbf16, #tpu.memory_space<vmem>>, vector<1x4x256xbf16>
    %120 = vector.shape_cast %119 : vector<1x4x256xbf16> to vector<4x256xbf16>
    %c0_48 = arith.constant 0 : index
    %c128 = arith.constant 128 : index
    %121 = vector.load %arg5[%c0_48, %c128] : memref<4x512xbf16, #tpu.memory_space<vmem>>, vector<4x256xbf16>
    tpu.vector_store %arg5[%c0_48, %c128], %120 {strides = array<i32>} : memref<4x512xbf16, #tpu.memory_space<vmem>>, vector<4x256xbf16>,
    %cst_49 = arith.constant 0.000000e+00 : f32
    %122 = vector.broadcast %cst_49 : f32 to vector<8x256xf32>
    %c0_50 = arith.constant 0 : index
    %c111 = arith.constant 111 : index
    %123 = vector.load %arg5[%c0_50, %c111] : memref<4x512xbf16, #tpu.memory_space<vmem>>, vector<4x256xbf16>
    %124 = vector.broadcast %38 : vector<1x256xbf16> to vector<4x256xbf16>
    %125 = arith.mulf %123, %124 : vector<4x256xbf16>
    %c0_51 = arith.constant 0 : index
    %c0_52 = arith.constant 0 : index
    %c0_53 = arith.constant 0 : index
    %c0_54 = arith.constant 0 : index
    %126 = vector.load %arg2[%c0_51, %c0_52, %c0_53, %c0_54] : memref<2x9x8x4xbf16, #tpu.memory_space<vmem>>, vector<1x1x8x4xbf16>
    %127 = vector.shape_cast %126 : vector<1x1x8x4xbf16> to vector<8x4xbf16>
    %cst_55 = arith.constant dense<0.000000e+00> : vector<8x256xf32>
    %128 = tpu.matmul %127, %125, %cst_55 {dimension_numbers = #tpu.dot_dimension_numbers<[1], [0], [0], [1], [0, 0, 1, 1], [], []>} : vector<8x4xbf16>, vector<4x256xbf16>, vector<8x256xf32> -> vector<8x256xf32>
    %129 = arith.addf %122, %128 : vector<8x256xf32>
    %c0_56 = arith.constant 0 : index
    %c112 = arith.constant 112 : index
    %130 = vector.load %arg5[%c0_56, %c112] : memref<4x512xbf16, #tpu.memory_space<vmem>>, vector<4x256xbf16>
    %131 = vector.broadcast %50 : vector<1x256xbf16> to vector<4x256xbf16>
    %132 = arith.mulf %130, %131 : vector<4x256xbf16>
    %c0_57 = arith.constant 0 : index
    %c1 = arith.constant 1 : index
    %c0_58 = arith.constant 0 : index
    %c0_59 = arith.constant 0 : index
    %133 = vector.load %arg2[%c0_57, %c1, %c0_58, %c0_59] : memref<2x9x8x4xbf16, #tpu.memory_space<vmem>>, vector<1x1x8x4xbf16>
    %134 = vector.shape_cast %133 : vector<1x1x8x4xbf16> to vector<8x4xbf16>
    %cst_60 = arith.constant dense<0.000000e+00> : vector<8x256xf32>
    %135 = tpu.matmul %134, %132, %cst_60 {dimension_numbers = #tpu.dot_dimension_numbers<[1], [0], [0], [1], [0, 0, 1, 1], [], []>} : vector<8x4xbf16>, vector<4x256xbf16>, vector<8x256xf32> -> vector<8x256xf32>
    %136 = arith.addf %129, %135 : vector<8x256xf32>
    %c0_61 = arith.constant 0 : index
    %c113 = arith.constant 113 : index
    %137 = vector.load %arg5[%c0_61, %c113] : memref<4x512xbf16, #tpu.memory_space<vmem>>, vector<4x256xbf16>
    %138 = vector.broadcast %62 : vector<1x256xbf16> to vector<4x256xbf16>
    %139 = arith.mulf %137, %138 : vector<4x256xbf16>
    %c0_62 = arith.constant 0 : index
    %c2 = arith.constant 2 : index
    %c0_63 = arith.constant 0 : index
    %c0_64 = arith.constant 0 : index
    %140 = vector.load %arg2[%c0_62, %c2, %c0_63, %c0_64] : memref<2x9x8x4xbf16, #tpu.memory_space<vmem>>, vector<1x1x8x4xbf16>
    %141 = vector.shape_cast %140 : vector<1x1x8x4xbf16> to vector<8x4xbf16>
    %cst_65 = arith.constant dense<0.000000e+00> : vector<8x256xf32>
    %142 = tpu.matmul %141, %139, %cst_65 {dimension_numbers = #tpu.dot_dimension_numbers<[1], [0], [0], [1], [0, 0, 1, 1], [], []>} : vector<8x4xbf16>, vector<4x256xbf16>, vector<8x256xf32> -> vector<8x256xf32>
    %143 = arith.addf %136, %142 : vector<8x256xf32>
    %c0_66 = arith.constant 0 : index
    %c127 = arith.constant 127 : index
    %144 = vector.load %arg5[%c0_66, %c127] : memref<4x512xbf16, #tpu.memory_space<vmem>>, vector<4x256xbf16>
    %145 = vector.broadcast %38 : vector<1x256xbf16> to vector<4x256xbf16>
    %146 = arith.mulf %144, %145 : vector<4x256xbf16>
    %c0_67 = arith.constant 0 : index
    %c3 = arith.constant 3 : index
    %c0_68 = arith.constant 0 : index
    %c0_69 = arith.constant 0 : index
    %147 = vector.load %arg2[%c0_67, %c3, %c0_68, %c0_69] : memref<2x9x8x4xbf16, #tpu.memory_space<vmem>>, vector<1x1x8x4xbf16>
    %148 = vector.shape_cast %147 : vector<1x1x8x4xbf16> to vector<8x4xbf16>
    %cst_70 = arith.constant dense<0.000000e+00> : vector<8x256xf32>
    %149 = tpu.matmul %148, %146, %cst_70 {dimension_numbers = #tpu.dot_dimension_numbers<[1], [0], [0], [1], [0, 0, 1, 1], [], []>} : vector<8x4xbf16>, vector<4x256xbf16>, vector<8x256xf32> -> vector<8x256xf32>
    %150 = arith.addf %143, %149 : vector<8x256xf32>
    %c0_71 = arith.constant 0 : index
    %c128_72 = arith.constant 128 : index
    %151 = vector.load %arg5[%c0_71, %c128_72] : memref<4x512xbf16, #tpu.memory_space<vmem>>, vector<4x256xbf16>
    %152 = vector.broadcast %50 : vector<1x256xbf16> to vector<4x256xbf16>
    %153 = arith.mulf %151, %152 : vector<4x256xbf16>
    %c0_73 = arith.constant 0 : index
    %c4 = arith.constant 4 : index
    %c0_74 = arith.constant 0 : index
    %c0_75 = arith.constant 0 : index
    %154 = vector.load %arg2[%c0_73, %c4, %c0_74, %c0_75] : memref<2x9x8x4xbf16, #tpu.memory_space<vmem>>, vector<1x1x8x4xbf16>
    %155 = vector.shape_cast %154 : vector<1x1x8x4xbf16> to vector<8x4xbf16>
    %cst_76 = arith.constant dense<0.000000e+00> : vector<8x256xf32>
    %156 = tpu.matmul %155, %153, %cst_76 {dimension_numbers = #tpu.dot_dimension_numbers<[1], [0], [0], [1], [0, 0, 1, 1], [], []>} : vector<8x4xbf16>, vector<4x256xbf16>, vector<8x256xf32> -> vector<8x256xf32>
    %157 = arith.addf %150, %156 : vector<8x256xf32>
    %c0_77 = arith.constant 0 : index
    %c129 = arith.constant 129 : index
    %158 = vector.load %arg5[%c0_77, %c129] : memref<4x512xbf16, #tpu.memory_space<vmem>>, vector<4x256xbf16>
    %159 = vector.broadcast %62 : vector<1x256xbf16> to vector<4x256xbf16>
    %160 = arith.mulf %158, %159 : vector<4x256xbf16>
    %c0_78 = arith.constant 0 : index
    %c5 = arith.constant 5 : index
    %c0_79 = arith.constant 0 : index
    %c0_80 = arith.constant 0 : index
    %161 = vector.load %arg2[%c0_78, %c5, %c0_79, %c0_80] : memref<2x9x8x4xbf16, #tpu.memory_space<vmem>>, vector<1x1x8x4xbf16>
    %162 = vector.shape_cast %161 : vector<1x1x8x4xbf16> to vector<8x4xbf16>
    %cst_81 = arith.constant dense<0.000000e+00> : vector<8x256xf32>
    %163 = tpu.matmul %162, %160, %cst_81 {dimension_numbers = #tpu.dot_dimension_numbers<[1], [0], [0], [1], [0, 0, 1, 1], [], []>} : vector<8x4xbf16>, vector<4x256xbf16>, vector<8x256xf32> -> vector<8x256xf32>
    %164 = arith.addf %157, %163 : vector<8x256xf32>
    %c0_82 = arith.constant 0 : index
    %c143 = arith.constant 143 : index
    %165 = vector.load %arg5[%c0_82, %c143] : memref<4x512xbf16, #tpu.memory_space<vmem>>, vector<4x256xbf16>
    %166 = vector.broadcast %38 : vector<1x256xbf16> to vector<4x256xbf16>
    %167 = arith.mulf %165, %166 : vector<4x256xbf16>
    %c0_83 = arith.constant 0 : index
    %c6 = arith.constant 6 : index
    %c0_84 = arith.constant 0 : index
    %c0_85 = arith.constant 0 : index
    %168 = vector.load %arg2[%c0_83, %c6, %c0_84, %c0_85] : memref<2x9x8x4xbf16, #tpu.memory_space<vmem>>, vector<1x1x8x4xbf16>
    %169 = vector.shape_cast %168 : vector<1x1x8x4xbf16> to vector<8x4xbf16>
    %cst_86 = arith.constant dense<0.000000e+00> : vector<8x256xf32>
    %170 = tpu.matmul %169, %167, %cst_86 {dimension_numbers = #tpu.dot_dimension_numbers<[1], [0], [0], [1], [0, 0, 1, 1], [], []>} : vector<8x4xbf16>, vector<4x256xbf16>, vector<8x256xf32> -> vector<8x256xf32>
    %171 = arith.addf %164, %170 : vector<8x256xf32>
    %c0_87 = arith.constant 0 : index
    %c144 = arith.constant 144 : index
    %172 = vector.load %arg5[%c0_87, %c144] : memref<4x512xbf16, #tpu.memory_space<vmem>>, vector<4x256xbf16>
    %173 = vector.broadcast %50 : vector<1x256xbf16> to vector<4x256xbf16>
    %174 = arith.mulf %172, %173 : vector<4x256xbf16>
    %c0_88 = arith.constant 0 : index
    %c7 = arith.constant 7 : index
    %c0_89 = arith.constant 0 : index
    %c0_90 = arith.constant 0 : index
    %175 = vector.load %arg2[%c0_88, %c7, %c0_89, %c0_90] : memref<2x9x8x4xbf16, #tpu.memory_space<vmem>>, vector<1x1x8x4xbf16>
    %176 = vector.shape_cast %175 : vector<1x1x8x4xbf16> to vector<8x4xbf16>
    %cst_91 = arith.constant dense<0.000000e+00> : vector<8x256xf32>
    %177 = tpu.matmul %176, %174, %cst_91 {dimension_numbers = #tpu.dot_dimension_numbers<[1], [0], [0], [1], [0, 0, 1, 1], [], []>} : vector<8x4xbf16>, vector<4x256xbf16>, vector<8x256xf32> -> vector<8x256xf32>
    %178 = arith.addf %171, %177 : vector<8x256xf32>
    %c0_92 = arith.constant 0 : index
    %c145 = arith.constant 145 : index
    %179 = vector.load %arg5[%c0_92, %c145] : memref<4x512xbf16, #tpu.memory_space<vmem>>, vector<4x256xbf16>
    %180 = vector.broadcast %62 : vector<1x256xbf16> to vector<4x256xbf16>
    %181 = arith.mulf %179, %180 : vector<4x256xbf16>
    %c0_93 = arith.constant 0 : index
    %c8 = arith.constant 8 : index
    %c0_94 = arith.constant 0 : index
    %c0_95 = arith.constant 0 : index
    %182 = vector.load %arg2[%c0_93, %c8, %c0_94, %c0_95] : memref<2x9x8x4xbf16, #tpu.memory_space<vmem>>, vector<1x1x8x4xbf16>
    %183 = vector.shape_cast %182 : vector<1x1x8x4xbf16> to vector<8x4xbf16>
    %cst_96 = arith.constant dense<0.000000e+00> : vector<8x256xf32>
    %184 = tpu.matmul %183, %181, %cst_96 {dimension_numbers = #tpu.dot_dimension_numbers<[1], [0], [0], [1], [0, 0, 1, 1], [], []>} : vector<8x4xbf16>, vector<4x256xbf16>, vector<8x256xf32> -> vector<8x256xf32>
    %185 = arith.addf %178, %184 : vector<8x256xf32>
    %cst_97 = arith.constant dense<0.000000e+00> : vector<256xf32>
    %186 = vector.multi_reduction <add>, %185, %cst_97 [0] : vector<8x256xf32> to vector<256xf32>
    %187 = vector.shape_cast %186 : vector<256xf32> to vector<1x256xf32>
    %cst_98 = arith.constant 1.250000e-01 : f32
    %188 = vector.broadcast %cst_98 : f32 to vector<1x256xf32>
    %189 = arith.mulf %187, %188 : vector<1x256xf32>
    %cst_99 = arith.constant dense<0xFF800000> : vector<256xf32>
    %190 = vector.multi_reduction <maximumf>, %185, %cst_99 [0] : vector<8x256xf32> to vector<256xf32>
    %191 = vector.shape_cast %190 : vector<256xf32> to vector<1x256xf32>
    %192 = tpu.concatenate %189, %191 in 0 : vector<1x256xf32>, vector<1x256xf32> -> vector<2x256xf32>
    %c0_100 = arith.constant 0 : index
    %c128_101 = arith.constant 128 : index
    %193 = vector.load %arg6[%c0_100, %c128_101] : memref<2x512xf32, #tpu.memory_space<vmem>>, vector<2x256xf32>
    tpu.vector_store %arg6[%c0_100, %c128_101], %192 {strides = array<i32>} : memref<2x512xf32, #tpu.memory_space<vmem>>, vector<2x256xf32>,
    %c0_102 = arith.constant 0 : index
    %c94 = arith.constant 94 : index
    %194 = vector.load %arg6[%c0_102, %c94] : memref<2x512xf32, #tpu.memory_space<vmem>>, vector<2x256xf32>
    %195 = vector.broadcast %73 : vector<1x256xf32> to vector<2x256xf32>
    %196 = arith.mulf %194, %195 : vector<2x256xf32>
    %c0_103 = arith.constant 0 : index
    %c0_104 = arith.constant 0 : index
    %197 = vector.load %arg7[%c0_103, %c0_104] : memref<51x256xf32, #tpu.memory_space<vmem>>, vector<2x256xf32>
    tpu.vector_store %arg7[%c0_103, %c0_104], %196 {strides = array<i32>} : memref<51x256xf32, #tpu.memory_space<vmem>>, vector<2x256xf32>,
    %c0_105 = arith.constant 0 : index
    %c95 = arith.constant 95 : index
    %198 = vector.load %arg6[%c0_105, %c95] : memref<2x512xf32, #tpu.memory_space<vmem>>, vector<2x256xf32>
    %199 = vector.broadcast %84 : vector<1x256xf32> to vector<2x256xf32>
    %200 = arith.mulf %198, %199 : vector<2x256xf32>
    %c2_106 = arith.constant 2 : index
    %c0_107 = arith.constant 0 : index
    %201 = vector.load %arg7[%c2_106, %c0_107] : memref<51x256xf32, #tpu.memory_space<vmem>>, vector<2x256xf32>
    tpu.vector_store %arg7[%c2_106, %c0_107], %200 {strides = array<i32>} : memref<51x256xf32, #tpu.memory_space<vmem>>, vector<2x256xf32>,
    %c0_108 = arith.constant 0 : index
    %c96 = arith.constant 96 : index
    %202 = vector.load %arg6[%c0_108, %c96] : memref<2x512xf32, #tpu.memory_space<vmem>>, vector<2x256xf32>
    %203 = vector.broadcast %95 : vector<1x256xf32> to vector<2x256xf32>
    %204 = arith.mulf %202, %203 : vector<2x256xf32>
    %c4_109 = arith.constant 4 : index
    %c0_110 = arith.constant 0 : index
    %205 = vector.load %arg7[%c4_109, %c0_110] : memref<51x256xf32, #tpu.memory_space<vmem>>, vector<2x256xf32>
    tpu.vector_store %arg7[%c4_109, %c0_110], %204 {strides = array<i32>} : memref<51x256xf32, #tpu.memory_space<vmem>>, vector<2x256xf32>,
    %c0_111 = arith.constant 0 : index
    %c97 = arith.constant 97 : index
    %206 = vector.load %arg6[%c0_111, %c97] : memref<2x512xf32, #tpu.memory_space<vmem>>, vector<2x256xf32>
    %207 = vector.broadcast %106 : vector<1x256xf32> to vector<2x256xf32>
    %208 = arith.mulf %206, %207 : vector<2x256xf32>
    %c6_112 = arith.constant 6 : index
    %c0_113 = arith.constant 0 : index
    %209 = vector.load %arg7[%c6_112, %c0_113] : memref<51x256xf32, #tpu.memory_space<vmem>>, vector<2x256xf32>
    tpu.vector_store %arg7[%c6_112, %c0_113], %208 {strides = array<i32>} : memref<51x256xf32, #tpu.memory_space<vmem>>, vector<2x256xf32>,
    %c0_114 = arith.constant 0 : index
    %c98 = arith.constant 98 : index
    %210 = vector.load %arg6[%c0_114, %c98] : memref<2x512xf32, #tpu.memory_space<vmem>>, vector<2x256xf32>
    %211 = vector.broadcast %117 : vector<1x256xf32> to vector<2x256xf32>
    %212 = arith.mulf %210, %211 : vector<2x256xf32>
    %c8_115 = arith.constant 8 : index
    %c0_116 = arith.constant 0 : index
    %213 = vector.load %arg7[%c8_115, %c0_116] : memref<51x256xf32, #tpu.memory_space<vmem>>, vector<2x256xf32>
    tpu.vector_store %arg7[%c8_115, %c0_116], %212 {strides = array<i32>} : memref<51x256xf32, #tpu.memory_space<vmem>>, vector<2x256xf32>,
    %c0_117 = arith.constant 0 : index
    %c110 = arith.constant 110 : index
    %214 = vector.load %arg6[%c0_117, %c110] : memref<2x512xf32, #tpu.memory_space<vmem>>, vector<2x256xf32>
    %215 = vector.broadcast %73 : vector<1x256xf32> to vector<2x256xf32>
    %216 = arith.mulf %214, %215 : vector<2x256xf32>
    %c10 = arith.constant 10 : index
    %c0_118 = arith.constant 0 : index
    %217 = vector.load %arg7[%c10, %c0_118] : memref<51x256xf32, #tpu.memory_space<vmem>>, vector<2x256xf32>
    tpu.vector_store %arg7[%c10, %c0_118], %216 {strides = array<i32>} : memref<51x256xf32, #tpu.memory_space<vmem>>, vector<2x256xf32>,
    %c0_119 = arith.constant 0 : index
    %c111_120 = arith.constant 111 : index
    %218 = vector.load %arg6[%c0_119, %c111_120] : memref<2x512xf32, #tpu.memory_space<vmem>>, vector<2x256xf32>
    %219 = vector.broadcast %84 : vector<1x256xf32> to vector<2x256xf32>
    %220 = arith.mulf %218, %219 : vector<2x256xf32>
    %c12 = arith.constant 12 : index
    %c0_121 = arith.constant 0 : index
    %221 = vector.load %arg7[%c12, %c0_121] : memref<51x256xf32, #tpu.memory_space<vmem>>, vector<2x256xf32>
    tpu.vector_store %arg7[%c12, %c0_121], %220 {strides = array<i32>} : memref<51x256xf32, #tpu.memory_space<vmem>>, vector<2x256xf32>,
    %c0_122 = arith.constant 0 : index
    %c112_123 = arith.constant 112 : index
    %222 = vector.load %arg6[%c0_122, %c112_123] : memref<2x512xf32, #tpu.memory_space<vmem>>, vector<2x256xf32>
    %223 = vector.broadcast %95 : vector<1x256xf32> to vector<2x256xf32>
    %224 = arith.mulf %222, %223 : vector<2x256xf32>
    %c14 = arith.constant 14 : index
    %c0_124 = arith.constant 0 : index
    %225 = vector.load %arg7[%c14, %c0_124] : memref<51x256xf32, #tpu.memory_space<vmem>>, vector<2x256xf32>
    tpu.vector_store %arg7[%c14, %c0_124], %224 {strides = array<i32>} : memref<51x256xf32, #tpu.memory_space<vmem>>, vector<2x256xf32>,
    %c0_125 = arith.constant 0 : index
    %c113_126 = arith.constant 113 : index
    %226 = vector.load %arg6[%c0_125, %c113_126] : memref<2x512xf32, #tpu.memory_space<vmem>>, vector<2x256xf32>
    %227 = vector.broadcast %106 : vector<1x256xf32> to vector<2x256xf32>
    %228 = arith.mulf %226, %227 : vector<2x256xf32>
    %c16 = arith.constant 16 : index
    %c0_127 = arith.constant 0 : index
    %229 = vector.load %arg7[%c16, %c0_127] : memref<51x256xf32, #tpu.memory_space<vmem>>, vector<2x256xf32>
    tpu.vector_store %arg7[%c16, %c0_127], %228 {strides = array<i32>} : memref<51x256xf32, #tpu.memory_space<vmem>>, vector<2x256xf32>,
    %c0_128 = arith.constant 0 : index
    %c114 = arith.constant 114 : index
    %230 = vector.load %arg6[%c0_128, %c114] : memref<2x512xf32, #tpu.memory_space<vmem>>, vector<2x256xf32>
    %231 = vector.broadcast %117 : vector<1x256xf32> to vector<2x256xf32>
    %232 = arith.mulf %230, %231 : vector<2x256xf32>
    %c18 = arith.constant 18 : index
    %c0_129 = arith.constant 0 : index
    %233 = vector.load %arg7[%c18, %c0_129] : memref<51x256xf32, #tpu.memory_space<vmem>>, vector<2x256xf32>
    tpu.vector_store %arg7[%c18, %c0_129], %232 {strides = array<i32>} : memref<51x256xf32, #tpu.memory_space<vmem>>, vector<2x256xf32>,
    %c0_130 = arith.constant 0 : index
    %c126 = arith.constant 126 : index
    %234 = vector.load %arg6[%c0_130, %c126] : memref<2x512xf32, #tpu.memory_space<vmem>>, vector<2x256xf32>
    %235 = vector.broadcast %73 : vector<1x256xf32> to vector<2x256xf32>
    %236 = arith.mulf %234, %235 : vector<2x256xf32>
    %c20 = arith.constant 20 : index
    %c0_131 = arith.constant 0 : index
    %237 = vector.load %arg7[%c20, %c0_131] : memref<51x256xf32, #tpu.memory_space<vmem>>, vector<2x256xf32>
    tpu.vector_store %arg7[%c20, %c0_131], %236 {strides = array<i32>} : memref<51x256xf32, #tpu.memory_space<vmem>>, vector<2x256xf32>,
    %c0_132 = arith.constant 0 : index
    %c127_133 = arith.constant 127 : index
    %238 = vector.load %arg6[%c0_132, %c127_133] : memref<2x512xf32, #tpu.memory_space<vmem>>, vector<2x256xf32>
    %239 = vector.broadcast %84 : vector<1x256xf32> to vector<2x256xf32>
    %240 = arith.mulf %238, %239 : vector<2x256xf32>
    %c22 = arith.constant 22 : index
    %c0_134 = arith.constant 0 : index
    %241 = vector.load %arg7[%c22, %c0_134] : memref<51x256xf32, #tpu.memory_space<vmem>>, vector<2x256xf32>
    tpu.vector_store %arg7[%c22, %c0_134], %240 {strides = array<i32>} : memref<51x256xf32, #tpu.memory_space<vmem>>, vector<2x256xf32>,
    %c0_135 = arith.constant 0 : index
    %c128_136 = arith.constant 128 : index
    %242 = vector.load %arg6[%c0_135, %c128_136] : memref<2x512xf32, #tpu.memory_space<vmem>>, vector<2x256xf32>
    %243 = vector.broadcast %95 : vector<1x256xf32> to vector<2x256xf32>
    %244 = arith.mulf %242, %243 : vector<2x256xf32>
    %c24 = arith.constant 24 : index
    %c0_137 = arith.constant 0 : index
    %245 = vector.load %arg7[%c24, %c0_137] : memref<51x256xf32, #tpu.memory_space<vmem>>, vector<2x256xf32>
    tpu.vector_store %arg7[%c24, %c0_137], %244 {strides = array<i32>} : memref<51x256xf32, #tpu.memory_space<vmem>>, vector<2x256xf32>,
    %c0_138 = arith.constant 0 : index
    %c129_139 = arith.constant 129 : index
    %246 = vector.load %arg6[%c0_138, %c129_139] : memref<2x512xf32, #tpu.memory_space<vmem>>, vector<2x256xf32>
    %247 = vector.broadcast %106 : vector<1x256xf32> to vector<2x256xf32>
    %248 = arith.mulf %246, %247 : vector<2x256xf32>
    %c26 = arith.constant 26 : index
    %c0_140 = arith.constant 0 : index
    %249 = vector.load %arg7[%c26, %c0_140] : memref<51x256xf32, #tpu.memory_space<vmem>>, vector<2x256xf32>
    tpu.vector_store %arg7[%c26, %c0_140], %248 {strides = array<i32>} : memref<51x256xf32, #tpu.memory_space<vmem>>, vector<2x256xf32>,
    %c0_141 = arith.constant 0 : index
    %c130 = arith.constant 130 : index
    %250 = vector.load %arg6[%c0_141, %c130] : memref<2x512xf32, #tpu.memory_space<vmem>>, vector<2x256xf32>
    %251 = vector.broadcast %117 : vector<1x256xf32> to vector<2x256xf32>
    %252 = arith.mulf %250, %251 : vector<2x256xf32>
    %c28 = arith.constant 28 : index
    %c0_142 = arith.constant 0 : index
    %253 = vector.load %arg7[%c28, %c0_142] : memref<51x256xf32, #tpu.memory_space<vmem>>, vector<2x256xf32>
    tpu.vector_store %arg7[%c28, %c0_142], %252 {strides = array<i32>} : memref<51x256xf32, #tpu.memory_space<vmem>>, vector<2x256xf32>,
    %c0_143 = arith.constant 0 : index
    %c142 = arith.constant 142 : index
    %254 = vector.load %arg6[%c0_143, %c142] : memref<2x512xf32, #tpu.memory_space<vmem>>, vector<2x256xf32>
    %255 = vector.broadcast %73 : vector<1x256xf32> to vector<2x256xf32>
    %256 = arith.mulf %254, %255 : vector<2x256xf32>
    %c30 = arith.constant 30 : index
    %c0_144 = arith.constant 0 : index
    %257 = vector.load %arg7[%c30, %c0_144] : memref<51x256xf32, #tpu.memory_space<vmem>>, vector<2x256xf32>
    tpu.vector_store %arg7[%c30, %c0_144], %256 {strides = array<i32>} : memref<51x256xf32, #tpu.memory_space<vmem>>, vector<2x256xf32>,
    %c0_145 = arith.constant 0 : index
    %c143_146 = arith.constant 143 : index
    %258 = vector.load %arg6[%c0_145, %c143_146] : memref<2x512xf32, #tpu.memory_space<vmem>>, vector<2x256xf32>
    %259 = vector.broadcast %84 : vector<1x256xf32> to vector<2x256xf32>
    %260 = arith.mulf %258, %259 : vector<2x256xf32>
    %c32 = arith.constant 32 : index
    %c0_147 = arith.constant 0 : index
    %261 = vector.load %arg7[%c32, %c0_147] : memref<51x256xf32, #tpu.memory_space<vmem>>, vector<2x256xf32>
    tpu.vector_store %arg7[%c32, %c0_147], %260 {strides = array<i32>} : memref<51x256xf32, #tpu.memory_space<vmem>>, vector<2x256xf32>,
    %c0_148 = arith.constant 0 : index
    %c144_149 = arith.constant 144 : index
    %262 = vector.load %arg6[%c0_148, %c144_149] : memref<2x512xf32, #tpu.memory_space<vmem>>, vector<2x256xf32>
    %263 = vector.broadcast %95 : vector<1x256xf32> to vector<2x256xf32>
    %264 = arith.mulf %262, %263 : vector<2x256xf32>
    %c34 = arith.constant 34 : index
    %c0_150 = arith.constant 0 : index
    %265 = vector.load %arg7[%c34, %c0_150] : memref<51x256xf32, #tpu.memory_space<vmem>>, vector<2x256xf32>
    tpu.vector_store %arg7[%c34, %c0_150], %264 {strides = array<i32>} : memref<51x256xf32, #tpu.memory_space<vmem>>, vector<2x256xf32>,
    %c0_151 = arith.constant 0 : index
    %c145_152 = arith.constant 145 : index
    %266 = vector.load %arg6[%c0_151, %c145_152] : memref<2x512xf32, #tpu.memory_space<vmem>>, vector<2x256xf32>
    %267 = vector.broadcast %106 : vector<1x256xf32> to vector<2x256xf32>
    %268 = arith.mulf %266, %267 : vector<2x256xf32>
    %c36 = arith.constant 36 : index
    %c0_153 = arith.constant 0 : index
    %269 = vector.load %arg7[%c36, %c0_153] : memref<51x256xf32, #tpu.memory_space<vmem>>, vector<2x256xf32>
    tpu.vector_store %arg7[%c36, %c0_153], %268 {strides = array<i32>} : memref<51x256xf32, #tpu.memory_space<vmem>>, vector<2x256xf32>,
    %c0_154 = arith.constant 0 : index
    %c146 = arith.constant 146 : index
    %270 = vector.load %arg6[%c0_154, %c146] : memref<2x512xf32, #tpu.memory_space<vmem>>, vector<2x256xf32>
    %271 = vector.broadcast %117 : vector<1x256xf32> to vector<2x256xf32>
    %272 = arith.mulf %270, %271 : vector<2x256xf32>
    %c38 = arith.constant 38 : index
    %c0_155 = arith.constant 0 : index
    %273 = vector.load %arg7[%c38, %c0_155] : memref<51x256xf32, #tpu.memory_space<vmem>>, vector<2x256xf32>
    tpu.vector_store %arg7[%c38, %c0_155], %272 {strides = array<i32>} : memref<51x256xf32, #tpu.memory_space<vmem>>, vector<2x256xf32>,
    %c0_156 = arith.constant 0 : index
    %c158 = arith.constant 158 : index
    %274 = vector.load %arg6[%c0_156, %c158] : memref<2x512xf32, #tpu.memory_space<vmem>>, vector<2x256xf32>
    %275 = vector.broadcast %73 : vector<1x256xf32> to vector<2x256xf32>
    %276 = arith.mulf %274, %275 : vector<2x256xf32>
    %c40 = arith.constant 40 : index
    %c0_157 = arith.constant 0 : index
    %277 = vector.load %arg7[%c40, %c0_157] : memref<51x256xf32, #tpu.memory_space<vmem>>, vector<2x256xf32>
    tpu.vector_store %arg7[%c40, %c0_157], %276 {strides = array<i32>} : memref<51x256xf32, #tpu.memory_space<vmem>>, vector<2x256xf32>,
    %c0_158 = arith.constant 0 : index
    %c159 = arith.constant 159 : index
    %278 = vector.load %arg6[%c0_158, %c159] : memref<2x512xf32, #tpu.memory_space<vmem>>, vector<2x256xf32>
    %279 = vector.broadcast %84 : vector<1x256xf32> to vector<2x256xf32>
    %280 = arith.mulf %278, %279 : vector<2x256xf32>
    %c42 = arith.constant 42 : index
    %c0_159 = arith.constant 0 : index
    %281 = vector.load %arg7[%c42, %c0_159] : memref<51x256xf32, #tpu.memory_space<vmem>>, vector<2x256xf32>
    tpu.vector_store %arg7[%c42, %c0_159], %280 {strides = array<i32>} : memref<51x256xf32, #tpu.memory_space<vmem>>, vector<2x256xf32>,
    %c0_160 = arith.constant 0 : index
    %c160 = arith.constant 160 : index
    %282 = vector.load %arg6[%c0_160, %c160] : memref<2x512xf32, #tpu.memory_space<vmem>>, vector<2x256xf32>
    %283 = vector.broadcast %95 : vector<1x256xf32> to vector<2x256xf32>
    %284 = arith.mulf %282, %283 : vector<2x256xf32>
    %c44 = arith.constant 44 : index
    %c0_161 = arith.constant 0 : index
    %285 = vector.load %arg7[%c44, %c0_161] : memref<51x256xf32, #tpu.memory_space<vmem>>, vector<2x256xf32>
    tpu.vector_store %arg7[%c44, %c0_161], %284 {strides = array<i32>} : memref<51x256xf32, #tpu.memory_space<vmem>>, vector<2x256xf32>,
    %c0_162 = arith.constant 0 : index
    %c161 = arith.constant 161 : index
    %286 = vector.load %arg6[%c0_162, %c161] : memref<2x512xf32, #tpu.memory_space<vmem>>, vector<2x256xf32>
    %287 = vector.broadcast %106 : vector<1x256xf32> to vector<2x256xf32>
    %288 = arith.mulf %286, %287 : vector<2x256xf32>
    %c46 = arith.constant 46 : index
    %c0_163 = arith.constant 0 : index
    %289 = vector.load %arg7[%c46, %c0_163] : memref<51x256xf32, #tpu.memory_space<vmem>>, vector<2x256xf32>
    tpu.vector_store %arg7[%c46, %c0_163], %288 {strides = array<i32>} : memref<51x256xf32, #tpu.memory_space<vmem>>, vector<2x256xf32>,
    %c0_164 = arith.constant 0 : index
    %c162 = arith.constant 162 : index
    %290 = vector.load %arg6[%c0_164, %c162] : memref<2x512xf32, #tpu.memory_space<vmem>>, vector<2x256xf32>
    %291 = vector.broadcast %117 : vector<1x256xf32> to vector<2x256xf32>
    %292 = arith.mulf %290, %291 : vector<2x256xf32>
    %c48 = arith.constant 48 : index
    %c0_165 = arith.constant 0 : index
    %293 = vector.load %arg7[%c48, %c0_165] : memref<51x256xf32, #tpu.memory_space<vmem>>, vector<2x256xf32>
    tpu.vector_store %arg7[%c48, %c0_165], %292 {strides = array<i32>} : memref<51x256xf32, #tpu.memory_space<vmem>>, vector<2x256xf32>,
    %c0_166 = arith.constant 0 : index
    %c0_167 = arith.constant 0 : index
    %294 = vector.load %arg7[%c0_166, %c0_167] : memref<51x256xf32, #tpu.memory_space<vmem>>, vector<51x256xf32>
    %cst_168 = arith.constant dense<0.000000e+00> : vector<1x256xf32>
    %295 = tpu.matmul %118, %294, %cst_168 {dimension_numbers = #tpu.dot_dimension_numbers<[1], [0], [0], [1], [0, 0, 1, 1], [], []>} : vector<1x51xf32>, vector<51x256xf32>, vector<1x256xf32> -> vector<1x256xf32>
    %296 = arith.negf %295 : vector<1x256xf32>
    %297 = math.exp %296 : vector<1x256xf32>
    %cst_169 = arith.constant 1.000000e+00 : f32
    %298 = vector.broadcast %cst_169 : f32 to vector<1x256xf32>
    %299 = arith.addf %298, %297 : vector<1x256xf32>
    %300 = arith.divf %298, %299 : vector<1x256xf32>
    %301 = vector.broadcast %300 : vector<1x256xf32> to vector<8x256xf32>
    %302 = arith.mulf %185, %301 : vector<8x256xf32>
    %303 = arith.truncf %302 : vector<8x256xf32> to vector<8x256xbf16>
    %c0_170 = arith.constant 0 : index
    %c0_171 = arith.constant 0 : index
    %c0_172 = arith.constant 0 : index
    %304 = vector.load %arg4[%c0_170, %c0_171, %c0_172] : memref<2x8x256xbf16, #tpu.memory_space<vmem>>, vector<1x8x256xbf16>
    %305 = vector.shape_cast %304 : vector<1x8x256xbf16> to vector<8x256xbf16>
    %306 = vector.shape_cast %303 : vector<8x256xbf16> to vector<1x8x256xbf16>
    tpu.vector_store %arg4[%c0_170, %c0_171, %c0_172], %306 {strides = array<i32>} : memref<2x8x256xbf16, #tpu.memory_space<vmem>>, vector<1x8x256xbf16>,
    %c1_173 = arith.constant 1 : index
    %c0_174 = arith.constant 0 : index
    %c0_175 = arith.constant 0 : index
    %307 = vector.load %arg1[%c1_173, %c0_174, %c0_175] : memref<2x4x256xbf16, #tpu.memory_space<vmem>>, vector<1x4x256xbf16>
    %308 = vector.shape_cast %307 : vector<1x4x256xbf16> to vector<4x256xbf16>
    %c0_176 = arith.constant 0 : index
    %c128_177 = arith.constant 128 : index
    %309 = vector.load %arg5[%c0_176, %c128_177] : memref<4x512xbf16, #tpu.memory_space<vmem>>, vector<4x256xbf16>
    tpu.vector_store %arg5[%c0_176, %c128_177], %308 {strides = array<i32>} : memref<4x512xbf16, #tpu.memory_space<vmem>>, vector<4x256xbf16>,
    %cst_178 = arith.constant 0.000000e+00 : f32
    %310 = vector.broadcast %cst_178 : f32 to vector<8x256xf32>
    %c0_179 = arith.constant 0 : index
    %c111_180 = arith.constant 111 : index
    %311 = vector.load %arg5[%c0_179, %c111_180] : memref<4x512xbf16, #tpu.memory_space<vmem>>, vector<4x256xbf16>
    %312 = vector.broadcast %38 : vector<1x256xbf16> to vector<4x256xbf16>
    %313 = arith.mulf %311, %312 : vector<4x256xbf16>
    %c1_181 = arith.constant 1 : index
    %c0_182 = arith.constant 0 : index
    %c0_183 = arith.constant 0 : index
    %c0_184 = arith.constant 0 : index
    %314 = vector.load %arg2[%c1_181, %c0_182, %c0_183, %c0_184] : memref<2x9x8x4xbf16, #tpu.memory_space<vmem>>, vector<1x1x8x4xbf16>
    %315 = vector.shape_cast %314 : vector<1x1x8x4xbf16> to vector<8x4xbf16>
    %cst_185 = arith.constant dense<0.000000e+00> : vector<8x256xf32>
    %316 = tpu.matmul %315, %313, %cst_185 {dimension_numbers = #tpu.dot_dimension_numbers<[1], [0], [0], [1], [0, 0, 1, 1], [], []>} : vector<8x4xbf16>, vector<4x256xbf16>, vector<8x256xf32> -> vector<8x256xf32>
    %317 = arith.addf %310, %316 : vector<8x256xf32>
    %c0_186 = arith.constant 0 : index
    %c112_187 = arith.constant 112 : index
    %318 = vector.load %arg5[%c0_186, %c112_187] : memref<4x512xbf16, #tpu.memory_space<vmem>>, vector<4x256xbf16>
    %319 = vector.broadcast %50 : vector<1x256xbf16> to vector<4x256xbf16>
    %320 = arith.mulf %318, %319 : vector<4x256xbf16>
    %c1_188 = arith.constant 1 : index
    %c1_189 = arith.constant 1 : index
    %c0_190 = arith.constant 0 : index
    %c0_191 = arith.constant 0 : index
    %321 = vector.load %arg2[%c1_188, %c1_189, %c0_190, %c0_191] : memref<2x9x8x4xbf16, #tpu.memory_space<vmem>>, vector<1x1x8x4xbf16>
    %322 = vector.shape_cast %321 : vector<1x1x8x4xbf16> to vector<8x4xbf16>
    %cst_192 = arith.constant dense<0.000000e+00> : vector<8x256xf32>
    %323 = tpu.matmul %322, %320, %cst_192 {dimension_numbers = #tpu.dot_dimension_numbers<[1], [0], [0], [1], [0, 0, 1, 1], [], []>} : vector<8x4xbf16>, vector<4x256xbf16>, vector<8x256xf32> -> vector<8x256xf32>
    %324 = arith.addf %317, %323 : vector<8x256xf32>
    %c0_193 = arith.constant 0 : index
    %c113_194 = arith.constant 113 : index
    %325 = vector.load %arg5[%c0_193, %c113_194] : memref<4x512xbf16, #tpu.memory_space<vmem>>, vector<4x256xbf16>
    %326 = vector.broadcast %62 : vector<1x256xbf16> to vector<4x256xbf16>
    %327 = arith.mulf %325, %326 : vector<4x256xbf16>
    %c1_195 = arith.constant 1 : index
    %c2_196 = arith.constant 2 : index
    %c0_197 = arith.constant 0 : index
    %c0_198 = arith.constant 0 : index
    %328 = vector.load %arg2[%c1_195, %c2_196, %c0_197, %c0_198] : memref<2x9x8x4xbf16, #tpu.memory_space<vmem>>, vector<1x1x8x4xbf16>
    %329 = vector.shape_cast %328 : vector<1x1x8x4xbf16> to vector<8x4xbf16>
    %cst_199 = arith.constant dense<0.000000e+00> : vector<8x256xf32>
    %330 = tpu.matmul %329, %327, %cst_199 {dimension_numbers = #tpu.dot_dimension_numbers<[1], [0], [0], [1], [0, 0, 1, 1], [], []>} : vector<8x4xbf16>, vector<4x256xbf16>, vector<8x256xf32> -> vector<8x256xf32>
    %331 = arith.addf %324, %330 : vector<8x256xf32>
    %c0_200 = arith.constant 0 : index
    %c127_201 = arith.constant 127 : index
    %332 = vector.load %arg5[%c0_200, %c127_201] : memref<4x512xbf16, #tpu.memory_space<vmem>>, vector<4x256xbf16>
    %333 = vector.broadcast %38 : vector<1x256xbf16> to vector<4x256xbf16>
    %334 = arith.mulf %332, %333 : vector<4x256xbf16>
    %c1_202 = arith.constant 1 : index
    %c3_203 = arith.constant 3 : index
    %c0_204 = arith.constant 0 : index
    %c0_205 = arith.constant 0 : index
    %335 = vector.load %arg2[%c1_202, %c3_203, %c0_204, %c0_205] : memref<2x9x8x4xbf16, #tpu.memory_space<vmem>>, vector<1x1x8x4xbf16>
    %336 = vector.shape_cast %335 : vector<1x1x8x4xbf16> to vector<8x4xbf16>
    %cst_206 = arith.constant dense<0.000000e+00> : vector<8x256xf32>
    %337 = tpu.matmul %336, %334, %cst_206 {dimension_numbers = #tpu.dot_dimension_numbers<[1], [0], [0], [1], [0, 0, 1, 1], [], []>} : vector<8x4xbf16>, vector<4x256xbf16>, vector<8x256xf32> -> vector<8x256xf32>
    %338 = arith.addf %331, %337 : vector<8x256xf32>
    %c0_207 = arith.constant 0 : index
    %c128_208 = arith.constant 128 : index
    %339 = vector.load %arg5[%c0_207, %c128_208] : memref<4x512xbf16, #tpu.memory_space<vmem>>, vector<4x256xbf16>
    %340 = vector.broadcast %50 : vector<1x256xbf16> to vector<4x256xbf16>
    %341 = arith.mulf %339, %340 : vector<4x256xbf16>
    %c1_209 = arith.constant 1 : index
    %c4_210 = arith.constant 4 : index
    %c0_211 = arith.constant 0 : index
    %c0_212 = arith.constant 0 : index
    %342 = vector.load %arg2[%c1_209, %c4_210, %c0_211, %c0_212] : memref<2x9x8x4xbf16, #tpu.memory_space<vmem>>, vector<1x1x8x4xbf16>
    %343 = vector.shape_cast %342 : vector<1x1x8x4xbf16> to vector<8x4xbf16>
    %cst_213 = arith.constant dense<0.000000e+00> : vector<8x256xf32>
    %344 = tpu.matmul %343, %341, %cst_213 {dimension_numbers = #tpu.dot_dimension_numbers<[1], [0], [0], [1], [0, 0, 1, 1], [], []>} : vector<8x4xbf16>, vector<4x256xbf16>, vector<8x256xf32> -> vector<8x256xf32>
    %345 = arith.addf %338, %344 : vector<8x256xf32>
    %c0_214 = arith.constant 0 : index
    %c129_215 = arith.constant 129 : index
    %346 = vector.load %arg5[%c0_214, %c129_215] : memref<4x512xbf16, #tpu.memory_space<vmem>>, vector<4x256xbf16>
    %347 = vector.broadcast %62 : vector<1x256xbf16> to vector<4x256xbf16>
    %348 = arith.mulf %346, %347 : vector<4x256xbf16>
    %c1_216 = arith.constant 1 : index
    %c5_217 = arith.constant 5 : index
    %c0_218 = arith.constant 0 : index
    %c0_219 = arith.constant 0 : index
    %349 = vector.load %arg2[%c1_216, %c5_217, %c0_218, %c0_219] : memref<2x9x8x4xbf16, #tpu.memory_space<vmem>>, vector<1x1x8x4xbf16>
    %350 = vector.shape_cast %349 : vector<1x1x8x4xbf16> to vector<8x4xbf16>
    %cst_220 = arith.constant dense<0.000000e+00> : vector<8x256xf32>
    %351 = tpu.matmul %350, %348, %cst_220 {dimension_numbers = #tpu.dot_dimension_numbers<[1], [0], [0], [1], [0, 0, 1, 1], [], []>} : vector<8x4xbf16>, vector<4x256xbf16>, vector<8x256xf32> -> vector<8x256xf32>
    %352 = arith.addf %345, %351 : vector<8x256xf32>
    %c0_221 = arith.constant 0 : index
    %c143_222 = arith.constant 143 : index
    %353 = vector.load %arg5[%c0_221, %c143_222] : memref<4x512xbf16, #tpu.memory_space<vmem>>, vector<4x256xbf16>
    %354 = vector.broadcast %38 : vector<1x256xbf16> to vector<4x256xbf16>
    %355 = arith.mulf %353, %354 : vector<4x256xbf16>
    %c1_223 = arith.constant 1 : index
    %c6_224 = arith.constant 6 : index
    %c0_225 = arith.constant 0 : index
    %c0_226 = arith.constant 0 : index
    %356 = vector.load %arg2[%c1_223, %c6_224, %c0_225, %c0_226] : memref<2x9x8x4xbf16, #tpu.memory_space<vmem>>, vector<1x1x8x4xbf16>
    %357 = vector.shape_cast %356 : vector<1x1x8x4xbf16> to vector<8x4xbf16>
    %cst_227 = arith.constant dense<0.000000e+00> : vector<8x256xf32>
    %358 = tpu.matmul %357, %355, %cst_227 {dimension_numbers = #tpu.dot_dimension_numbers<[1], [0], [0], [1], [0, 0, 1, 1], [], []>} : vector<8x4xbf16>, vector<4x256xbf16>, vector<8x256xf32> -> vector<8x256xf32>
    %359 = arith.addf %352, %358 : vector<8x256xf32>
    %c0_228 = arith.constant 0 : index
    %c144_229 = arith.constant 144 : index
    %360 = vector.load %arg5[%c0_228, %c144_229] : memref<4x512xbf16, #tpu.memory_space<vmem>>, vector<4x256xbf16>
    %361 = vector.broadcast %50 : vector<1x256xbf16> to vector<4x256xbf16>
    %362 = arith.mulf %360, %361 : vector<4x256xbf16>
    %c1_230 = arith.constant 1 : index
    %c7_231 = arith.constant 7 : index
    %c0_232 = arith.constant 0 : index
    %c0_233 = arith.constant 0 : index
    %363 = vector.load %arg2[%c1_230, %c7_231, %c0_232, %c0_233] : memref<2x9x8x4xbf16, #tpu.memory_space<vmem>>, vector<1x1x8x4xbf16>
    %364 = vector.shape_cast %363 : vector<1x1x8x4xbf16> to vector<8x4xbf16>
    %cst_234 = arith.constant dense<0.000000e+00> : vector<8x256xf32>
    %365 = tpu.matmul %364, %362, %cst_234 {dimension_numbers = #tpu.dot_dimension_numbers<[1], [0], [0], [1], [0, 0, 1, 1], [], []>} : vector<8x4xbf16>, vector<4x256xbf16>, vector<8x256xf32> -> vector<8x256xf32>
    %366 = arith.addf %359, %365 : vector<8x256xf32>
    %c0_235 = arith.constant 0 : index
    %c145_236 = arith.constant 145 : index
    %367 = vector.load %arg5[%c0_235, %c145_236] : memref<4x512xbf16, #tpu.memory_space<vmem>>, vector<4x256xbf16>
    %368 = vector.broadcast %62 : vector<1x256xbf16> to vector<4x256xbf16>
    %369 = arith.mulf %367, %368 : vector<4x256xbf16>
    %c1_237 = arith.constant 1 : index
    %c8_238 = arith.constant 8 : index
    %c0_239 = arith.constant 0 : index
    %c0_240 = arith.constant 0 : index
    %370 = vector.load %arg2[%c1_237, %c8_238, %c0_239, %c0_240] : memref<2x9x8x4xbf16, #tpu.memory_space<vmem>>, vector<1x1x8x4xbf16>
    %371 = vector.shape_cast %370 : vector<1x1x8x4xbf16> to vector<8x4xbf16>
    %cst_241 = arith.constant dense<0.000000e+00> : vector<8x256xf32>
    %372 = tpu.matmul %371, %369, %cst_241 {dimension_numbers = #tpu.dot_dimension_numbers<[1], [0], [0], [1], [0, 0, 1, 1], [], []>} : vector<8x4xbf16>, vector<4x256xbf16>, vector<8x256xf32> -> vector<8x256xf32>
    %373 = arith.addf %366, %372 : vector<8x256xf32>
    %cst_242 = arith.constant dense<0.000000e+00> : vector<256xf32>
    %374 = vector.multi_reduction <add>, %373, %cst_242 [0] : vector<8x256xf32> to vector<256xf32>
    %375 = vector.shape_cast %374 : vector<256xf32> to vector<1x256xf32>
    %cst_243 = arith.constant 1.250000e-01 : f32
    %376 = vector.broadcast %cst_243 : f32 to vector<1x256xf32>
    %377 = arith.mulf %375, %376 : vector<1x256xf32>
    %cst_244 = arith.constant dense<0xFF800000> : vector<256xf32>
    %378 = vector.multi_reduction <maximumf>, %373, %cst_244 [0] : vector<8x256xf32> to vector<256xf32>
    %379 = vector.shape_cast %378 : vector<256xf32> to vector<1x256xf32>
    %380 = tpu.concatenate %377, %379 in 0 : vector<1x256xf32>, vector<1x256xf32> -> vector<2x256xf32>
    %c0_245 = arith.constant 0 : index
    %c128_246 = arith.constant 128 : index
    %381 = vector.load %arg6[%c0_245, %c128_246] : memref<2x512xf32, #tpu.memory_space<vmem>>, vector<2x256xf32>
    tpu.vector_store %arg6[%c0_245, %c128_246], %380 {strides = array<i32>} : memref<2x512xf32, #tpu.memory_space<vmem>>, vector<2x256xf32>,
    %c0_247 = arith.constant 0 : index
    %c94_248 = arith.constant 94 : index
    %382 = vector.load %arg6[%c0_247, %c94_248] : memref<2x512xf32, #tpu.memory_space<vmem>>, vector<2x256xf32>
    %383 = vector.broadcast %73 : vector<1x256xf32> to vector<2x256xf32>
    %384 = arith.mulf %382, %383 : vector<2x256xf32>
    %c0_249 = arith.constant 0 : index
    %c0_250 = arith.constant 0 : index
    %385 = vector.load %arg7[%c0_249, %c0_250] : memref<51x256xf32, #tpu.memory_space<vmem>>, vector<2x256xf32>
    tpu.vector_store %arg7[%c0_249, %c0_250], %384 {strides = array<i32>} : memref<51x256xf32, #tpu.memory_space<vmem>>, vector<2x256xf32>,
    %c0_251 = arith.constant 0 : index
    %c95_252 = arith.constant 95 : index
    %386 = vector.load %arg6[%c0_251, %c95_252] : memref<2x512xf32, #tpu.memory_space<vmem>>, vector<2x256xf32>
    %387 = vector.broadcast %84 : vector<1x256xf32> to vector<2x256xf32>
    %388 = arith.mulf %386, %387 : vector<2x256xf32>
    %c2_253 = arith.constant 2 : index
    %c0_254 = arith.constant 0 : index
    %389 = vector.load %arg7[%c2_253, %c0_254] : memref<51x256xf32, #tpu.memory_space<vmem>>, vector<2x256xf32>
    tpu.vector_store %arg7[%c2_253, %c0_254], %388 {strides = array<i32>} : memref<51x256xf32, #tpu.memory_space<vmem>>, vector<2x256xf32>,
    %c0_255 = arith.constant 0 : index
    %c96_256 = arith.constant 96 : index
    %390 = vector.load %arg6[%c0_255, %c96_256] : memref<2x512xf32, #tpu.memory_space<vmem>>, vector<2x256xf32>
    %391 = vector.broadcast %95 : vector<1x256xf32> to vector<2x256xf32>
    %392 = arith.mulf %390, %391 : vector<2x256xf32>
    %c4_257 = arith.constant 4 : index
    %c0_258 = arith.constant 0 : index
    %393 = vector.load %arg7[%c4_257, %c0_258] : memref<51x256xf32, #tpu.memory_space<vmem>>, vector<2x256xf32>
    tpu.vector_store %arg7[%c4_257, %c0_258], %392 {strides = array<i32>} : memref<51x256xf32, #tpu.memory_space<vmem>>, vector<2x256xf32>,
    %c0_259 = arith.constant 0 : index
    %c97_260 = arith.constant 97 : index
    %394 = vector.load %arg6[%c0_259, %c97_260] : memref<2x512xf32, #tpu.memory_space<vmem>>, vector<2x256xf32>
    %395 = vector.broadcast %106 : vector<1x256xf32> to vector<2x256xf32>
    %396 = arith.mulf %394, %395 : vector<2x256xf32>
    %c6_261 = arith.constant 6 : index
    %c0_262 = arith.constant 0 : index
    %397 = vector.load %arg7[%c6_261, %c0_262] : memref<51x256xf32, #tpu.memory_space<vmem>>, vector<2x256xf32>
    tpu.vector_store %arg7[%c6_261, %c0_262], %396 {strides = array<i32>} : memref<51x256xf32, #tpu.memory_space<vmem>>, vector<2x256xf32>,
    %c0_263 = arith.constant 0 : index
    %c98_264 = arith.constant 98 : index
    %398 = vector.load %arg6[%c0_263, %c98_264] : memref<2x512xf32, #tpu.memory_space<vmem>>, vector<2x256xf32>
    %399 = vector.broadcast %117 : vector<1x256xf32> to vector<2x256xf32>
    %400 = arith.mulf %398, %399 : vector<2x256xf32>
    %c8_265 = arith.constant 8 : index
    %c0_266 = arith.constant 0 : index
    %401 = vector.load %arg7[%c8_265, %c0_266] : memref<51x256xf32, #tpu.memory_space<vmem>>, vector<2x256xf32>
    tpu.vector_store %arg7[%c8_265, %c0_266], %400 {strides = array<i32>} : memref<51x256xf32, #tpu.memory_space<vmem>>, vector<2x256xf32>,
    %c0_267 = arith.constant 0 : index
    %c110_268 = arith.constant 110 : index
    %402 = vector.load %arg6[%c0_267, %c110_268] : memref<2x512xf32, #tpu.memory_space<vmem>>, vector<2x256xf32>
    %403 = vector.broadcast %73 : vector<1x256xf32> to vector<2x256xf32>
    %404 = arith.mulf %402, %403 : vector<2x256xf32>
    %c10_269 = arith.constant 10 : index
    %c0_270 = arith.constant 0 : index
    %405 = vector.load %arg7[%c10_269, %c0_270] : memref<51x256xf32, #tpu.memory_space<vmem>>, vector<2x256xf32>
    tpu.vector_store %arg7[%c10_269, %c0_270], %404 {strides = array<i32>} : memref<51x256xf32, #tpu.memory_space<vmem>>, vector<2x256xf32>,
    %c0_271 = arith.constant 0 : index
    %c111_272 = arith.constant 111 : index
    %406 = vector.load %arg6[%c0_271, %c111_272] : memref<2x512xf32, #tpu.memory_space<vmem>>, vector<2x256xf32>
    %407 = vector.broadcast %84 : vector<1x256xf32> to vector<2x256xf32>
    %408 = arith.mulf %406, %407 : vector<2x256xf32>
    %c12_273 = arith.constant 12 : index
    %c0_274 = arith.constant 0 : index
    %409 = vector.load %arg7[%c12_273, %c0_274] : memref<51x256xf32, #tpu.memory_space<vmem>>, vector<2x256xf32>
    tpu.vector_store %arg7[%c12_273, %c0_274], %408 {strides = array<i32>} : memref<51x256xf32, #tpu.memory_space<vmem>>, vector<2x256xf32>,
    %c0_275 = arith.constant 0 : index
    %c112_276 = arith.constant 112 : index
    %410 = vector.load %arg6[%c0_275, %c112_276] : memref<2x512xf32, #tpu.memory_space<vmem>>, vector<2x256xf32>
    %411 = vector.broadcast %95 : vector<1x256xf32> to vector<2x256xf32>
    %412 = arith.mulf %410, %411 : vector<2x256xf32>
    %c14_277 = arith.constant 14 : index
    %c0_278 = arith.constant 0 : index
    %413 = vector.load %arg7[%c14_277, %c0_278] : memref<51x256xf32, #tpu.memory_space<vmem>>, vector<2x256xf32>
    tpu.vector_store %arg7[%c14_277, %c0_278], %412 {strides = array<i32>} : memref<51x256xf32, #tpu.memory_space<vmem>>, vector<2x256xf32>,
    %c0_279 = arith.constant 0 : index
    %c113_280 = arith.constant 113 : index
    %414 = vector.load %arg6[%c0_279, %c113_280] : memref<2x512xf32, #tpu.memory_space<vmem>>, vector<2x256xf32>
    %415 = vector.broadcast %106 : vector<1x256xf32> to vector<2x256xf32>
    %416 = arith.mulf %414, %415 : vector<2x256xf32>
    %c16_281 = arith.constant 16 : index
    %c0_282 = arith.constant 0 : index
    %417 = vector.load %arg7[%c16_281, %c0_282] : memref<51x256xf32, #tpu.memory_space<vmem>>, vector<2x256xf32>
    tpu.vector_store %arg7[%c16_281, %c0_282], %416 {strides = array<i32>} : memref<51x256xf32, #tpu.memory_space<vmem>>, vector<2x256xf32>,
    %c0_283 = arith.constant 0 : index
    %c114_284 = arith.constant 114 : index
    %418 = vector.load %arg6[%c0_283, %c114_284] : memref<2x512xf32, #tpu.memory_space<vmem>>, vector<2x256xf32>
    %419 = vector.broadcast %117 : vector<1x256xf32> to vector<2x256xf32>
    %420 = arith.mulf %418, %419 : vector<2x256xf32>
    %c18_285 = arith.constant 18 : index
    %c0_286 = arith.constant 0 : index
    %421 = vector.load %arg7[%c18_285, %c0_286] : memref<51x256xf32, #tpu.memory_space<vmem>>, vector<2x256xf32>
    tpu.vector_store %arg7[%c18_285, %c0_286], %420 {strides = array<i32>} : memref<51x256xf32, #tpu.memory_space<vmem>>, vector<2x256xf32>,
    %c0_287 = arith.constant 0 : index
    %c126_288 = arith.constant 126 : index
    %422 = vector.load %arg6[%c0_287, %c126_288] : memref<2x512xf32, #tpu.memory_space<vmem>>, vector<2x256xf32>
    %423 = vector.broadcast %73 : vector<1x256xf32> to vector<2x256xf32>
    %424 = arith.mulf %422, %423 : vector<2x256xf32>
    %c20_289 = arith.constant 20 : index
    %c0_290 = arith.constant 0 : index
    %425 = vector.load %arg7[%c20_289, %c0_290] : memref<51x256xf32, #tpu.memory_space<vmem>>, vector<2x256xf32>
    tpu.vector_store %arg7[%c20_289, %c0_290], %424 {strides = array<i32>} : memref<51x256xf32, #tpu.memory_space<vmem>>, vector<2x256xf32>,
    %c0_291 = arith.constant 0 : index
    %c127_292 = arith.constant 127 : index
    %426 = vector.load %arg6[%c0_291, %c127_292] : memref<2x512xf32, #tpu.memory_space<vmem>>, vector<2x256xf32>
    %427 = vector.broadcast %84 : vector<1x256xf32> to vector<2x256xf32>
    %428 = arith.mulf %426, %427 : vector<2x256xf32>
    %c22_293 = arith.constant 22 : index
    %c0_294 = arith.constant 0 : index
    %429 = vector.load %arg7[%c22_293, %c0_294] : memref<51x256xf32, #tpu.memory_space<vmem>>, vector<2x256xf32>
    tpu.vector_store %arg7[%c22_293, %c0_294], %428 {strides = array<i32>} : memref<51x256xf32, #tpu.memory_space<vmem>>, vector<2x256xf32>,
    %c0_295 = arith.constant 0 : index
    %c128_296 = arith.constant 128 : index
    %430 = vector.load %arg6[%c0_295, %c128_296] : memref<2x512xf32, #tpu.memory_space<vmem>>, vector<2x256xf32>
    %431 = vector.broadcast %95 : vector<1x256xf32> to vector<2x256xf32>
    %432 = arith.mulf %430, %431 : vector<2x256xf32>
    %c24_297 = arith.constant 24 : index
    %c0_298 = arith.constant 0 : index
    %433 = vector.load %arg7[%c24_297, %c0_298] : memref<51x256xf32, #tpu.memory_space<vmem>>, vector<2x256xf32>
    tpu.vector_store %arg7[%c24_297, %c0_298], %432 {strides = array<i32>} : memref<51x256xf32, #tpu.memory_space<vmem>>, vector<2x256xf32>,
    %c0_299 = arith.constant 0 : index
    %c129_300 = arith.constant 129 : index
    %434 = vector.load %arg6[%c0_299, %c129_300] : memref<2x512xf32, #tpu.memory_space<vmem>>, vector<2x256xf32>
    %435 = vector.broadcast %106 : vector<1x256xf32> to vector<2x256xf32>
    %436 = arith.mulf %434, %435 : vector<2x256xf32>
    %c26_301 = arith.constant 26 : index
    %c0_302 = arith.constant 0 : index
    %437 = vector.load %arg7[%c26_301, %c0_302] : memref<51x256xf32, #tpu.memory_space<vmem>>, vector<2x256xf32>
    tpu.vector_store %arg7[%c26_301, %c0_302], %436 {strides = array<i32>} : memref<51x256xf32, #tpu.memory_space<vmem>>, vector<2x256xf32>,
    %c0_303 = arith.constant 0 : index
    %c130_304 = arith.constant 130 : index
    %438 = vector.load %arg6[%c0_303, %c130_304] : memref<2x512xf32, #tpu.memory_space<vmem>>, vector<2x256xf32>
    %439 = vector.broadcast %117 : vector<1x256xf32> to vector<2x256xf32>
    %440 = arith.mulf %438, %439 : vector<2x256xf32>
    %c28_305 = arith.constant 28 : index
    %c0_306 = arith.constant 0 : index
    %441 = vector.load %arg7[%c28_305, %c0_306] : memref<51x256xf32, #tpu.memory_space<vmem>>, vector<2x256xf32>
    tpu.vector_store %arg7[%c28_305, %c0_306], %440 {strides = array<i32>} : memref<51x256xf32, #tpu.memory_space<vmem>>, vector<2x256xf32>,
    %c0_307 = arith.constant 0 : index
    %c142_308 = arith.constant 142 : index
    %442 = vector.load %arg6[%c0_307, %c142_308] : memref<2x512xf32, #tpu.memory_space<vmem>>, vector<2x256xf32>
    %443 = vector.broadcast %73 : vector<1x256xf32> to vector<2x256xf32>
    %444 = arith.mulf %442, %443 : vector<2x256xf32>
    %c30_309 = arith.constant 30 : index
    %c0_310 = arith.constant 0 : index
    %445 = vector.load %arg7[%c30_309, %c0_310] : memref<51x256xf32, #tpu.memory_space<vmem>>, vector<2x256xf32>
    tpu.vector_store %arg7[%c30_309, %c0_310], %444 {strides = array<i32>} : memref<51x256xf32, #tpu.memory_space<vmem>>, vector<2x256xf32>,
    %c0_311 = arith.constant 0 : index
    %c143_312 = arith.constant 143 : index
    %446 = vector.load %arg6[%c0_311, %c143_312] : memref<2x512xf32, #tpu.memory_space<vmem>>, vector<2x256xf32>
    %447 = vector.broadcast %84 : vector<1x256xf32> to vector<2x256xf32>
    %448 = arith.mulf %446, %447 : vector<2x256xf32>
    %c32_313 = arith.constant 32 : index
    %c0_314 = arith.constant 0 : index
    %449 = vector.load %arg7[%c32_313, %c0_314] : memref<51x256xf32, #tpu.memory_space<vmem>>, vector<2x256xf32>
    tpu.vector_store %arg7[%c32_313, %c0_314], %448 {strides = array<i32>} : memref<51x256xf32, #tpu.memory_space<vmem>>, vector<2x256xf32>,
    %c0_315 = arith.constant 0 : index
    %c144_316 = arith.constant 144 : index
    %450 = vector.load %arg6[%c0_315, %c144_316] : memref<2x512xf32, #tpu.memory_space<vmem>>, vector<2x256xf32>
    %451 = vector.broadcast %95 : vector<1x256xf32> to vector<2x256xf32>
    %452 = arith.mulf %450, %451 : vector<2x256xf32>
    %c34_317 = arith.constant 34 : index
    %c0_318 = arith.constant 0 : index
    %453 = vector.load %arg7[%c34_317, %c0_318] : memref<51x256xf32, #tpu.memory_space<vmem>>, vector<2x256xf32>
    tpu.vector_store %arg7[%c34_317, %c0_318], %452 {strides = array<i32>} : memref<51x256xf32, #tpu.memory_space<vmem>>, vector<2x256xf32>,
    %c0_319 = arith.constant 0 : index
    %c145_320 = arith.constant 145 : index
    %454 = vector.load %arg6[%c0_319, %c145_320] : memref<2x512xf32, #tpu.memory_space<vmem>>, vector<2x256xf32>
    %455 = vector.broadcast %106 : vector<1x256xf32> to vector<2x256xf32>
    %456 = arith.mulf %454, %455 : vector<2x256xf32>
    %c36_321 = arith.constant 36 : index
    %c0_322 = arith.constant 0 : index
    %457 = vector.load %arg7[%c36_321, %c0_322] : memref<51x256xf32, #tpu.memory_space<vmem>>, vector<2x256xf32>
    tpu.vector_store %arg7[%c36_321, %c0_322], %456 {strides = array<i32>} : memref<51x256xf32, #tpu.memory_space<vmem>>, vector<2x256xf32>,
    %c0_323 = arith.constant 0 : index
    %c146_324 = arith.constant 146 : index
    %458 = vector.load %arg6[%c0_323, %c146_324] : memref<2x512xf32, #tpu.memory_space<vmem>>, vector<2x256xf32>
    %459 = vector.broadcast %117 : vector<1x256xf32> to vector<2x256xf32>
    %460 = arith.mulf %458, %459 : vector<2x256xf32>
    %c38_325 = arith.constant 38 : index
    %c0_326 = arith.constant 0 : index
    %461 = vector.load %arg7[%c38_325, %c0_326] : memref<51x256xf32, #tpu.memory_space<vmem>>, vector<2x256xf32>
    tpu.vector_store %arg7[%c38_325, %c0_326], %460 {strides = array<i32>} : memref<51x256xf32, #tpu.memory_space<vmem>>, vector<2x256xf32>,
    %c0_327 = arith.constant 0 : index
    %c158_328 = arith.constant 158 : index
    %462 = vector.load %arg6[%c0_327, %c158_328] : memref<2x512xf32, #tpu.memory_space<vmem>>, vector<2x256xf32>
    %463 = vector.broadcast %73 : vector<1x256xf32> to vector<2x256xf32>
    %464 = arith.mulf %462, %463 : vector<2x256xf32>
    %c40_329 = arith.constant 40 : index
    %c0_330 = arith.constant 0 : index
    %465 = vector.load %arg7[%c40_329, %c0_330] : memref<51x256xf32, #tpu.memory_space<vmem>>, vector<2x256xf32>
    tpu.vector_store %arg7[%c40_329, %c0_330], %464 {strides = array<i32>} : memref<51x256xf32, #tpu.memory_space<vmem>>, vector<2x256xf32>,
    %c0_331 = arith.constant 0 : index
    %c159_332 = arith.constant 159 : index
    %466 = vector.load %arg6[%c0_331, %c159_332] : memref<2x512xf32, #tpu.memory_space<vmem>>, vector<2x256xf32>
    %467 = vector.broadcast %84 : vector<1x256xf32> to vector<2x256xf32>
    %468 = arith.mulf %466, %467 : vector<2x256xf32>
    %c42_333 = arith.constant 42 : index
    %c0_334 = arith.constant 0 : index
    %469 = vector.load %arg7[%c42_333, %c0_334] : memref<51x256xf32, #tpu.memory_space<vmem>>, vector<2x256xf32>
    tpu.vector_store %arg7[%c42_333, %c0_334], %468 {strides = array<i32>} : memref<51x256xf32, #tpu.memory_space<vmem>>, vector<2x256xf32>,
    %c0_335 = arith.constant 0 : index
    %c160_336 = arith.constant 160 : index
    %470 = vector.load %arg6[%c0_335, %c160_336] : memref<2x512xf32, #tpu.memory_space<vmem>>, vector<2x256xf32>
    %471 = vector.broadcast %95 : vector<1x256xf32> to vector<2x256xf32>
    %472 = arith.mulf %470, %471 : vector<2x256xf32>
    %c44_337 = arith.constant 44 : index
    %c0_338 = arith.constant 0 : index
    %473 = vector.load %arg7[%c44_337, %c0_338] : memref<51x256xf32, #tpu.memory_space<vmem>>, vector<2x256xf32>
    tpu.vector_store %arg7[%c44_337, %c0_338], %472 {strides = array<i32>} : memref<51x256xf32, #tpu.memory_space<vmem>>, vector<2x256xf32>,
    %c0_339 = arith.constant 0 : index
    %c161_340 = arith.constant 161 : index
    %474 = vector.load %arg6[%c0_339, %c161_340] : memref<2x512xf32, #tpu.memory_space<vmem>>, vector<2x256xf32>
    %475 = vector.broadcast %106 : vector<1x256xf32> to vector<2x256xf32>
    %476 = arith.mulf %474, %475 : vector<2x256xf32>
    %c46_341 = arith.constant 46 : index
    %c0_342 = arith.constant 0 : index
    %477 = vector.load %arg7[%c46_341, %c0_342] : memref<51x256xf32, #tpu.memory_space<vmem>>, vector<2x256xf32>
    tpu.vector_store %arg7[%c46_341, %c0_342], %476 {strides = array<i32>} : memref<51x256xf32, #tpu.memory_space<vmem>>, vector<2x256xf32>,
    %c0_343 = arith.constant 0 : index
    %c162_344 = arith.constant 162 : index
    %478 = vector.load %arg6[%c0_343, %c162_344] : memref<2x512xf32, #tpu.memory_space<vmem>>, vector<2x256xf32>
    %479 = vector.broadcast %117 : vector<1x256xf32> to vector<2x256xf32>
    %480 = arith.mulf %478, %479 : vector<2x256xf32>
    %c48_345 = arith.constant 48 : index
    %c0_346 = arith.constant 0 : index
    %481 = vector.load %arg7[%c48_345, %c0_346] : memref<51x256xf32, #tpu.memory_space<vmem>>, vector<2x256xf32>
    tpu.vector_store %arg7[%c48_345, %c0_346], %480 {strides = array<i32>} : memref<51x256xf32, #tpu.memory_space<vmem>>, vector<2x256xf32>,
    %c0_347 = arith.constant 0 : index
    %c0_348 = arith.constant 0 : index
    %482 = vector.load %arg7[%c0_347, %c0_348] : memref<51x256xf32, #tpu.memory_space<vmem>>, vector<51x256xf32>
    %cst_349 = arith.constant dense<0.000000e+00> : vector<1x256xf32>
    %483 = tpu.matmul %118, %482, %cst_349 {dimension_numbers = #tpu.dot_dimension_numbers<[1], [0], [0], [1], [0, 0, 1, 1], [], []>} : vector<1x51xf32>, vector<51x256xf32>, vector<1x256xf32> -> vector<1x256xf32>
    %484 = arith.negf %483 : vector<1x256xf32>
    %485 = math.exp %484 : vector<1x256xf32>
    %cst_350 = arith.constant 1.000000e+00 : f32
    %486 = vector.broadcast %cst_350 : f32 to vector<1x256xf32>
    %487 = arith.addf %486, %485 : vector<1x256xf32>
    %488 = arith.divf %486, %487 : vector<1x256xf32>
    %489 = vector.broadcast %488 : vector<1x256xf32> to vector<8x256xf32>
    %490 = arith.mulf %373, %489 : vector<8x256xf32>
    %491 = arith.truncf %490 : vector<8x256xf32> to vector<8x256xbf16>
    %c1_351 = arith.constant 1 : index
    %c0_352 = arith.constant 0 : index
    %c0_353 = arith.constant 0 : index
    %492 = vector.load %arg4[%c1_351, %c0_352, %c0_353] : memref<2x8x256xbf16, #tpu.memory_space<vmem>>, vector<1x8x256xbf16>
    %493 = vector.shape_cast %492 : vector<1x8x256xbf16> to vector<8x256xbf16>
    %494 = vector.shape_cast %491 : vector<8x256xbf16> to vector<1x8x256xbf16>
    tpu.vector_store %arg4[%c1_351, %c0_352, %c0_353], %494 {strides = array<i32>} : memref<2x8x256xbf16, #tpu.memory_space<vmem>>, vector<1x8x256xbf16>,
    return
  }
  func.func @transform_0(%arg0: i32) -> (i32, i32, i32) {
    %c0_i32 = arith.constant 0 : i32
    %c0_i32_0 = arith.constant 0 : i32
    %c0_i32_1 = arith.constant 0 : i32
    return %arg0, %c0_i32, %c0_i32_0 : i32, i32, i32
  }
  func.func @transform_1(%arg0: i32) -> (i32, i32, i32, i32) {
    %c0_i32 = arith.constant 0 : i32
    %c0_i32_0 = arith.constant 0 : i32
    %c0_i32_1 = arith.constant 0 : i32
    %c0_i32_2 = arith.constant 0 : i32
    return %arg0, %c0_i32, %c0_i32_0, %c0_i32_1 : i32, i32, i32, i32
  }
  func.func @transform_2(%arg0: i32) -> (i32, i32) {
    %c0_i32 = arith.constant 0 : i32
    %c0_i32_0 = arith.constant 0 : i32
    %c0_i32_1 = arith.constant 0 : i32
    return %c0_i32, %c0_i32_0 : i32, i32
  }
  func.func @transform_3(%arg0: i32) -> (i32, i32, i32) {
    %c0_i32 = arith.constant 0 : i32
    %c0_i32_0 = arith.constant 0 : i32
    %c0_i32_1 = arith.constant 0 : i32
    return %arg0, %c0_i32, %c0_i32_0 : i32, i32, i32
  }
}

</mosaic_0001>

<bundles_post_ra>
// kernel: tpu_custom_call.1
= control target key start
LH: loop header
LB: loop body
LE: loop exit
PB: predicated region body
PF: predicated region fallthrough
CT: control target
= control target key end

     0   :  { %v20_v0 = vlaneseq  ;;  %v3947_v1 = vmov 1983009808   ;;  %v3948_v3 = vmov 0.0   ;;  %v5541_v7 = vmov 0   ;;  %s5533_s0 = inlined_call_operand.vmem [shape: bf16[2,4,256], index: 0, kind: input, shape index: {}]   ;;  %s5534_s1 = inlined_call_operand.vmem [shape: bf16[2,9,8,4], index: 1, kind: input, shape index: {}]   ;;  %s5535_s2 = inlined_call_operand.vmem [shape: f32[1,51], index: 2, kind: input, shape index: {}]   ;;  %s5536_s3 = inlined_call_operand.hbm [shape: bf16[2,8,256], index: 3, kind: output, shape index: {}]  }
   0x1   :  { %v126_v2 = vunpack.c.l.s4 %v3947_v1  ;;  %18 = vst [vmem:[#allocation3] sm:$0x3] %v3948_v3  ;;  %19 = vst [vmem:[#allocation3 + $0x6] sm:$0x3] %v3948_v3  ;;  %v119_v4 = vld [vmem:[%s5533_s0] sm:$0xf]  ;;  %2005 = vmatprep.mubr.f32.mxu1 %v3948_v3  ;;  %228 = vmatprep.mubr.bf16.mxu0 %v5541_v7 }
   0x2   :  { %v4006_v5 = vshrl.u32 %v20_v0, 7  ;;  %v28_v6 = vand.u32 127, %v20_v0  ;;  %120 = vst [vmem:[#allocation2 + $0x2] sm:$0xf] %v119_v4  ;;  %16 = vst [vmem:[#allocation2] sm:$0x3] %v5541_v7 }
   0x3   :  { %17 = vst [vmem:[#allocation2 + $0x6] sm:$0x3] %v5541_v7  ;;  %v127_v8 = vunpack.c.0.s8 %v126_v2  ;;  %v3950_v9 = vmov 1.0|1.0  }
   0x4   :  { %v142_v10 = vcombine.low %v3950_v9, %v3950_v9 }
   0x5   :  { %8 = vsyncpa [#allocation6], 0  ;;  %v29_v11 = vadd.s32 128, %v28_v6  ;;  %v4012_v12 = vand.u32 15, %v28_v6  ;;  %v4015_v13 = vsub.s32 %v127_v8, %v4006_v5  ;;  %v3748_v20 = vld [vmem:[%s5533_s0 + $0x4] sm:$0xf] }
   0x6   :  { %s3951_s16 = smov 112   ;;  %s3952_s0 = smov 111   ;;  %vm5559_vm4 = vcmask 916480   ;;  %vm5548_vm5 = vcmask 908288   ;;  %vm5564_vm6 = vcmask 924672   ;;  %vm5560_vm7 = vcmask 1039360  }
   0x7   :  { %v4017_v14 = vand.u32 15, %v29_v11  ;;  %v54_v15 = vadd.s32 4294967295, %v4012_v12  ;;  %v80_v16 = vadd.s32 1, %v4012_v12  ;;  %v4022_v17 = vrot.slane %v142_v10, %v4015_v13  ;;  %s3953_s17 = smov 113   ;;  %s3954_s18 = smov 127  }
   0x8   :  { %s3955_s19 = smov 1   ;;  %s3956_s20 = smov 16   ;;  %vm444_vm8 = vcmask 7168   ;;  %vm182_vm9 = vcmask 130048   ;;  %vm5539_vm10 = vcmask 1041408   ;;  %vm356_vm11 = vcmask 121856  }
   0x9   :  { %v55_v18 = vadd.s32 4294967295, %v4017_v14  ;;  %vm56_vm0 = vcmp.ge.s32.totalorder %v54_v15, 0  ;;  %v81_v19 = vadd.s32 1, %v4017_v14  ;;  %vm84_vm1 = vcmp.lt.s32.totalorder %v80_v16, 16  ;;  %150 = vrot.lane.b32.xlu0 %v4022_v17, %s3951_s16  ;;  %v4037_v23 = vld [vmem:[#allocation2 + $0x2] sm:$0xf] }
   0xa   :  { %v4032_v21 = vsel %vm56_vm0, 1.0, %v3948_v3  ;;  %v4035_v22 = vsel %vm84_vm1, 1.0, %v3948_v3  ;;  %v121_v24 = vld [vmem:[#allocation2] sm:$0x3f]  ;;  %s3957_s21 = smov 15   ;;  %s3958_s22 = smov 17  }
   0xb   :  { %vm57_vm2 = vcmp.ge.s32.totalorder %v55_v18, 0  ;;  %vm85_vm3 = vcmp.lt.s32.totalorder %v81_v19, 16  ;;  %v313_v25 = vld [vmem:[#allocation2] sm:$0x3f]  ;;  %vm5538_vm12 = vcmask 31744   ;;  %vm260_vm13 = vcmask 138240  }
   0xc   :  { %v4039_v26 = vld [vmem:[#allocation2] sm:$0x3f]  ;;  %v4042_v27 = vsel %vm57_vm2, 1.0, %v3948_v3  ;;  %v4045_v28 = vsel %vm85_vm3, 1.0, %v3948_v3  ;;  %vm22_vm14 = vcmp.lt.s32.totalorder %v20_v0, 256  ;;  %s3960_s29 = smov 95  }
   0xd   :  { %v4047_v29 = vld [vmem:[#allocation2 + $0x2] sm:$0x3f]  ;;  %v3712_v31 = vpack.c.bf16 %v4042_v27, %v4032_v21  ;;  %v1001_v32 = vcombine.low %v4032_v21, %v4042_v27  ;;  %v3718_v33 = vpack.c.bf16 %v4045_v28, %v4035_v22  ;;  %v1098_v34 = vcombine.low %v4035_v22, %v4045_v28  ;;  %s3961_s30 = smov 96   ;;  %s3962_s4 = smov 110  }
   0xe   :  { %v4049_v30 = vld [vmem:[#allocation2 + $0x2] sm:$0x3f]  ;;  %v106_v21 = vadd.s32 2, %v4012_v12  ;;  %v107_v27 = vadd.s32 2, %v4017_v14  ;;  %s3963_s7 = smov 97   ;;  %s3964_s8 = smov 94  }
   0xf   :  { %v4059_v35 = vld [vmem:[#allocation2 + $0x2] sm:$0x3f]  ;;  %v131_v37 = vrot.slane %v3712_v31, %v4015_v13  ;;  %v323_v38 = vrot.slane %v3718_v33, %v4015_v13  ;;  %s3965_s9 = smov 98   ;;  %s3966_s10 = smov 114   ;;  %vm5537_vm3 = vcmask 1040384  }
  0x10   :  { %v4061_v36 = vld [vmem:[#allocation2 + $0x2] sm:$0x3f]  ;;  %vm110_vm1 = vcmp.lt.s32.totalorder %v106_v21, 16  ;;  %vm111_vm2 = vcmp.lt.s32.totalorder %v107_v27, 16  ;;  %s3967_s13 = smov 126   ;;  %s3968_s14 = smov 2  }
  0x11   :  { %2045 = vst [vmem:[#allocation2 + $0x2] sm:$0xf] %v3748_v20  ;;  %132 = vrot.lane.b32.xlu0 %v131_v37, %s3952_s0  ;;  %324 = vrot.lane.b32.xlu1 %v323_v38, %s3953_s17  ;;  %s3969_s15 = smov 14   ;;  %s3970_s25 = smov 31  }
  0x12   :  { %s3971_s26 = smov 32   ;;  %s3972_s27 = smov 18  }
  0x13   :  { %s3973_s28 = smov 33   ;;  %s3974_s5 = smov 30  }
  0x14   :  { %s3975_s6 = smov 34  }
  0x15   :  { %412 = vrot.lane.b32.xlu1 %v131_v37, %s3954_s18  ;;  %566 = vrot.lane.b32.xlu0 %v323_v38, %s3955_s19 }
  0x7b   :  { %v151_v39 = vpop.permute.xlu0 %150 }
  0x7c   :  { %v152_v40 = vrot.slane %v151_v39, 6 }
  0x7e   :  { %v4070_v41 = vsel %vm5559_vm4, %v152_v40, %v151_v39 }
  0x7f   :  { %v156_v42 = vmul.bf16 %v4070_v41, %v121_v24 }
  0x81   :  { %v167_v43 = vrot.slane %v156_v42, %v4015_v13  ;;  %v160_v44 = vcombine.high %v156_v42, %v156_v42  ;;  %v3713_v42 = vld [vmem:[%s5534_s1 + $0x4] sm:$0xf] }
  0x83   :  { %v133_v45 = vpop.permute.xlu0 %132  ;;  %v325_v46 = vpop.permute.xlu1 %324  ;;  %176 = vrot.lane.b32.xlu1 %v167_v43, %s3956_s20  ;;  %v175_v48 = vcombine.high %v167_v43, %v167_v43  ;;  %v174_v51 = vrot.slane %v160_v44, %v4015_v13 }
  0x84   :  { %v134_v47 = vrot.slane %v133_v45, 6  ;;  %v326_v49 = vrot.slane %v325_v46, 6 }
  0x85   :  { %178 = vrot.lane.b32.xlu0 %v175_v48, %s3956_s20 }
  0x86   :  { %v4076_v50 = vsel %vm5548_vm5, %v134_v47, %v133_v45  ;;  %v4082_v53 = vsel %vm5564_vm6, %v326_v49, %v325_v46 }
  0x87   :  { %v138_v52 = vmul.bf16 %v4076_v50, %v121_v24  ;;  %180 = vrot.lane.b32.xlu1 %v174_v51, %s3956_s20  ;;  %v330_v55 = vmul.bf16 %v4082_v53, %v313_v25  ;;  %v413_v57 = vpop.permute.xlu1 %412  ;;  %v567_v63 = vpop.permute.xlu0 %566 }
  0x88   :  { %v414_v60 = vrot.slane %v413_v57, 6  ;;  %v568_v4 = vrot.slane %v567_v63, 6 }
  0x89   :  { %v245_v54 = vrot.slane %v138_v52, %v4015_v13  ;;  %652 = vrot.lane.b32.xlu0 %v131_v37, %s3957_s21  ;;  %v238_v56 = vcombine.high %v138_v52, %v138_v52  ;;  %v341_v61 = vrot.slane %v330_v55, %v4015_v13  ;;  %v334_v62 = vcombine.high %v330_v55, %v330_v55 }
  0x8a   :  { %v4094_v1 = vsel %vm5560_vm7, %v414_v60, %v413_v57  ;;  %v4104_v9 = vsel %vm444_vm8, %v568_v4, %v567_v63  ;;  %v139_v4 = vld [vmem:[%s5534_s1] sm:$0xf] }
  0x8b   :  { %v253_v58 = vcombine.high %v245_v54, %v245_v54  ;;  %254 = vrot.lane.b32.xlu1 %v245_v54, %s3958_s22  ;;  %v252_v59 = vrot.slane %v238_v56, %v4015_v13  ;;  %v349_v2 = vcombine.high %v341_v61, %v341_v61  ;;  %v348_v6 = vrot.slane %v334_v62, %v4015_v13 }
  0x8c   :  { %v418_v8 = vmul.bf16 %v4094_v1, %v4039_v26  ;;  %v571_v16 = vmul.bf16 %v4104_v9, %v4047_v29 }
  0x8d   :  { %256 = vrot.lane.b32.xlu0 %v253_v58, %s3958_s22 }
  0x8e   :  { %v429_v10 = vrot.slane %v418_v8, %v4015_v13  ;;  %v422_v11 = vcombine.high %v418_v8, %v418_v8  ;;  %v582_v19 = vrot.slane %v571_v16, %v4015_v13  ;;  %v575_v20 = vcombine.high %v571_v16, %v571_v16 }
  0x8f   :  { %258 = vrot.lane.b32.xlu1 %v252_v59, %s3958_s22 }
  0x90   :  { %v437_v15 = vcombine.high %v429_v10, %v429_v10  ;;  %v436_v18 = vrot.slane %v422_v11, %v4015_v13  ;;  %v590_v24 = vcombine.high %v582_v19, %v582_v19  ;;  %v589_v25 = vrot.slane %v575_v20, %v4015_v13 }
  0x91   :  { %738 = vrot.lane.b32.xlu0 %v4022_v17, %s3956_s20  ;;  %v501_v20 = vmul.bf16 %v4037_v23, %v4022_v17 }
  0x93   :  { %350 = vrot.lane.b32.xlu1 %v341_v61, %s3957_s21 }
  0x95   :  { %352 = vrot.lane.b32.xlu0 %v349_v2, %s3957_s21 }
  0x97   :  { %354 = vrot.lane.b32.xlu1 %v348_v6, %s3957_s21 }
  0x99   :  { %824 = vrot.lane.b32.xlu0 %v323_v38, %s3958_s22 }
  0x9b   :  { %438 = vrot.lane.b32.xlu1 %v429_v10, %s3955_s19 }
  0x9d   :  { %440 = vrot.lane.b32.xlu0 %v437_v15, %s3955_s19 }
  0x9f   :  { %442 = vrot.lane.b32.xlu1 %v436_v18, %s3955_s19 }
  0xa1   :  { %591 = vrot.lane.b32.xlu0 %v582_v19, %s3954_s18 }
  0xa3   :  { %593 = vrot.lane.b32.xlu1 %v590_v24, %s3954_s18 }
  0xa5   :  { %595 = vrot.lane.b32.xlu0 %v589_v25, %s3954_s18 }
  0xf5   :  { %v177_v26 = vpop.permute.xlu1 %176 }
  0xf7   :  { %v179_v29 = vpop.permute.xlu0 %178 }
  0xf8   :  { %v183_v31 = vsel %vm182_vm9, %v177_v26, %v179_v29 }
  0xf9   :  { %v181_v33 = vpop.permute.xlu1 %180  ;;  %v191_v39 = vsel %vm5539_vm10, %v183_v31, 0 }
  0xfa   :  { %v184_v37 = vsel %vm182_vm9, %v179_v29, %v181_v33 }
  0xfb   :  { %v653_v38 = vpop.permute.xlu0 %652  ;;  %3714 = vmatprep.subr.msk.bf16.mxu0 %vm5539_vm10, %v184_v37  ;;  %v511_v37 = vrot.slane %v501_v20, %v4015_v13 }
  0xfc   :  { %v654_v40 = vrot.slane %v653_v38, 6  ;;  %197 = vmatpush1.bf16.msra.mxu0 %v191_v39 }
  0xfd   :  { %v255_v43 = vpop.permute.xlu1 %254 }
  0xfe   :  { %v4128_v44 = vsel %vm356_vm11, %v654_v40, %v653_v38  ;;  %v4184_v40 = vrot.slane %v1001_v32, %v4015_v13 }
  0xff   :  { %v657_v45 = vmul.bf16 %v4128_v44, %v4049_v30  ;;  %v257_v46 = vpop.permute.xlu0 %256  ;;  %3715 = vmatmul.mubr.msk.bf16.vlgmr.msra.gmra.mrb[0].mxu0 %vm5538_vm12, %v3713_v42 }
 0x100   :  { %v261_v47 = vsel %vm260_vm13, %v255_v43, %v257_v46  ;;  %304 = vmatprep.mubr.bf16.mxu0 %v5541_v7  ;;  %v512_v43 = vcombine.high %v511_v37, %v511_v37 }
 0x101   :  { %v259_v48 = vpop.permute.xlu1 %258  ;;  %v668_v49 = vrot.slane %v657_v45, %v4015_v13  ;;  %v661_v52 = vcombine.high %v657_v45, %v657_v45  ;;  %v267_v30 = vsel %vm5539_vm10, %v261_v47, 0  ;;  %v94_v45 = vadd.s32 4294967294, %v4012_v12 }
 0x102   :  { %v262_v51 = vsel %vm260_vm13, %v257_v46, %v259_v48  ;;  %v3959_v46 = vmov 1.0   ;;  %v95_v48 = vadd.s32 4294967294, %v4017_v14 }
 0x103   :  { %v739_v54 = vpop.permute.xlu0 %738  ;;  %677 = vrot.lane.b32.xlu1 %v668_v49, %s3953_s17  ;;  %3716 = vmatprep.subr.msk.bf16.mxu0 %vm5539_vm10, %v262_v51  ;;  %v676_v55 = vcombine.high %v668_v49, %v668_v49  ;;  %v675_v57 = vrot.slane %v661_v52, %v4015_v13  ;;  %25 = vst.msk [vmem:[#allocation4 + $0x62] ss:$8 sm:$0x3] %vm22_vm14, %v3959_v46  ;;  %vm96_vm15 = vcmp.ge.s32.totalorder %v94_v45, 0  ;;  %v3710_v52 = vsel %vm110_vm1, 1.0, %v3948_v3 }
 0x104   :  { %v740_v56 = vrot.slane %v739_v54, 6  ;;  %273 = vmatpush1.bf16.msra.mxu0 %v267_v30  ;;  %v1049_v47 = vcombine.low %v3959_v46, %v3959_v46  ;;  %vm97_vm0 = vcmp.ge.s32.totalorder %v95_v48, 0  ;;  %v3708_v49 = vsel %vm96_vm15, 1.0, %v3948_v3 }
 0x105   :  { %679 = vrot.lane.b32.xlu0 %v676_v55, %s3953_s17  ;;  %v351_v58 = vpop.permute.xlu1 %350  ;;  %v3709_v12 = vsel %vm97_vm0, 1.0, %v3948_v3  ;;  %v1105_v30 = vrot.slane %v1098_v34, %v4015_v13  ;;  %v3725_v34 = vld [vmem:[%s5534_s1 + $0x10] sm:$0xf]  ;;  %vm5547_vm14 = vcmask 777216   ;;  %vm5543_vm15 = vcmask 785408  }
 0x106   :  { %v4143_v59 = vsel %vm182_vm9, %v740_v56, %v739_v54  ;;  %v4199_v0 = vrot.slane %v1049_v47, %v4015_v13  ;;  %v953_v14 = vcombine.low %v3708_v49, %v3709_v12  ;;  %v3711_v54 = vsel %vm111_vm2, 1.0, %v3948_v3 }
 0x107   :  { %v743_v60 = vmul.bf16 %v4143_v59, %v4059_v35  ;;  %681 = vrot.lane.b32.xlu1 %v675_v57, %s3953_s17  ;;  %v353_v61 = vpop.permute.xlu0 %352  ;;  %v3722_v57 = vld [vmem:[%s5534_s1 + $0xc] sm:$0xf]  ;;  %vm5570_vm0 = vcmask 900096   ;;  %vm1350_vm1 = vcmask 932864   ;;  %vm5540_vm2 = vcmask 769024  }
 0x108   :  { %v357_v62 = vsel %vm356_vm11, %v351_v58, %v353_v61  ;;  %5571 = vst [vmem:[#allocation8_spill] sm:$0xff] %v4199_v0  ;;  %v960_v51 = vrot.slane %v953_v14, %v4015_v13  ;;  %v517_v58 = vsel %vm5539_vm10, %v511_v37, 0 }
 0x109   :  { %v754_v63 = vrot.slane %v743_v60, %v4015_v13  ;;  %v355_v2 = vpop.permute.xlu1 %354  ;;  %v363_v8 = vsel %vm5539_vm10, %v357_v62, 0  ;;  %v747_v10 = vcombine.high %v743_v60, %v743_v60  ;;  %v1147_v60 = vcombine.low %v3710_v52, %v3711_v54 }
 0x10a   :  { %v358_v6 = vsel %vm356_vm11, %v353_v61, %v355_v2 }
 0x10b   :  { %763 = vrot.lane.b32.xlu0 %v754_v63, %s3951_s16  ;;  %v825_v35 = vpop.permute.xlu0 %824  ;;  %v762_v11 = vcombine.high %v754_v63, %v754_v63  ;;  %3720 = vmatprep.subr.msk.bf16.mxu0 %vm5539_vm10, %v358_v6  ;;  %v761_v16 = vrot.slane %v747_v10, %v4015_v13  ;;  %v1154_v22 = vrot.slane %v1147_v60, %v4015_v13  ;;  %v3728_v63 = vld [vmem:[%s5534_s1 + $0x14] sm:$0xf] }
 0x10c   :  { %v826_v15 = vrot.slane %v825_v35, 6  ;;  %3717 = vmatmul.mubr.msk.bf16.vlgmr.msra.gmra.mrb[0].mxu0 %vm5538_vm12, %v139_v4 }
 0x10d   :  { %765 = vrot.lane.b32.xlu1 %v762_v11, %s3951_s16  ;;  %369 = vmatpush1.bf16.msra.mxu0 %v363_v8  ;;  %v439_v18 = vpop.permute.xlu1 %438  ;;  %v3731_v11 = vld [vmem:[%s5534_s1 + $0x18] sm:$0xf] }
 0x10e   :  { %v4161_v19 = vsel %vm260_vm13, %v826_v15, %v825_v35  ;;  %400 = vmatprep.mubr.bf16.mxu0 %v5541_v7 }
 0x10f   :  { %v829_v24 = vmul.bf16 %v4161_v19, %v4061_v36  ;;  %767 = vrot.lane.b32.xlu0 %v761_v16, %s3951_s16  ;;  %v441_v25 = vpop.permute.xlu0 %440  ;;  %v3719_v36 = vld [vmem:[%s5534_s1 + $0x8] sm:$0xf] }
 0x110   :  { %v445_v23 = vsel %vm444_vm8, %v439_v18, %v441_v25 }
 0x111   :  { %v840_v26 = vrot.slane %v829_v24, %v4015_v13  ;;  %v833_v29 = vcombine.high %v829_v24, %v829_v24  ;;  %v443_v31 = vpop.permute.xlu1 %442  ;;  %v451_v42 = vsel %vm5539_vm10, %v445_v23, 0  ;;  %v3737_v23 = vld [vmem:[%s5534_s1 + $0x20] sm:$0xf] }
 0x112   :  { %v446_v33 = vsel %vm444_vm8, %v441_v25, %v443_v31 }
 0x113   :  { %849 = vrot.lane.b32.xlu1 %v840_v26, %s3952_s0  ;;  %v848_v38 = vcombine.high %v840_v26, %v840_v26  ;;  %v847_v39 = vrot.slane %v833_v29, %v4015_v13  ;;  %3723 = vmatprep.subr.msk.bf16.mxu0 %vm5539_vm10, %v446_v33  ;;  %v592_v32 = vpop.permute.xlu0 %591  ;;  %v3734_v33 = vld [vmem:[%s5534_s1 + $0x1c] sm:$0xf] }
 0x115   :  { %851 = vrot.lane.b32.xlu0 %v848_v38, %s3952_s0  ;;  %v594_v56 = vpop.permute.xlu1 %593 }
 0x116   :  { %v597_v28 = vsel %vm5560_vm7, %v592_v32, %v594_v56 }
 0x117   :  { %853 = vrot.lane.b32.xlu1 %v847_v39, %s3952_s0  ;;  %v596_v55 = vpop.permute.xlu0 %595  ;;  %v603_v62 = vsel %vm5539_vm10, %v597_v28, 0 }
 0x118   :  { %3721 = vmatmul.mubr.msk.bf16.vlgmr.msra.gmra.mrb[0].mxu0 %vm5538_vm12, %v3719_v36  ;;  %v598_v61 = vsel %vm5560_vm7, %v594_v56, %v596_v55 }
 0x119   :  { %457 = vmatpush1.bf16.msra.mxu0 %v451_v42  ;;  %488 = vmatprep.mubr.bf16.mxu0 %v5541_v7 }
 0x11a   :  { %3726 = vmatprep.subr.msk.bf16.mxu0 %vm5539_vm10, %v512_v43  ;;  %1009 = vrot.lane.b32.xlu0 %v4184_v40, %s3960_s29 }
 0x11b   :  { %1057 = vrot.lane.b32.xlu1 %v4199_v0, %s3961_s30 }
 0x11e   :  { %1193 = vrot.lane.b32.xlu0 %v960_v51, %s3962_s4 }
 0x11f   :  { %1231 = vrot.lane.b32.xlu1 %v4184_v40, %s3952_s0 }
 0x122   :  { %1106 = vrot.lane.b32.xlu0 %v1105_v30, %s3963_s7 }
 0x123   :  { %1270 = vrot.lane.b32.xlu1 %v4199_v0, %s3951_s16 }
 0x124   :  { %3724 = vmatmul.mubr.msk.bf16.vlgmr.msra.gmra.mrb[0].mxu0 %vm5538_vm12, %v3722_v57 }
 0x125   :  { %523 = vmatpush1.bf16.msra.mxu0 %v517_v58  ;;  %554 = vmatprep.mubr.bf16.mxu0 %v5541_v7 }
 0x126   :  { %3729 = vmatprep.subr.msk.bf16.mxu0 %vm5539_vm10, %v598_v61  ;;  %961 = vrot.lane.b32.xlu0 %v960_v51, %s3964_s8 }
 0x127   :  { %1155 = vrot.lane.b32.xlu1 %v1154_v22, %s3965_s9 }
 0x12a   :  { %1347 = vrot.lane.b32.xlu0 %v1154_v22, %s3966_s10 }
 0x12b   :  { %1385 = vrot.lane.b32.xlu1 %v960_v51, %s3967_s13 }
 0x12e   :  { %1479 = vrot.lane.b32.xlu0 %v1105_v30, %s3955_s19 }
 0x12f   :  { %1515 = vrot.lane.b32.xlu1 %v1154_v22, %s3968_s14 }
 0x130   :  { %3727 = vmatmul.mubr.msk.bf16.vlgmr.msra.gmra.mrb[0].mxu0 %vm5538_vm12, %v3725_v34 }
 0x131   :  { %609 = vmatpush1.bf16.msra.mxu0 %v603_v62  ;;  %640 = vmatprep.mubr.bf16.mxu0 %v5541_v7 }
 0x132   :  { %1424 = vrot.lane.b32.xlu0 %v4184_v40, %s3954_s18 }
 0x133   :  { %1552 = vrot.lane.b32.xlu1 %v960_v51, %s3969_s15 }
 0x136   :  { %1309 = vrot.lane.b32.xlu0 %v1105_v30, %s3953_s17 }
 0x137   :  { %1625 = vrot.lane.b32.xlu1 %v4199_v0, %s3956_s20 }
 0x13a   :  { %1661 = vrot.lane.b32.xlu0 %v1105_v30, %s3958_s22 }
 0x13b   :  { %1771 = vrot.lane.b32.xlu1 %v4184_v40, %s3970_s25 }
 0x13c   :  { %3730 = vmatmul.mubr.msk.bf16.vlgmr.msra.gmra.mrb[0].mxu0 %vm5538_vm12, %v3728_v63 }
 0x13d   :  { %726 = vmatprep.mubr.bf16.mxu0 %v5541_v7 }
 0x13e   :  { %1807 = vrot.lane.b32.xlu0 %v4199_v0, %s3971_s26 }
 0x13f   :  { %1698 = vrot.lane.b32.xlu1 %v1154_v22, %s3972_s27 }
 0x142   :  { %1844 = vrot.lane.b32.xlu0 %v1105_v30, %s3973_s28 }
 0x143   :  { %1589 = vrot.lane.b32.xlu1 %v4184_v40, %s3957_s21 }
 0x146   :  { %1735 = vrot.lane.b32.xlu0 %v960_v51, %s3974_s5 }
 0x147   :  { %1881 = vrot.lane.b32.xlu1 %v1154_v22, %s3975_s6 }
 0x175   :  { %v678_v2 = vpop.permute.xlu1 %677 }
 0x177   :  { %v680_v4 = vpop.permute.xlu0 %679 }
 0x178   :  { %v683_v6 = vsel %vm5564_vm6, %v678_v2, %v680_v4 }
 0x179   :  { %v682_v8 = vpop.permute.xlu1 %681  ;;  %v689_v35 = vsel %vm5539_vm10, %v683_v6, 0 }
 0x17a   :  { %v684_v10 = vsel %vm5564_vm6, %v680_v4, %v682_v8 }
 0x17b   :  { %3732 = vmatprep.subr.msk.bf16.mxu0 %vm5539_vm10, %v684_v10 }
 0x17c   :  { %695 = vmatpush1.bf16.msra.mxu0 %v689_v35 }
 0x17d   :  { %v764_v15 = vpop.permute.xlu0 %763 }
 0x17f   :  { %3733 = vmatmul.mubr.msk.bf16.vlgmr.msra.gmra.mrb[0].mxu0 %vm5538_vm12, %v3731_v11  ;;  %v766_v16 = vpop.permute.xlu1 %765 }
 0x180   :  { %v769_v18 = vsel %vm5559_vm4, %v764_v15, %v766_v16  ;;  %812 = vmatprep.mubr.bf16.mxu0 %v5541_v7 }
 0x181   :  { %v768_v20 = vpop.permute.xlu0 %767  ;;  %v775_v25 = vsel %vm5539_vm10, %v769_v18, 0 }
 0x182   :  { %v770_v24 = vsel %vm5559_vm4, %v766_v16, %v768_v20 }
 0x183   :  { %3735 = vmatprep.subr.msk.bf16.mxu0 %vm5539_vm10, %v770_v24 }
 0x184   :  { %781 = vmatpush1.bf16.msra.mxu0 %v775_v25 }
 0x185   :  { %v850_v26 = vpop.permute.xlu1 %849 }
 0x187   :  { %v852_v29 = vpop.permute.xlu0 %851 }
 0x188   :  { %v855_v31 = vsel %vm5548_vm5, %v850_v26, %v852_v29 }
 0x189   :  { %v854_v37 = vpop.permute.xlu1 %853  ;;  %v861_v38 = vsel %vm5539_vm10, %v855_v31, 0 }
 0x18a   :  { %v856_v39 = vsel %vm5548_vm5, %v852_v29, %v854_v37 }
 0x18b   :  { %3736 = vmatmul.mubr.msk.bf16.vlgmr.msra.gmra.mrb[0].mxu0 %vm5538_vm12, %v3734_v33  ;;  %3738 = vmatprep.subr.msk.bf16.mxu0 %vm5539_vm10, %v856_v39  ;;  %vm1088_vm10 = vcmask 261120  }
 0x18c   :  { %867 = vmatpush1.bf16.msra.mxu0 %v861_v38  ;;  %898 = vmatprep.mubr.bf16.mxu0 %v5541_v7  ;;  %v1010_v36 = vpop.permute.xlu0 %1009 }
 0x18d   :  { %v1058_v40 = vpop.permute.xlu1 %1057  ;;  %v1011_v33 = vrot.slane %v1010_v36, 6 }
 0x18e   :  { %v1059_v37 = vrot.slane %v1058_v40, 6 }
 0x190   :  { %v4289_v42 = vpop.permute.xlu0 %1193 }
 0x191   :  { %v4291_v43 = vpop.permute.xlu1 %1231  ;;  %v1195_v39 = vrot.slane %v4289_v42, 6 }
 0x194   :  { %v4293_v45 = vpop.permute.xlu0 %1106 }
 0x195   :  { %v4295_v46 = vpop.permute.xlu1 %1270 }
 0x197   :  { %3739 = vmatmul.mubr.msk.bf16.vlgmr.msra.gmra.mrb[0].mxu0 %vm5538_vm12, %v3737_v23  ;;  %v1233_v23 = vrot.slane %v4291_v43, 6  ;;  %vm1388_vm12 = vcmask 1031168  }
 0x198   :  { %3649 = vmatprep.mubr.f32.mxu0 %v3948_v3  ;;  %v4297_v47 = vpop.permute.xlu0 %961 }
 0x199   :  { %v4307_v51 = vpop.permute.xlu1 %1155 }
 0x19c   :  { %v1348_v56 = vpop.permute.xlu0 %1347 }
 0x19d   :  { %v4311_v63 = vpop.permute.xlu1 %1385 }
 0x1a0   :  { %v1480_v8 = vpop.permute.xlu0 %1479 }
 0x1a1   :  { %v4314_v20 = vpop.permute.xlu1 %1515 }
 0x1a4   :  { %v4317_v26 = vpop.permute.xlu0 %1424 }
 0x1a5   :  { %v4319_v29 = vpop.permute.xlu1 %1552 }
 0x1a8   :  { %v4321_v31 = vpop.permute.xlu0 %1309 }
 0x1a9   :  { %v4323_v38 = vpop.permute.xlu1 %1625 }
 0x1aa   :  { %v1627_v7 = vrot.slane %v4323_v38, 6 }
 0x26a   :  { %v4299_v48 = vpop.f32.mrb[0].mxu0 }
 0x26b   :  { %v909_v21 = vrot.slane %v4299_v48, 4  ;;  %v4302_v27 = vpop.f32.mrb[1].mxu0 }
 0x26c   :  { %v915_v3 = vrot.slane %v4302_v27, 4  ;;  %v904_v32 = vpop.f32.mrb[2].mxu0 }
 0x26d   :  { %v910_v49 = vadd.f32 %v909_v21, %v4299_v48  ;;  %v924_v12 = vmax.f32 %v4299_v48, %v909_v21  ;;  %v905_v14 = vpop.f32.mrb[3].mxu0  ;;  %v1662_v21 = vpop.permute.xlu0 %1661 }
 0x26e   :  { %v916_v52 = vadd.f32 %v915_v3, %v4302_v27  ;;  %v930_v54 = vmax.f32 %v4302_v27, %v915_v3  ;;  %v1349_v14 = vrot.slane %v1348_v56, 6 }
 0x26f   :  { %v911_v30 = vrot.slane %v910_v49, 2  ;;  %v925_v55 = vrot.slane %v924_v12, 2 }
 0x270   :  { %v917_v57 = vrot.slane %v916_v52, 2  ;;  %v931_v58 = vrot.slane %v930_v54, 2 }
 0x271   :  { %v912_v60 = vadd.f32 %v911_v30, %v910_v49  ;;  %v926_v61 = vmax.f32 %v924_v12, %v925_v55  ;;  %v4328_v49 = vsel %vm5547_vm14, %v1011_v33, %v1010_v36  ;;  %v4331_v12 = vsel %vm5543_vm15, %v1059_v37, %v1058_v40 }
 0x272   :  { %v918_v22 = vadd.f32 %v917_v57, %v916_v52  ;;  %v932_v28 = vmax.f32 %v930_v54, %v931_v58  ;;  %v4341_v57 = vsel %vm5570_vm0, %v1195_v39, %v4289_v42  ;;  %v4345_v36 = vsel %vm5548_vm5, %v1233_v23, %v4291_v43  ;;  %v4348_v58 = vpop.permute.xlu1 %1771 }
 0x273   :  { %v913_v34 = vrot.slane %v912_v60, 1  ;;  %v927_v62 = vrot.slane %v926_v61, 1  ;;  %v963_v40 = vrot.slane %v4297_v47, 6  ;;  %v1481_v42 = vrot.slane %v1480_v8, 6 }
 0x274   :  { %v919_v2 = vrot.slane %v918_v22, 1  ;;  %v933_v4 = vrot.slane %v932_v28, 1  ;;  %vm5562_vm15 = vcmask 244736   ;;  %vm1137_vm14 = vcmask 252928  }
 0x275   :  { %v914_v6 = vadd.f32 %v913_v34, %v912_v60  ;;  %v928_v11 = vmax.f32 %v926_v61, %v927_v62  ;;  %v1808_v62 = vpop.permute.xlu0 %1807  ;;  %vm5558_vm5 = vcmask 793600  }
 0x276   :  { %v920_v10 = vadd.f32 %v919_v2, %v918_v22  ;;  %v934_v16 = vmax.f32 %v932_v28, %v933_v4  ;;  %v4356_v22 = vsel %vm1350_vm1, %v1349_v14, %v1348_v56  ;;  %v4370_v56 = vsel %vm5540_vm2, %v963_v40, %v4297_v47 }
 0x277   :  { %v921_v35 = vmul.f32 0.125, %v914_v6  ;;  %v1157_v4 = vrot.slane %v4307_v51, 6  ;;  %vm1416_vm2 = vcmask 15360  }
 0x278   :  { %v922_v15 = vmul.f32 0.125, %v920_v10 }
 0x279   :  { %v936_v18 = vsel %vm5537_vm3, %v921_v35, %v928_v11  ;;  %v4379_v35 = vsel %vm444_vm8, %v1481_v42, %v1480_v8  ;;  %v1663_v11 = vrot.slane %v1662_v21, 6  ;;  %v4398_v33 = vpop.permute.xlu0 %1844 }
 0x27a   :  { %v937_v24 = vsel %vm5537_vm3, %v922_v15, %v934_v16  ;;  %vm5569_vm3 = vcmask 801792  }
 0x27b   :  { %v940_v25 = vcombine.low %v936_v18, %v937_v24  ;;  %v1387_v18 = vrot.slane %v4311_v63, 6  ;;  %v4389_v24 = vpop.permute.xlu1 %1698  ;;  %v4396_v8 = vsel %vm5569_vm3, %v1157_v4, %v4307_v51 }
 0x27c   :  { %5572 = vst [vmem:[#allocation9_spill] sm:$0xff] %v4396_v8 }
 0x27d   :  { %3740 = vst.sshfl [vmem:[#allocation3 + $0x2] sm:$0x33 pattern:$0x76325410] %v940_v25 }
 0x284   :  { %v998_v3 = vld [vmem:[#allocation3] sm:$0x3f] }
 0x285   :  { %v1046_v32 = vld [vmem:[#allocation3] sm:$0x3f]  ;;  %v4334_v54 = vmul.f32 %v4328_v49, %v998_v3  ;;  %v4406_v3 = vsel %vm260_vm13, %v1663_v11, %v1662_v21 }
 0x286   :  { %v1192_v52 = vld [vmem:[#allocation3] sm:$0x3f]  ;;  %v4337_v30 = vmul.f32 %v4331_v12, %v1046_v32  ;;  %5573 = vst [vmem:[#allocation10_spill] sm:$0xff] %v4406_v3  ;;  %v1809_v32 = vrot.slane %v1808_v62, 6 }
 0x287   :  { %v1230_v55 = vld [vmem:[#allocation3] sm:$0x3f]  ;;  %v1031_v60 = vrot.slane %v4334_v54, %v4015_v13  ;;  %v4353_v61 = vmul.f32 %v4341_v57, %v1192_v52  ;;  %v4417_v52 = vsel %vm1388_vm12, %v1387_v18, %v4311_v63  ;;  %v1736_v18 = vpop.permute.xlu0 %1735 }
 0x288   :  { %v4360_v28 = vrot.slane %v4337_v30, %v4015_v13  ;;  %v4363_v43 = vmul.f32 %v4345_v36, %v1230_v55  ;;  %v1346_v34 = vld [vmem:[#allocation3] sm:$0x3f]  ;;  %5574 = vst [vmem:[#allocation11_spill] sm:$0xff] %v4417_v52  ;;  %v1517_v55 = vrot.slane %v4314_v20, 6  ;;  %v4429_v63 = vsel %vm1088_vm10, %v1809_v32, %v1808_v62 }
 0x289   :  { %1037 = vrot.lane.b32.xlu1 %v1031_v60, %s3973_s28  ;;  %v950_v2 = vld [vmem:[#allocation3] sm:$0x3f]  ;;  %v1215_v6 = vrot.slane %v4353_v61, %v4015_v13  ;;  %v4376_v10 = vmul.f32 %v4356_v22, %v1346_v34  ;;  %v1590_v60 = vpop.permute.xlu1 %1589  ;;  %5575 = vst [vmem:[#allocation12_spill] sm:$0xff] %v4429_v63  ;;  %v1737_v32 = vrot.slane %v1736_v18, 6 }
 0x28a   :  { %1084 = vrot.lane.b32.xlu0 %v4360_v28, %s3971_s26  ;;  %v4383_v15 = vrot.slane %v4363_v43, %v4015_v13  ;;  %v4386_v16 = vmul.f32 %v4370_v56, %v950_v2  ;;  %v1478_v47 = vld [vmem:[#allocation3 + $0x2] sm:$0x3f]  ;;  %v1591_v2 = vrot.slane %v1590_v60, 6  ;;  %v4440_v11 = vsel %vm1416_vm2, %v1517_v55, %v4314_v20 }
 0x28b   :  { %v1144_v25 = vld [vmem:[#allocation3] sm:$0x3f]  ;;  %v1369_v37 = vrot.slane %v4376_v10, %v4015_v13  ;;  %v4403_v39 = vmul.f32 %v4379_v35, %v1478_v47  ;;  %5576 = vst [vmem:[#allocation13_spill] sm:$0xff] %v4440_v11  ;;  %v1311_v47 = vrot.slane %v4321_v31, 6 }
 0x28c   :  { %v1660_v23 = vld [vmem:[#allocation3 + $0x2] sm:$0x3f]  ;;  %v4410_v14 = vrot.slane %v4386_v16, %v4015_v13  ;;  %v4413_v51 = vmul.f32 %v4396_v8, %v1144_v25  ;;  %v4454_v20 = vsel %vm356_vm11, %v1591_v2, %v1590_v60 }
 0x28d   :  { %1221 = vrot.lane.b32.xlu1 %v1215_v6, %s3972_s27  ;;  %v1384_v40 = vld [vmem:[#allocation3] sm:$0x3f]  ;;  %v4424_v21 = vmul.f32 %v4406_v3, %v1660_v23  ;;  %v1500_v42 = vrot.slane %v4403_v39, %v4015_v13  ;;  %5577 = vst [vmem:[#allocation14_spill] sm:$0xff] %v4454_v20 }
 0x28e   :  { %1258 = vrot.lane.b32.xlu0 %v4383_v15, %s3958_s22  ;;  %v1806_v34 = vld [vmem:[#allocation3 + $0x2] sm:$0x3f]  ;;  %v4433_v4 = vrot.slane %v4413_v51, %v4015_v13  ;;  %v4436_v6 = vmul.f32 %v4417_v52, %v1384_v40 }
 0x28f   :  { %v1514_v25 = vld [vmem:[#allocation3 + $0x2] sm:$0x3f]  ;;  %v4447_v62 = vmul.f32 %v4429_v63, %v1806_v34  ;;  %v4465_v34 = vsel %vm5564_vm6, %v1311_v47, %v4321_v31  ;;  %v4483_v47 = vsel %vm5562_vm15, %v1737_v32, %v1736_v18 }
 0x290   :  { %v1588_v23 = vld [vmem:[#allocation3 + $0x2] sm:$0x3f]  ;;  %v4458_v55 = vrot.slane %v4436_v6, %v4015_v13  ;;  %v4461_v40 = vmul.f32 %v4440_v11, %v1514_v25  ;;  %5578 = vst [vmem:[#allocation15_spill] sm:$0xff] %v4465_v34  ;;  %5579 = vst [vmem:[#allocation16_spill] sm:$0xff] %v4483_v47 }
 0x291   :  { %1375 = vrot.lane.b32.xlu1 %v1369_v37, %s3969_s15  ;;  %v4451_v37 = vrot.slane %v4424_v21, %v4015_v13  ;;  %v4473_v60 = vmul.f32 %v4454_v20, %v1588_v23  ;;  %v4477_v2 = vrot.slane %v4447_v62, %v4015_v13  ;;  %v1734_v31 = vld [vmem:[#allocation3 + $0x2] sm:$0x3f]  ;;  %v4491_v23 = vsel %vm182_vm9, %v1627_v7, %v4323_v38 }
 0x292   :  { %985 = vrot.lane.b32.xlu0 %v4410_v14, %s3975_s6  ;;  %v4487_v11 = vrot.slane %v4461_v40, %v4015_v13  ;;  %v1624_v63 = vld [vmem:[#allocation3 + $0x2] sm:$0x3f]  ;;  %5580 = vst [vmem:[#allocation17_spill] sm:$0xff] %v4491_v23  ;;  %v1773_v20 = vrot.slane %v4348_v58, 6  ;;  %v4500_v32 = vmul.f32 %v4483_v47, %v1734_v31 }
 0x293   :  { %v1462_v18 = vld [vmem:[#allocation3 + $0x2] sm:$0xf]  ;;  %v4504_v7 = vrot.slane %v4473_v60, %v4015_v13  ;;  %v4507_v38 = vmul.f32 %v4491_v23, %v1624_v63 }
 0x294   :  { %v1095_v52 = vld [vmem:[#allocation3] sm:$0x3f]  ;;  %v4515_v8 = vsel %vm1137_vm14, %v1773_v20, %v4348_v58  ;;  %v1464_v31 = vmul.f32 %v1462_v18, %v4199_v0  ;;  %v4528_v63 = vrot.slane %v4500_v32, %v4015_v13  ;;  %v969_v58 = vcombine.high %v4386_v16, %v4386_v16 }
 0x295   :  { %1506 = vrot.lane.b32.xlu1 %v1500_v42, %s3954_s18  ;;  %v1308_v42 = vld [vmem:[#allocation3] sm:$0x3f]  ;;  %5581 = vst [vmem:[#allocation18_spill] sm:$0xff] %v4515_v8  ;;  %v1272_v0 = vrot.slane %v4295_v46, 6 }
 0x296   :  { %1179 = vrot.lane.b32.xlu0 %v4433_v4, %s3974_s5  ;;  %v4480_v25 = vmul.f32 %v4465_v34, %v1308_v42  ;;  %v1108_v42 = vrot.slane %v4293_v45, 6  ;;  %v1770_v3 = vld [vmem:[#allocation3 + $0x2] sm:$0x3f]  ;;  %v1472_v23 = vrot.slane %v1464_v31, %v4015_v13  ;;  %v983_v16 = vrot.slane %v969_v58, %v4015_v13 }
 0x297   :  { %3741 = vst.sshfl [vmem:[#allocation4 + $0x30] sm:$0x3 pattern:$0x76325410] %v1464_v31  ;;  %v4535_v18 = vmul.f32 %v4515_v8, %v1770_v3  ;;  %v1269_v31 = vld [vmem:[#allocation3] sm:$0x3f] }
 0x298   :  { %v4511_v34 = vrot.slane %v4480_v25, %v4015_v13  ;;  %v4522_v47 = vsel %vm5558_vm5, %v1108_v42, %v4293_v45  ;;  %v1646_v45 = vrot.slane %v4507_v38, %v4015_v13  ;;  %v1473_v42 = vcombine.high %v1472_v23, %v1472_v23 }
 0x299   :  { %1687 = vrot.lane.b32.xlu1 %v4451_v37, %s3952_s0  ;;  %5582 = vst [vmem:[#allocation19_spill] sm:$0xff] %v4522_v47  ;;  %v1112_v20 = vmul.f32 %v4522_v47, %v1095_v52  ;;  %v1792_v3 = vrot.slane %v4535_v18, %v4015_v13  ;;  %v4550_v47 = vsel %vm5559_vm4, %v1272_v0, %v4295_v46  ;;  %vm5561_vm5 = vcmask 113664  }
 0x29a   :  { %1412 = vrot.lane.b32.xlu0 %v4458_v55, %s3968_s14  ;;  %1477 = vst [vmem:[#allocation4 + $0x38] sm:$0x3] %v1473_v42  ;;  %v1276_v58 = vmul.f32 %v4550_v47, %v1269_v31  ;;  %v984_v42 = vcombine.high %v4410_v14, %v4410_v14  ;;  %v1017_v14 = vcombine.low %v4334_v54, %v4334_v54  ;;  %vm5565_vm4 = vcmask 146432  }
 0x29b   :  { %v1128_v52 = vrot.slane %v1112_v20, %v4015_v13  ;;  %v1114_v8 = vcombine.low %v1112_v20, %v1112_v20  ;;  %v1426_v20 = vrot.slane %v4317_v26, 6  ;;  %v1201_v31 = vcombine.low %v4353_v61, %v4353_v61 }
 0x29c   :  { %v1292_v0 = vrot.slane %v1276_v58, %v4015_v13 }
 0x29d   :  { %1833 = vrot.lane.b32.xlu1 %v4477_v2, %s3961_s30  ;;  %v1130_v23 = vcombine.low %v1128_v52, %v1128_v52  ;;  %v4563_v46 = vrot.slane %v1114_v8, %v4015_v13  ;;  %v1178_v52 = vcombine.high %v4433_v4, %v4433_v4  ;;  %v4576_v8 = vrot.slane %v1017_v14, %v4015_v13 }
 0x29e   :  { %1541 = vrot.lane.b32.xlu0 %v4487_v11, %s3967_s13  ;;  %v4582_v54 = vsel %vm5560_vm7, %v1426_v20, %v4317_v26  ;;  %v4594_v61 = vrot.slane %v1201_v31, %v4015_v13  ;;  %v1317_v26 = vcombine.high %v4480_v25, %v4480_v25  ;;  %v1254_v25 = vcombine.low %v4383_v15, %v4383_v15 }
 0x29f   :  { %v1700_v15 = vrot.slane %v4389_v24, 6  ;;  %vm5566_vm7 = vcmask 269312  }
 0x2a0   :  { %v1331_v14 = vrot.slane %v1317_v26, %v4015_v13 }
 0x2a1   :  { %1612 = vrot.lane.b32.xlu1 %v4504_v7, %s3953_s17 }
 0x2a2   :  { %1333 = vrot.lane.b32.xlu0 %v4511_v34, %s3957_s21 }
 0x2a5   :  { %1758 = vrot.lane.b32.xlu1 %v4528_v63, %s3965_s9 }
 0x2a6   :  { %1652 = vrot.lane.b32.xlu0 %v1646_v45, %s3951_s16  ;;  %v1163_v45 = vcombine.high %v4413_v51, %v4413_v51  ;;  %v1294_v51 = vcombine.low %v1292_v0, %v1292_v0  ;;  %v1080_v0 = vcombine.low %v4360_v28, %v4360_v28 }
 0x2a9   :  { %989 = vrot.lane.b32.xlu1 %v983_v16, %s3975_s6  ;;  %v1177_v16 = vrot.slane %v1163_v45, %v4015_v13  ;;  %v1554_v45 = vrot.slane %v4319_v29, 6 }
 0x2aa   :  { %1798 = vrot.lane.b32.xlu0 %v1792_v3, %s3963_s7  ;;  %v1278_v3 = vcombine.low %v1276_v58, %v1276_v58 }
 0x2ac   :  { %v4586_v4 = vrot.slane %v1278_v3, %v4015_v13 }
 0x2ad   :  { %1135 = vrot.lane.b32.xlu1 %v1130_v23, %s3970_s25  ;;  %v1423_v23 = vld [vmem:[#allocation3] sm:$0x3f] }
 0x2ae   :  { %987 = vrot.lane.b32.xlu0 %v984_v42, %s3975_s6  ;;  %v1430_v58 = vmul.f32 %v4582_v54, %v1423_v23  ;;  %v1551_v42 = vld [vmem:[#allocation3 + $0x2] sm:$0x3f]  ;;  %v1355_v23 = vcombine.low %v4376_v10, %v4376_v10 }
 0x2b0   :  { %v1446_v20 = vrot.slane %v1430_v58, %v4015_v13  ;;  %v1432_v3 = vcombine.low %v1430_v58, %v1430_v58  ;;  %v1697_v58 = vld [vmem:[#allocation3 + $0x2] sm:$0x3f] }
 0x2b1   :  { %1183 = vrot.lane.b32.xlu1 %v1177_v16, %s3974_s5  ;;  %v4600_v16 = vsel %vm5561_vm5, %v1554_v45, %v4319_v29  ;;  %vm5563_vm5 = vcmask 277504  }
 0x2b2   :  { %1133 = vrot.lane.b32.xlu0 %v4563_v46, %s3970_s25  ;;  %v1448_v29 = vcombine.low %v1446_v20, %v1446_v20  ;;  %v4623_v45 = vrot.slane %v1432_v3, %v4015_v13  ;;  %v1486_v20 = vcombine.low %v4403_v39, %v4403_v39 }
 0x2b5   :  { %1299 = vrot.lane.b32.xlu1 %v1294_v51, %s3956_s20  ;;  %v1557_v51 = vmul.f32 %v4600_v16, %v1551_v42  ;;  %v4633_v42 = vsel %vm5565_vm4, %v1700_v15, %v4389_v24  ;;  %v1408_v24 = vcombine.low %v4458_v55, %v4458_v55  ;;  %v1596_v55 = vcombine.high %v4473_v60, %v4473_v60 }
 0x2b6   :  { %1181 = vrot.lane.b32.xlu0 %v1178_v52, %s3974_s5  ;;  %v1332_v52 = vcombine.high %v4511_v34, %v4511_v34  ;;  %v4629_v34 = vrot.slane %v1355_v23, %v4015_v13  ;;  %v1757_v60 = vcombine.high %v4528_v63, %v4528_v63  ;;  %v1742_v15 = vcombine.high %v4500_v32, %v4500_v32 }
 0x2b7   :  { %v1573_v28 = vrot.slane %v1557_v51, %v4015_v13  ;;  %v1559_v26 = vcombine.low %v1557_v51, %v1557_v51  ;;  %v1537_v51 = vcombine.low %v4487_v11, %v4487_v11  ;;  %v1065_v63 = vcombine.high %v4337_v30, %v4337_v30 }
 0x2b8   :  { %v1683_v32 = vcombine.low %v4451_v37, %v4451_v37  ;;  %v1778_v30 = vcombine.low %v4535_v18, %v4535_v18  ;;  %v1393_v18 = vcombine.high %v4436_v6, %v4436_v6  ;;  %v1370_v6 = vcombine.high %v4629_v34, %v4629_v34 }
 0x2b9   :  { %1033 = vrot.lane.b32.xlu1 %v4576_v8, %s3973_s28  ;;  %v1575_v31 = vcombine.low %v1573_v28, %v1573_v28  ;;  %v4636_v10 = vrot.slane %v1559_v26, %v4015_v13  ;;  %v1843_v28 = vld [vmem:[#allocation3 + $0x2] sm:$0x3f] }
 0x2ba   :  { %1297 = vrot.lane.b32.xlu0 %v4586_v4, %s3956_s20 }
 0x2bd   :  { %1217 = vrot.lane.b32.xlu1 %v4594_v61, %s3972_s27 }
 0x2be   :  { %1082 = vrot.lane.b32.xlu0 %v1080_v0, %s3971_s26  ;;  %v1703_v0 = vmul.f32 %v4633_v42, %v1697_v58 }
 0x2c1   :  { %1337 = vrot.lane.b32.xlu1 %v1331_v14, %s3957_s21  ;;  %v1846_v14 = vrot.slane %v4398_v33, 6 }
 0x2c2   :  { %1256 = vrot.lane.b32.xlu0 %v1254_v25, %s3958_s22  ;;  %v1611_v25 = vcombine.high %v4504_v7, %v4504_v7  ;;  %v1719_v7 = vrot.slane %v1703_v0, %v4015_v13 }
 0x2c3   :  { %v4656_v11 = vsel %vm5566_vm7, %v1846_v14, %v4398_v33 }
 0x2c4   :  { %v1849_v39 = vmul.f32 %v4656_v11, %v1843_v28  ;;  %v1721_v23 = vcombine.low %v1719_v7, %v1719_v7  ;;  %v1785_v28 = vrot.slane %v1778_v30, %v4015_v13  ;;  %v1882_v7 = vpop.permute.xlu1 %1881 }
 0x2c5   :  { %1453 = vrot.lane.b32.xlu1 %v1448_v29, %s3955_s19  ;;  %v1705_v29 = vcombine.low %v1703_v0, %v1703_v0  ;;  %v1756_v0 = vrot.slane %v1742_v15, %v4015_v13 }
 0x2c6   :  { %1335 = vrot.lane.b32.xlu0 %v1332_v52, %s3957_s21  ;;  %v1493_v52 = vrot.slane %v1486_v20, %v4015_v13  ;;  %v1851_v33 = vcombine.low %v1849_v39, %v1849_v39  ;;  %v1865_v58 = vrot.slane %v1849_v39, %v4015_v13  ;;  %v1829_v20 = vcombine.low %v4477_v2, %v4477_v2 }
 0x2c7   :  { %v4665_v3 = vrot.slane %v1705_v29, %v4015_v13  ;;  %v1032_v2 = vcombine.high %v4576_v8, %v4576_v8  ;;  %v1216_v39 = vcombine.high %v4594_v61, %v4594_v61  ;;  %v1522_v8 = vcombine.high %v4461_v40, %v4461_v40 }
 0x2c8   :  { %v4679_v26 = vrot.slane %v1851_v33, %v4015_v13  ;;  %v1867_v14 = vcombine.low %v1865_v58, %v1865_v58  ;;  %v1407_v33 = vrot.slane %v1393_v18, %v4015_v13  ;;  %v1668_v40 = vcombine.high %v4424_v21, %v4424_v21 }
 0x2c9   :  { %1580 = vrot.lane.b32.xlu1 %v1575_v31, %s3966_s10  ;;  %v1610_v31 = vrot.slane %v1596_v55, %v4015_v13  ;;  %v1129_v55 = vcombine.low %v4563_v46, %v4563_v46  ;;  %v1814_v58 = vcombine.high %v4447_v62, %v4447_v62  ;;  %v1793_v18 = vcombine.high %v1785_v28, %v1785_v28 }
 0x2ca   :  { %1451 = vrot.lane.b32.xlu0 %v4623_v45, %s3955_s19  ;;  %v1409_v61 = vcombine.low %v1407_v33, %v1407_v33  ;;  %v1682_v21 = vrot.slane %v1668_v40, %v4015_v13 }
 0x2cd   :  { %1371 = vrot.lane.b32.xlu1 %v4629_v34, %s3969_s15 }
 0x2ce   :  { %1578 = vrot.lane.b32.xlu0 %v4636_v10, %s3966_s10 }
 0x2d1   :  { %1539 = vrot.lane.b32.xlu1 %v1537_v51, %s3967_s13  ;;  %v1632_v51 = vcombine.low %v4507_v38, %v4507_v38 }
 0x2d2   :  { %1410 = vrot.lane.b32.xlu0 %v1408_v24, %s3968_s14  ;;  %v1239_v24 = vcombine.high %v4363_v43, %v4363_v43 }
 0x2d3   :  { %v1639_v37 = vrot.slane %v1632_v51, %v4015_v13 }
 0x2d4   :  { %v1253_v29 = vrot.slane %v1239_v24, %v4015_v13 }
 0x2d5   :  { %1614 = vrot.lane.b32.xlu1 %v1611_v25, %s3953_s17  ;;  %v1079_v25 = vrot.slane %v1065_v63, %v4015_v13  ;;  %v1574_v63 = vcombine.low %v4636_v10, %v4636_v10  ;;  %v1684_v10 = vcombine.low %v1682_v21, %v1682_v21 }
 0x2d6   :  { %1502 = vrot.lane.b32.xlu0 %v1493_v52, %s3954_s18  ;;  %v1255_v43 = vcombine.low %v1253_v29, %v1253_v29 }
 0x2d7   :  { %v1081_v38 = vcombine.low %v1079_v25, %v1079_v25 }
 0x2d9   :  { %1724 = vrot.lane.b32.xlu1 %v4665_v3, %s3962_s4 }
 0x2da   :  { %1616 = vrot.lane.b32.xlu0 %v1610_v31, %s3953_s17  ;;  %v1293_v31 = vcombine.low %v4586_v4, %v4586_v4 }
 0x2dd   :  { %1760 = vrot.lane.b32.xlu1 %v1757_v60, %s3965_s9  ;;  %v1536_v60 = vrot.slane %v1522_v8, %v4015_v13 }
 0x2de   :  { %1726 = vrot.lane.b32.xlu0 %v1721_v23, %s3962_s4  ;;  %v1501_v23 = vcombine.high %v1493_v52, %v1493_v52  ;;  %v1447_v52 = vcombine.low %v4623_v45, %v4623_v45 }
 0x2df   :  { %v1538_v34 = vcombine.low %v1536_v60, %v1536_v60 }
 0x2e1   :  { %1870 = vrot.lane.b32.xlu1 %v4679_v26, %s3960_s29 }
 0x2e2   :  { %1762 = vrot.lane.b32.xlu0 %v1756_v0, %s3965_s9  ;;  %v1883_v0 = vrot.slane %v1882_v7, 6 }
 0x2e4   :  { %v4754_v62 = vsel %vm5563_vm5, %v1883_v0, %v1882_v7 }
 0x2e5   :  { %1685 = vrot.lane.b32.xlu1 %v1683_v32, %s3952_s0 }
 0x2e6   :  { %1872 = vrot.lane.b32.xlu0 %v1867_v14, %s3960_s29  ;;  %v1880_v14 = vld [vmem:[#allocation3 + $0x2] sm:$0x3f] }
 0x2e7   :  { %v1886_v25 = vmul.f32 %v4754_v62, %v1880_v14 }
 0x2e9   :  { %1831 = vrot.lane.b32.xlu1 %v1829_v20, %s3961_s30  ;;  %v1828_v20 = vrot.slane %v1814_v58, %v4015_v13  ;;  %v1888_v33 = vcombine.high %v1886_v25, %v1886_v25  ;;  %v2203_v58 = vld [vmem:[#allocation2] sm:$0x3f] }
 0x2ea   :  { %1648 = vrot.lane.b32.xlu0 %v1639_v37, %s3951_s16 }
 0x2eb   :  { %v1830_v29 = vcombine.low %v1828_v20, %v1828_v20 }
 0x2ed   :  { %1086 = vrot.lane.b32.xlu1 %v1081_v38, %s3971_s26  ;;  %v1647_v38 = vcombine.high %v1639_v37, %v1639_v37 }
 0x2ee   :  { %1794 = vrot.lane.b32.xlu0 %v1785_v28, %s3963_s7  ;;  %v1866_v28 = vcombine.low %v4679_v26, %v4679_v26 }
 0x2f1   :  { %1260 = vrot.lane.b32.xlu1 %v1255_v43, %s3958_s22  ;;  %v1895_v43 = vrot.slane %v1886_v25, %v4015_v13 }
 0x2f2   :  { %1035 = vrot.lane.b32.xlu0 %v1032_v2, %s3973_s28 }
 0x2f5   :  { %1131 = vrot.lane.b32.xlu1 %v1129_v55, %s3970_s25  ;;  %v2046_v55 = vld [vmem:[#allocation2] sm:$0x3f] }
 0x2f6   :  { %1219 = vrot.lane.b32.xlu0 %v1216_v39, %s3972_s27  ;;  %v1720_v39 = vcombine.low %v4665_v3, %v4665_v3  ;;  %v2050_v37 = vmul.bf16 %v2046_v55, %v4070_v41  ;;  %v1902_v41 = vrot.slane %v1888_v33, %v4015_v13  ;;  %v2047_v40 = vmul.bf16 %v2046_v55, %v4076_v50 }
 0x2f8   :  { %v2061_v3 = vrot.slane %v2050_v37, %v4015_v13  ;;  %v2136_v21 = vrot.slane %v2047_v40, %v4015_v13 }
 0x2f9   :  { %1295 = vrot.lane.b32.xlu1 %v1293_v31, %s3956_s20  ;;  %v1903_v31 = vcombine.high %v1895_v43, %v1895_v43 }
 0x2fa   :  { %1373 = vrot.lane.b32.xlu0 %v1370_v6, %s3969_s15  ;;  %v2069_v26 = vcombine.high %v2061_v3, %v2061_v3 }
 0x2fb   :  { %v4729_v46 = vpop.permute.xlu1 %1037 }
 0x2fc   :  { %v4734_v15 = vpop.permute.xlu0 %1084 }
 0x2fd   :  { %1414 = vrot.lane.b32.xlu1 %v1409_v61, %s3968_s14 }
 0x2fe   :  { %1504 = vrot.lane.b32.xlu0 %v1501_v23, %s3954_s18 }
 0x2ff   :  { %v4738_v4 = vpop.permute.xlu1 %1221 }
 0x300   :  { %v4744_v32 = vpop.permute.xlu0 %1258 }
 0x301   :  { %1543 = vrot.lane.b32.xlu1 %v1538_v34, %s3967_s13  ;;  %v2054_v34 = vcombine.high %v2050_v37, %v2050_v37 }
 0x302   :  { %1576 = vrot.lane.b32.xlu0 %v1574_v63, %s3966_s10  ;;  %v2129_v63 = vcombine.high %v2047_v40, %v2047_v40 }
 0x303   :  { %v4751_v51 = vpop.permute.xlu1 %1375  ;;  %v2068_v50 = vrot.slane %v2054_v34, %v4015_v13 }
 0x304   :  { %v986_v24 = vpop.permute.xlu0 %985 }
 0x305   :  { %1449 = vrot.lane.b32.xlu1 %v1447_v52, %s3955_s19  ;;  %v2204_v52 = vmul.bf16 %v2203_v58, %v4082_v53 }
 0x306   :  { %1689 = vrot.lane.b32.xlu0 %v1684_v10, %s3952_s0 }
 0x307   :  { %v4760_v30 = vpop.permute.xlu1 %1506  ;;  %v2215_v20 = vrot.slane %v2204_v52, %v4015_v13  ;;  %v2208_v33 = vcombine.high %v2204_v52, %v2204_v52 }
 0x308   :  { %v4762_v45 = vpop.permute.xlu0 %1179 }
 0x309   :  { %1650 = vrot.lane.b32.xlu1 %v1647_v38, %s3951_s16  ;;  %v2143_v38 = vrot.slane %v2129_v63, %v4015_v13  ;;  %v2222_v58 = vrot.slane %v2208_v33, %v4015_v13 }
 0x30a   :  { %1835 = vrot.lane.b32.xlu0 %v1830_v29, %s3961_s30  ;;  %v2284_v29 = vld [vmem:[#allocation2] sm:$0x3f] }
 0x30b   :  { %v4767_v2 = vpop.permute.xlu1 %1687 }
 0x30c   :  { %v4771_v7 = vpop.permute.xlu0 %1412 }
 0x30d   :  { %1796 = vrot.lane.b32.xlu1 %v1793_v18, %s3963_s7  ;;  %v2144_v18 = vcombine.high %v2136_v21, %v2136_v21 }
 0x30e   :  { %1722 = vrot.lane.b32.xlu0 %v1720_v39, %s3962_s4  ;;  %v2285_v39 = vmul.bf16 %v2284_v29, %v4094_v1 }
 0x30f   :  { %v4776_v8 = vpop.permute.xlu1 %1833 }
 0x310   :  { %v4778_v6 = vpop.permute.xlu0 %1541  ;;  %v2296_v40 = vrot.slane %v2285_v39, %v4015_v13 }
 0x311   :  { %1906 = vrot.lane.b32.xlu1 %v1903_v31, %s3964_s8  ;;  %v2223_v31 = vcombine.high %v2215_v20, %v2215_v20 }
 0x312   :  { %1868 = vrot.lane.b32.xlu0 %v1866_v28, %s3960_s29  ;;  %v2430_v28 = vld [vmem:[#allocation2 + $0x2] sm:$0x3f] }
 0x313   :  { %v4785_v61 = vpop.permute.xlu1 %1612 }
 0x314   :  { %v4787_v60 = vpop.permute.xlu0 %1333 }
 0x315   :  { %1904 = vrot.lane.b32.xlu1 %v1895_v43, %s3964_s8 }
 0x316   :  { %1908 = vrot.lane.b32.xlu0 %v1902_v41, %s3964_s8 }
 0x317   :  { %v4793_v23 = vpop.permute.xlu1 %1758 }
 0x318   :  { %v4795_v0 = vpop.permute.xlu0 %1652 }
 0x319   :  { %2072 = vrot.lane.b32.xlu1 %v2069_v26, %s3956_s20  ;;  %v2431_v26 = vmul.bf16 %v2430_v28, %v4104_v9 }
 0x31a   :  { %2070 = vrot.lane.b32.xlu0 %v2061_v3, %s3956_s20 }
 0x31b   :  { %v990_v14 = vpop.permute.xlu1 %989  ;;  %v2442_v52 = vrot.slane %v2431_v26, %v4015_v13 }
 0x31c   :  { %v4801_v10 = vpop.permute.xlu0 %1798 }
 0x31d   :  { %2145 = vrot.lane.b32.xlu1 %v2136_v21, %s3958_s22 }
 0x31e   :  { %2074 = vrot.lane.b32.xlu0 %v2068_v50, %s3956_s20  ;;  %v2511_v50 = vld [vmem:[#allocation2 + $0x2] sm:$0x3f] }
 0x31f   :  { %v1136_v25 = vpop.permute.xlu1 %1135 }
 0x320   :  { %v988_v43 = vpop.permute.xlu0 %987 }
 0x321   :  { %v992_v55 = vsel %vm5563_vm5, %v986_v24, %v988_v43  ;;  %v993_v53 = vsel %vm5563_vm5, %v988_v43, %v990_v14  ;;  %2149 = vrot.lane.b32.xlu1 %v2143_v38, %s3958_s22  ;;  %v2289_v24 = vcombine.high %v2285_v39, %v2285_v39  ;;  %v2512_v38 = vmul.bf16 %v2511_v50, %v4128_v44 }
 0x322   :  { %996 = vst [vmem:[#allocation4] sm:$0x3] %v992_v55  ;;  %997 = vst [vmem:[#allocation4 + $0x8] sm:$0x3] %v993_v53  ;;  %2147 = vrot.lane.b32.xlu0 %v2144_v18, %s3958_s22  ;;  %v2450_v43 = vcombine.high %v2442_v52, %v2442_v52  ;;  %v2435_v18 = vcombine.high %v2431_v26, %v2431_v26  ;;  %v2592_v55 = vld [vmem:[#allocation2 + $0x2] sm:$0x3f] }
 0x323   :  { %v1184_v37 = vpop.permute.xlu1 %1183  ;;  %v2303_v9 = vrot.slane %v2289_v24, %v4015_v13  ;;  %v2593_v33 = vmul.bf16 %v2592_v55, %v4143_v59  ;;  %vm5584_vm5 = vcmask 777216  }
 0x324   :  { %v4813_v3 = vpop.permute.xlu0 %1133 }
 0x325   :  { %v1139_v41 = vsel %vm1137_vm14, %v4813_v3, %v1136_v25  ;;  %2226 = vrot.lane.b32.xlu1 %v2223_v31, %s3957_s21  ;;  %v2304_v25 = vcombine.high %v2296_v40, %v2296_v40  ;;  %v2523_v31 = vrot.slane %v2512_v38, %v4015_v13 }
 0x326   :  { %1143 = vst [vmem:[#allocation4 + $0x8] sm:$0xc0] %v1139_v41  ;;  %2224 = vrot.lane.b32.xlu0 %v2215_v20, %s3957_s21  ;;  %v2449_v41 = vrot.slane %v2435_v18, %v4015_v13 }
 0x327   :  { %v1300_v1 = vpop.permute.xlu1 %1299  ;;  %v2531_v59 = vcombine.high %v2523_v31, %v2523_v31 }
 0x328   :  { %v1182_v34 = vpop.permute.xlu0 %1181 }
 0x329   :  { %v1186_v63 = vsel %vm5562_vm15, %v4762_v45, %v1182_v34  ;;  %v1187_v21 = vsel %vm5562_vm15, %v1182_v34, %v1184_v37  ;;  %2305 = vrot.lane.b32.xlu1 %v2296_v40, %s3955_s19  ;;  %v2516_v37 = vcombine.high %v2512_v38, %v2512_v38  ;;  %v2604_v40 = vrot.slane %v2593_v33, %v4015_v13  ;;  %v2673_v34 = vld [vmem:[#allocation2 + $0x2] sm:$0x3f] }
 0x32a   :  { %1190 = vst [vmem:[#allocation4 + $0x10] sm:$0x3] %v1186_v63  ;;  %1191 = vst [vmem:[#allocation4 + $0x18] sm:$0x3] %v1187_v21  ;;  %2228 = vrot.lane.b32.xlu0 %v2222_v58, %s3957_s21  ;;  %vm5583_vm15 = vcmask 908288  }
 0x32b   :  { %v4828_v14 = vpop.permute.xlu1 %1033  ;;  %v2612_v50 = vcombine.high %v2604_v40, %v2604_v40 }
 0x32c   :  { %v4831_v20 = vpop.permute.xlu0 %1297 }
 0x32d   :  { %v1303_v45 = vsel %vm182_vm9, %v4831_v20, %v1300_v1  ;;  %2309 = vrot.lane.b32.xlu1 %v2303_v9, %s3955_s19  ;;  %v2530_v1 = vrot.slane %v2516_v37, %v4015_v13 }
 0x32e   :  { %1307 = vst [vmem:[#allocation4 + $0x18] sm:$0xc0] %v1303_v45  ;;  %2307 = vrot.lane.b32.xlu0 %v2304_v25, %s3955_s19  ;;  %v2597_v25 = vcombine.high %v2593_v33, %v2593_v33 }
 0x32f   :  { %v4838_v29 = vpop.permute.xlu1 %1217 }
 0x330   :  { %v1083_v53 = vpop.permute.xlu0 %1082 }
 0x331   :  { %v1089_v39 = vsel %vm1088_vm10, %v1083_v53, %v4734_v15  ;;  %2453 = vrot.lane.b32.xlu1 %v2450_v43, %s3954_s18 }
 0x332   :  { %1093 = vst [vmem:[#allocation4] sm:$0x30] %v1089_v39  ;;  %2451 = vrot.lane.b32.xlu0 %v2442_v52, %s3954_s18  ;;  %v2674_v52 = vmul.bf16 %v2673_v34, %v4161_v19  ;;  %v2611_v19 = vrot.slane %v2597_v25, %v4015_v13 }
 0x333   :  { %v1338_v44 = vpop.permute.xlu1 %1337 }
 0x334   :  { %v1257_v28 = vpop.permute.xlu0 %1256  ;;  %v2685_v43 = vrot.slane %v2674_v52, %v4015_v13 }
 0x335   :  { %v1263_v24 = vsel %vm260_vm13, %v1257_v28, %v4744_v32  ;;  %2532 = vrot.lane.b32.xlu1 %v2523_v31, %s3953_s17 }
 0x336   :  { %1267 = vst [vmem:[#allocation4 + $0x10] sm:$0x30] %v1263_v24  ;;  %2455 = vrot.lane.b32.xlu0 %v2449_v41, %s3954_s18 }
 0x337   :  { %v1454_v26 = vpop.permute.xlu1 %1453 }
 0x338   :  { %v1336_v58 = vpop.permute.xlu0 %1335 }
 0x339   :  { %v1340_v63 = vsel %vm356_vm11, %v4787_v60, %v1336_v58  ;;  %v1341_v21 = vsel %vm356_vm11, %v1336_v58, %v1338_v44  ;;  %2536 = vrot.lane.b32.xlu1 %v2530_v1, %s3953_s17  ;;  %v2678_v60 = vcombine.high %v2674_v52, %v2674_v52  ;;  %v2693_v44 = vcombine.high %v2685_v43, %v2685_v43 }
 0x33a   :  { %1344 = vst [vmem:[#allocation4 + $0x20] sm:$0x3] %v1340_v63  ;;  %1345 = vst [vmem:[#allocation4 + $0x28] sm:$0x3] %v1341_v21  ;;  %2534 = vrot.lane.b32.xlu0 %v2531_v59, %s3953_s17 }
 0x33b   :  { %v1581_v9 = vpop.permute.xlu1 %1580  ;;  %v2692_v37 = vrot.slane %v2678_v60, %v4015_v13 }
 0x33c   :  { %v4859_v45 = vpop.permute.xlu0 %1451 }
 0x33d   :  { %v1457_v38 = vsel %vm444_vm8, %v4859_v45, %v1454_v26  ;;  %2615 = vrot.lane.b32.xlu1 %v2612_v50, %s3951_s16 }
 0x33e   :  { %1461 = vst [vmem:[#allocation4 + $0x28] sm:$0xc0] %v1457_v38  ;;  %2613 = vrot.lane.b32.xlu0 %v2604_v40, %s3951_s16 }
 0x33f   :  { %v4866_v18 = vpop.permute.xlu1 %1371 }
 0x340   :  { %v4868_v55 = vpop.permute.xlu0 %1578 }
 0x341   :  { %v1583_v53 = vsel %vm1350_vm1, %v4868_v55, %v1581_v9  ;;  %2694 = vrot.lane.b32.xlu1 %v2685_v43, %s3952_s0 }
 0x342   :  { %1587 = vst [vmem:[#allocation4 + $0x38] sm:$0xc0] %v1583_v53  ;;  %2617 = vrot.lane.b32.xlu0 %v2611_v19, %s3951_s16 }
 0x343   :  { %v1540_v39 = vpop.permute.xlu1 %1539 }
 0x344   :  { %v1411_v31 = vpop.permute.xlu0 %1410  ;;  %v1545_v33 = vsel %vm1388_vm12, %v1540_v39, %v4778_v6 }
 0x345   :  { %v1417_v28 = vsel %vm1416_vm2, %v1411_v31, %v4771_v7  ;;  %1549 = vst [vmem:[#allocation4 + $0x30] sm:$0x30] %v1545_v33  ;;  %2698 = vrot.lane.b32.xlu1 %v2692_v37, %s3952_s0 }
 0x346   :  { %1421 = vst [vmem:[#allocation4 + $0x20] sm:$0x30] %v1417_v28  ;;  %2696 = vrot.lane.b32.xlu0 %v2693_v44, %s3952_s0 }
 0x347   :  { %v1615_v41 = vpop.permute.xlu1 %1614 }
 0x348   :  { %v1503_v24 = vpop.permute.xlu0 %1502  ;;  %v1618_v40 = vsel %vm5564_vm6, %v4785_v61, %v1615_v41 }
 0x349   :  { %1622 = vst [vmem:[#allocation4 + $0x40] sm:$0x3] %v1618_v40 }
 0x34b   :  { %v4884_v26 = vpop.permute.xlu1 %1724 }
 0x34c   :  { %v1617_v1 = vpop.permute.xlu0 %1616 }
 0x34d   :  { %v1619_v34 = vsel %vm5564_vm6, %v1615_v41, %v1617_v1  ;;  %vm5585_vm6 = vcmask 785408  }
 0x34e   :  { %1623 = vst [vmem:[#allocation4 + $0x48] sm:$0x3] %v1619_v34 }
 0x34f   :  { %v1761_v58 = vpop.permute.xlu1 %1760 }
 0x350   :  { %v1727_v59 = vpop.permute.xlu0 %1726  ;;  %v1764_v63 = vsel %vm5569_vm3, %v4793_v23, %v1761_v58 }
 0x351   :  { %v1729_v21 = vsel %vm5570_vm0, %v4884_v26, %v1727_v59  ;;  %1768 = vst [vmem:[#allocation4 + $0x50] sm:$0x3] %v1764_v63 }
 0x352   :  { %1733 = vst [vmem:[#allocation4 + $0x48] sm:$0xc0] %v1729_v21 }
 0x353   :  { %v4891_v52 = vpop.permute.xlu1 %1870 }
 0x354   :  { %v1763_v61 = vpop.permute.xlu0 %1762 }
 0x355   :  { %v1765_v9 = vsel %vm5569_vm3, %v1761_v58, %v1763_v61  ;;  %vm5611_vm3 = vcmask 1039360  }
 0x356   :  { %1769 = vst [vmem:[#allocation4 + $0x58] sm:$0x3] %v1765_v9 }
 0x357   :  { %v1686_v50 = vpop.permute.xlu1 %1685 }
 0x358   :  { %v1873_v25 = vpop.permute.xlu0 %1872  ;;  %v1691_v38 = vsel %vm5583_vm15, %v1686_v50, %v4767_v2  ;;  %vm5588_vm15 = vcmask 1039360  }
 0x359   :  { %v1875_v60 = vsel %vm5584_vm5, %v4891_v52, %v1873_v25  ;;  %1695 = vst [vmem:[#allocation4 + $0x40] sm:$0x30] %v1691_v38  ;;  %vm5586_vm5 = vcmask 113664  }
 0x35a   :  { %1879 = vst [vmem:[#allocation4 + $0x58] sm:$0xc0] %v1875_v60 }
 0x35b   :  { %v1832_v23 = vpop.permute.xlu1 %1831 }
 0x35c   :  { %v1649_v43 = vpop.permute.xlu0 %1648  ;;  %v1837_v19 = vsel %vm5585_vm6, %v1832_v23, %v4776_v8  ;;  %vm5587_vm6 = vmmov %vm5586_vm5 }
 0x35d   :  { %1841 = vst [vmem:[#allocation4 + $0x50] sm:$0x30] %v1837_v19 }
 0x35f   :  { %v1087_v53 = vpop.permute.xlu1 %1086 }
 0x360   :  { %v4900_v39 = vpop.permute.xlu0 %1794  ;;  %v1090_v37 = vsel %vm1088_vm10, %v4734_v15, %v1087_v53 }
 0x361   :  { %1094 = vst [vmem:[#allocation4 + $0x8] sm:$0x30] %v1090_v37 }
 0x363   :  { %v1261_v31 = vpop.permute.xlu1 %1260 }
 0x364   :  { %v1036_v33 = vpop.permute.xlu0 %1035  ;;  %v1264_v44 = vsel %vm260_vm13, %v4744_v32, %v1261_v31 }
 0x365   :  { %v1040_v28 = vsel %vm5566_vm7, %v4828_v14, %v1036_v33  ;;  %v1041_v41 = vsel %vm5566_vm7, %v1036_v33, %v4729_v46  ;;  %1268 = vst [vmem:[#allocation4 + $0x18] sm:$0x30] %v1264_v44 }
 0x366   :  { %1044 = vst [vmem:[#allocation4] sm:$0xc] %v1040_v28  ;;  %1045 = vst [vmem:[#allocation4 + $0x8] sm:$0xc] %v1041_v41 }
 0x367   :  { %v1132_v40 = vpop.permute.xlu1 %1131 }
 0x368   :  { %v1220_v1 = vpop.permute.xlu0 %1219  ;;  %v1138_v15 = vsel %vm1137_vm14, %v1132_v40, %v4813_v3 }
 0x369   :  { %v1224_v34 = vsel %vm5565_vm4, %v4838_v29, %v1220_v1  ;;  %v1225_v32 = vsel %vm5565_vm4, %v1220_v1, %v4738_v4  ;;  %1142 = vst [vmem:[#allocation4] sm:$0xc0] %v1138_v15  ;;  %vm5589_vm4 = vmmov %vm5588_vm15 }
 0x36a   :  { %1228 = vst [vmem:[#allocation4 + $0x10] sm:$0xc] %v1224_v34  ;;  %1229 = vst [vmem:[#allocation4 + $0x18] sm:$0xc] %v1225_v32 }
 0x36b   :  { %v1296_v14 = vpop.permute.xlu1 %1295 }
 0x36c   :  { %v1374_v58 = vpop.permute.xlu0 %1373  ;;  %v1302_v46 = vsel %vm182_vm9, %v1296_v14, %v4831_v20 }
 0x36d   :  { %v1378_v59 = vsel %vm5586_vm5, %v4866_v18, %v1374_v58  ;;  %v1379_v3 = vsel %vm5587_vm6, %v1374_v58, %v4751_v51  ;;  %1306 = vst [vmem:[#allocation4 + $0x10] sm:$0xc0] %v1302_v46  ;;  %v1917_v20 = vld [vmem:[#allocation4 + $0x8] sm:$0xff]  ;;  %vm5591_vm5 = vcmask 916480  }
 0x36e   :  { %1382 = vst [vmem:[#allocation4 + $0x20] sm:$0xc] %v1378_v59  ;;  %1383 = vst [vmem:[#allocation4 + $0x28] sm:$0xc] %v1379_v3 }
 0x36f   :  { %v1415_v29 = vpop.permute.xlu1 %1414  ;;  %vm5592_vm6 = vmmov %vm5591_vm5 }
 0x370   :  { %v1505_v63 = vpop.permute.xlu0 %1504  ;;  %v1418_v4 = vsel %vm1416_vm2, %v4771_v7, %v1415_v29  ;;  %v1916_v38 = vld [vmem:[#allocation4] sm:$0xff] }
 0x371   :  { %v1508_v21 = vsel %vm5588_vm15, %v1503_v24, %v1505_v63  ;;  %v1509_v61 = vsel %vm5589_vm4, %v1505_v63, %v4760_v30  ;;  %1422 = vst [vmem:[#allocation4 + $0x28] sm:$0x30] %v1418_v4  ;;  %v1919_v9 = vld [vmem:[#allocation4 + $0x18] sm:$0xff]  ;;  %vm5590_vm4 = vcmask 908288   ;;  %vm5593_vm15 = vcmask 785408  }
 0x372   :  { %1512 = vst [vmem:[#allocation4 + $0x30] sm:$0xc] %v1508_v21  ;;  %1513 = vst [vmem:[#allocation4 + $0x38] sm:$0xc] %v1509_v61  ;;  %v3786_v18 = vpack.c.bf16 %v1919_v9, %v1917_v20 }
 0x373   :  { %v1544_v51 = vpop.permute.xlu1 %1543 }
 0x374   :  { %v1577_v50 = vpop.permute.xlu0 %1576  ;;  %3787 = vmatprep.subr.bf16.mxu1 %v3786_v18  ;;  %v1546_v25 = vsel %vm1388_vm12, %v4778_v6, %v1544_v51  ;;  %v1918_v60 = vld [vmem:[#allocation4 + $0x10] sm:$0xff] }
 0x375   :  { %v1582_v7 = vsel %vm1350_vm1, %v1577_v50, %v4868_v55  ;;  %1550 = vst [vmem:[#allocation4 + $0x38] sm:$0x30] %v1546_v25  ;;  %v3788_v24 = vpack.c.bf16 %v1918_v60, %v1916_v38  ;;  %v118_v51 = vld [vmem:[%s5535_s2] sm:$0x1] }
 0x376   :  { %1586 = vst [vmem:[#allocation4 + $0x30] sm:$0xc0] %v1582_v7 }
 0x377   :  { %3789 = vmatpush1.bf16.msra.mxu1 %v3788_v24  ;;  %v1450_v30 = vpop.permute.xlu1 %1449 }
 0x378   :  { %v1690_v23 = vpop.permute.xlu0 %1689  ;;  %v1456_v19 = vsel %vm444_vm8, %v1450_v30, %v4859_v45  ;;  %v1921_v33 = vld [vmem:[#allocation4 + $0x28] sm:$0xff] }
 0x379   :  { %v1692_v53 = vsel %vm5590_vm4, %v4767_v2, %v1690_v23  ;;  %1460 = vst [vmem:[#allocation4 + $0x20] sm:$0xc0] %v1456_v19  ;;  %vm5594_vm4 = vcmask 793600   ;;  %v5601_v23 = vmov 0   ;;  %v3750_v19 = vld [vmem:[%s5534_s1 + $0x28] sm:$0xf] }
 0x37a   :  { %1696 = vst [vmem:[#allocation4 + $0x48] sm:$0x30] %v1692_v53 }
 0x37b   :  { %v1651_v6 = vpop.permute.xlu1 %1650 }
 0x37c   :  { %v1836_v37 = vpop.permute.xlu0 %1835  ;;  %v1654_v31 = vsel %vm5591_vm5, %v1649_v43, %v1651_v6  ;;  %v1655_v55 = vsel %vm5592_vm6, %v1651_v6, %v4795_v0  ;;  %v1923_v44 = vld [vmem:[#allocation4 + $0x38] sm:$0xff]  ;;  %vm5595_vm5 = vmmov %vm5594_vm4  ;;  %vm5596_vm6 = vcmask 777216  }
 0x37d   :  { %v1838_v28 = vsel %vm5593_vm15, %v4776_v8, %v1836_v37  ;;  %1658 = vst [vmem:[#allocation4 + $0x40] sm:$0xc] %v1654_v31  ;;  %1659 = vst [vmem:[#allocation4 + $0x48] sm:$0xc] %v1655_v55  ;;  %v3790_v45 = vpack.c.bf16 %v1923_v44, %v1921_v33  ;;  %v1922_v0 = vld [vmem:[#allocation4 + $0x30] sm:$0xff]  ;;  %vm5597_vm15 = vcmask 769024  }
 0x37e   :  { %1842 = vst [vmem:[#allocation4 + $0x58] sm:$0x30] %v1838_v28  ;;  %v3749_v28 = vld [vmem:[%s5534_s1 + $0x24] sm:$0xf] }
 0x37f   :  { %3791 = vmatprep.subr.bf16.mxu1 %v3790_v45  ;;  %v1797_v2 = vpop.permute.xlu1 %1796 }
 0x380   :  { %v1723_v41 = vpop.permute.xlu0 %1722  ;;  %v1800_v40 = vsel %vm5594_vm4, %v4900_v39, %v1797_v2  ;;  %v1801_v43 = vsel %vm5595_vm5, %v1797_v2, %v4801_v10  ;;  %v1920_v1 = vld [vmem:[#allocation4 + $0x20] sm:$0xff]  ;;  %vm5598_vm4 = vmmov %vm5597_vm15  ;;  %vm5567_vm5 = vcmask 1042432  }
 0x381   :  { %v1728_v15 = vsel %vm5570_vm0, %v1723_v41, %v4884_v26  ;;  %1804 = vst [vmem:[#allocation4 + $0x50] sm:$0xc] %v1800_v40  ;;  %1805 = vst [vmem:[#allocation4 + $0x58] sm:$0xc] %v1801_v43  ;;  %v3792_v8 = vpack.c.bf16 %v1922_v0, %v1920_v1  ;;  %v2365_v41 = vld [vmem:[#allocation2 + $0x2] sm:$0xf] }
 0x382   :  { %1732 = vst [vmem:[#allocation4 + $0x40] sm:$0xc0] %v1728_v15  ;;  %v2366_v1 = vmul.bf16 %v2365_v41, %v4022_v17  ;;  %v3758_v17 = vld [vmem:[%s5534_s1 + $0x30] sm:$0xf] }
 0x383   :  { %3793 = vmatpush1.bf16.msra.mxu1 %v3792_v8  ;;  %v1907_v34 = vpop.permute.xlu1 %1906  ;;  %v3755_v8 = vld [vmem:[%s5534_s1 + $0x2c] sm:$0xf] }
 0x384   :  { %v1869_v32 = vpop.permute.xlu0 %1868  ;;  %v1925_v46 = vld [vmem:[#allocation4 + $0x48] sm:$0xff]  ;;  %v2376_v0 = vrot.slane %v2366_v1, %v4015_v13 }
 0x385   :  { %v1874_v14 = vsel %vm5596_vm6, %v1869_v32, %v4891_v52  ;;  %vm5568_vm6 = vcmask 416768  }
 0x386   :  { %1878 = vst [vmem:[#allocation4 + $0x50] sm:$0xc0] %v1874_v14 }
 0x387   :  { %v1905_v39 = vpop.permute.xlu1 %1904 }
 0x388   :  { %v1909_v58 = vpop.permute.xlu0 %1908  ;;  %v1910_v10 = vsel %vm5597_vm15, %v1905_v39, %v1907_v34  ;;  %v1927_v59 = vld [vmem:[#allocation4 + $0x58] sm:$0xff]  ;;  %vm5599_vm15 = vcmask 1041408  }
 0x389   :  { %v1911_v3 = vsel %vm5598_vm4, %v1907_v34, %v1909_v58  ;;  %1914 = vst [vmem:[#allocation4 + $0x60] sm:$0x3] %v1910_v10  ;;  %v3794_v26 = vpack.c.bf16 %v1927_v59, %v1925_v46  ;;  %v1924_v4 = vld [vmem:[#allocation4 + $0x40] sm:$0xff]  ;;  %vm5600_vm4 = vmmov %vm5599_vm15  ;;  %v2377_v34 = vcombine.high %v2376_v0, %v2376_v0 }
 0x38a   :  { %1915 = vst [vmem:[#allocation4 + $0x68] sm:$0x3] %v1911_v3  ;;  %vm5602_vm7 = vmmov %vm5600_vm4 }
 0x38b   :  { %3795 = vmatprep.subr.bf16.mxu1 %v3794_v26  ;;  %v2073_v29 = vpop.permute.xlu1 %2072  ;;  %v3761_v26 = vld [vmem:[%s5534_s1 + $0x34] sm:$0xf] }
 0x38c   :  { %v2071_v63 = vpop.permute.xlu0 %2070 }
 0x38d   :  { %v1926_v21 = vld [vmem:[#allocation4 + $0x50] sm:$0xff]  ;;  %v2076_v18 = vsel %vm182_vm9, %v2071_v63, %v2073_v29 }
 0x38e   :  { %v3796_v61 = vpack.c.bf16 %v1926_v21, %v1924_v4  ;;  %v2082_v7 = vsel %vm5599_vm15, %v2076_v18, 0  ;;  %vm5603_vm15 = vmmov %vm5600_vm4 }
 0x38f   :  { %v2146_v20 = vpop.permute.xlu1 %2145 }
 0x390   :  { %v2075_v52 = vpop.permute.xlu0 %2074  ;;  %3797 = vmatpush1.bf16.msra.mxu1 %v3796_v61  ;;  %v1928_v50 = vld [vmem:[#allocation4 + $0x60] sm:$0x7] }
 0x391   :  { %v1929_v9 = vld [vmem:[#allocation4 + $0x68] sm:$0x7]  ;;  %v2077_v38 = vsel %vm182_vm9, %v2073_v29, %v2075_v52 }
 0x392   :  { %3742 = vmatprep.subr.msk.mxu1 %vm5567_vm5, %v1929_v9  ;;  %v3764_v52 = vld [vmem:[%s5534_s1 + $0x38] sm:$0xf] }
 0x393   :  { %v2150_v25 = vpop.permute.xlu1 %2149 }
 0x394   :  { %v2148_v60 = vpop.permute.xlu0 %2147  ;;  %3743 = vmatpush1.msk.msra.mxu1 %vm5567_vm5, %v1928_v50  ;;  %vm5604_vm5 = vcmask 31744  }
 0x395   :  { %v2152_v24 = vsel %vm260_vm13, %v2148_v60, %v2150_v25  ;;  %3744 = vmatmul.mubr.msk.f32.vlgmr.msra.gmra.mrb[0].mxu1 %vm5568_vm6, %v118_v51  ;;  %3751 = vmatprep.subr.msk.bf16.mxu1 %vm5600_vm4, %v2077_v38  ;;  %v2151_v30 = vsel %vm260_vm13, %v2146_v20, %v2148_v60  ;;  %v3767_v60 = vld [vmem:[%s5534_s1 + $0x3c] sm:$0xf] }
 0x396   :  { %2088 = vmatpush1.bf16.msra.mxu1 %v2082_v7  ;;  %2119 = vmatprep.mubr.bf16.mxu1 %v5601_v23  ;;  %v2157_v37 = vsel %vm5603_vm15, %v2151_v30, 0  ;;  %vm5606_vm15 = vmmov %vm5600_vm4 }
 0x397   :  { %3753 = vmatprep.subr.msk.bf16.mxu1 %vm5602_vm7, %v2152_v24  ;;  %v2227_v53 = vpop.permute.xlu1 %2226  ;;  %vm5605_vm7 = vmmov %vm5600_vm4 }
 0x398   :  { %v2225_v6 = vpop.permute.xlu0 %2224 }
 0x399   :  { %3752 = vmatmul.mubr.msk.bf16.vlgmr.msra.gmra.mrb[4].mxu1 %vm5604_vm5, %v3750_v19  ;;  %v2230_v44 = vsel %vm356_vm11, %v2225_v6, %v2227_v53  ;;  %v3770_v6 = vld [vmem:[%s5534_s1 + $0x40] sm:$0xf] }
 0x39a   :  { %2163 = vmatpush1.bf16.msra.mxu1 %v2157_v37  ;;  %2194 = vmatprep.mubr.bf16.mxu1 %v5601_v23  ;;  %v2236_v40 = vsel %vm5605_vm7, %v2230_v44, 0  ;;  %vm5607_vm7 = vmmov %vm5604_vm5 }
 0x39b   :  { %v2306_v33 = vpop.permute.xlu1 %2305  ;;  %vm5610_vm6 = vmmov %vm5607_vm7 }
 0x39c   :  { %v2229_v31 = vpop.permute.xlu0 %2228 }
 0x39d   :  { %v2231_v55 = vsel %vm356_vm11, %v2227_v53, %v2229_v31  ;;  %v3773_v31 = vld [vmem:[%s5534_s1 + $0x44] sm:$0xf] }
 0x39e   :  { %3756 = vmatprep.subr.msk.bf16.mxu1 %vm5600_vm4, %v2231_v55 }
 0x39f   :  { %v2310_v2 = vpop.permute.xlu1 %2309 }
 0x3a0   :  { %v2308_v45 = vpop.permute.xlu0 %2307 }
 0x3a1   :  { %v2312_v43 = vsel %vm444_vm8, %v2308_v45, %v2310_v2  ;;  %v2311_v15 = vsel %vm444_vm8, %v2306_v33, %v2308_v45 }
 0x3a2   :  { %v2317_v32 = vsel %vm5600_vm4, %v2311_v15, 0 }
 0x3a3   :  { %v2454_v39 = vpop.permute.xlu1 %2453 }
 0x3a4   :  { %v2452_v14 = vpop.permute.xlu0 %2451 }
 0x3a5   :  { %3754 = vmatmul.mubr.msk.bf16.vlgmr.msra.gmra.mrb[4].mxu1 %vm5604_vm5, %v3749_v28  ;;  %vm5608_vm5 = vmmov %vm5600_vm4 }
 0x3a6   :  { %2242 = vmatpush1.bf16.msra.mxu1 %v2236_v40  ;;  %2273 = vmatprep.mubr.bf16.mxu1 %v5601_v23 }
 0x3a7   :  { %3759 = vmatprep.subr.msk.bf16.mxu1 %vm5606_vm15, %v2312_v43  ;;  %vm5609_vm15 = vmmov %vm5600_vm4  ;;  %v2533_v59 = vpop.permute.xlu1 %2532 }
 0x3a8   :  { %v2456_v58 = vpop.permute.xlu0 %2455  ;;  %v2382_v10 = vsel %vm5609_vm15, %v2376_v0, 0  ;;  %vm5614_vm15 = vmmov %vm5610_vm6 }
 0x3a9   :  { %v2458_v46 = vsel %vm5611_vm3, %v2454_v39, %v2456_v58 }
 0x3ab   :  { %v2537_v63 = vpop.permute.xlu1 %2536 }
 0x3ac   :  { %v2535_v29 = vpop.permute.xlu0 %2534 }
 0x3af   :  { %v2616_v9 = vpop.permute.xlu1 %2615 }
 0x3b0   :  { %v2614_v61 = vpop.permute.xlu0 %2613 }
 0x3b1   :  { %3757 = vmatmul.mubr.msk.bf16.vlgmr.msra.gmra.mrb[4].mxu1 %vm5607_vm7, %v3755_v8  ;;  %vm5612_vm7 = vmmov %vm5611_vm3 }
 0x3b2   :  { %2323 = vmatpush1.bf16.msra.mxu1 %v2317_v32  ;;  %2354 = vmatprep.mubr.bf16.mxu1 %v5601_v23  ;;  %v2457_v3 = vsel %vm5612_vm7, %v2452_v14, %v2454_v39  ;;  %vm5616_vm3 = vmmov %vm5600_vm4 }
 0x3b3   :  { %3762 = vmatprep.subr.msk.bf16.mxu1 %vm5608_vm5, %v2377_v34  ;;  %vm5613_vm5 = vmmov %vm5600_vm4  ;;  %v2695_v25 = vpop.permute.xlu1 %2694 }
 0x3b4   :  { %v2463_v4 = vsel %vm5613_vm5, %v2457_v3, 0  ;;  %v2618_v18 = vpop.permute.xlu0 %2617  ;;  %vm5618_vm7 = vmmov %vm5616_vm3 }
 0x3b5   :  { %vm5619_vm5 = vmmov %vm5614_vm15 }
 0x3b7   :  { %v2699_v24 = vpop.permute.xlu1 %2698 }
 0x3b8   :  { %v2697_v7 = vpop.permute.xlu0 %2696 }
 0x3bd   :  { %3760 = vmatmul.mubr.msk.bf16.vlgmr.msra.gmra.mrb[4].mxu1 %vm5610_vm6, %v3758_v17  ;;  %vm5615_vm6 = vcmask 924672  }
 0x3be   :  { %2388 = vmatpush1.bf16.msra.mxu1 %v2382_v10  ;;  %2419 = vmatprep.mubr.bf16.mxu1 %v5601_v23  ;;  %v2539_v21 = vsel %vm5615_vm6, %v2535_v29, %v2537_v63 }
 0x3bf   :  { %3765 = vmatprep.subr.msk.bf16.mxu1 %vm5600_vm4, %v2458_v46  ;;  %vm5617_vm4 = vmmov %vm5615_vm6 }
 0x3c0   :  { %v2538_v20 = vsel %vm5617_vm4, %v2533_v59, %v2535_v29  ;;  %vm5621_vm6 = vmmov %vm5616_vm3 }
 0x3c1   :  { %v2544_v51 = vsel %vm5618_vm7, %v2538_v20, 0  ;;  %vm5623_vm4 = vmmov %vm5621_vm6 }
 0x3c2   :  { %vm5624_vm7 = vmmov %vm5619_vm5 }
 0x3c3   :  { %vm5629_vm0 = vmmov %vm5624_vm7 }
 0x3c9   :  { %3763 = vmatmul.mubr.msk.bf16.vlgmr.msra.gmra.mrb[4].mxu1 %vm5614_vm15, %v3761_v26  ;;  %vm5620_vm15 = vcmask 916480  }
 0x3ca   :  { %2469 = vmatpush1.bf16.msra.mxu1 %v2463_v4  ;;  %2500 = vmatprep.mubr.bf16.mxu1 %v5601_v23  ;;  %v2620_v50 = vsel %vm5620_vm15, %v2616_v9, %v2618_v18 }
 0x3cb   :  { %3768 = vmatprep.subr.msk.bf16.mxu1 %vm5616_vm3, %v2539_v21  ;;  %vm5622_vm3 = vmmov %vm5620_vm15 }
 0x3cc   :  { %v2619_v38 = vsel %vm5622_vm3, %v2614_v61, %v2616_v9  ;;  %vm5626_vm15 = vmmov %vm5623_vm4 }
 0x3cd   :  { %v2625_v30 = vsel %vm5623_vm4, %v2619_v38, 0  ;;  %vm5628_vm3 = vmmov %vm5623_vm4 }
 0x3ce   :  { %vm5630_vm4 = vmmov %vm5629_vm0 }
 0x3d5   :  { %3766 = vmatmul.mubr.msk.bf16.vlgmr.msra.gmra.mrb[4].mxu1 %vm5619_vm5, %v3764_v52  ;;  %vm5625_vm5 = vcmask 908288  }
 0x3d6   :  { %2550 = vmatpush1.bf16.msra.mxu1 %v2544_v51  ;;  %2581 = vmatprep.mubr.bf16.mxu1 %v5601_v23  ;;  %v2701_v19 = vsel %vm5625_vm5, %v2697_v7, %v2699_v24 }
 0x3d7   :  { %3771 = vmatprep.subr.msk.bf16.mxu1 %vm5621_vm6, %v2620_v50  ;;  %vm5627_vm6 = vmmov %vm5625_vm5  ;;  %vm5645_vm5 = vcmask 277504  }
 0x3d8   :  { %v2700_v53 = vsel %vm5627_vm6, %v2695_v25, %v2697_v7  ;;  %vm5647_vm6 = vcmask 244736  }
 0x3d9   :  { %v2706_v37 = vsel %vm5628_vm3, %v2700_v53, 0  ;;  %vm5648_vm3 = vmmov %vm5647_vm6 }
 0x3e1   :  { %3769 = vmatmul.mubr.msk.bf16.vlgmr.msra.gmra.mrb[4].mxu1 %vm5624_vm7, %v3767_v60 }
 0x3e2   :  { %2631 = vmatpush1.bf16.msra.mxu1 %v2625_v30  ;;  %2662 = vmatprep.mubr.bf16.mxu1 %v5601_v23 }
 0x3e3   :  { %3774 = vmatprep.subr.msk.bf16.mxu1 %vm5626_vm15, %v2701_v19  ;;  %vm5646_vm15 = vmmov %vm5645_vm5 }
 0x3ed   :  { %3772 = vmatmul.mubr.msk.bf16.vlgmr.msra.gmra.mrb[4].mxu1 %vm5629_vm0, %v3770_v6  ;;  %vm5631_vm0 = vcmask 1040384  }
 0x3ee   :  { %2712 = vmatpush1.bf16.msra.mxu1 %v2706_v37  ;;  %2743 = vmatprep.mubr.bf16.mxu1 %v5601_v23  ;;  %v5038_v23 = vsub.s32 0, %v4006_v5  ;;  %vm5632_vm7 = vmmov %vm5631_vm0 }
 0x3f9   :  { %3775 = vmatmul.mubr.msk.bf16.vlgmr.msra.gmra.mrb[4].mxu1 %vm5630_vm4, %v3773_v31 }
 0x468   :  { %v2007_v55 = vpop.f32.mrb[0].mxu1 }
 0x469   :  { %v3745_v33 = vmul.f32 -1.442695, %v2007_v55  ;;  %v2009_v44 = vpop.f32.mrb[1].mxu1 }
 0x46a   :  { %v3746_v28 = vmul.f32 -1.442695, %v2009_v44 }
 0x46b   :  { %3906 = vpow2.f32 %v3745_v33 }
 0x46c   :  { %3908 = vpow2.f32 %v3746_v28 }
 0x475   :  { %v3907_v45 = vpop.eup %3906 }
 0x476   :  { %v3909_v2 = vpop.eup %3908  ;;  %v2018_v41 = vadd.f32 1.0, %v3907_v45 }
 0x477   :  { %v2019_v40 = vadd.f32 1.0, %v3909_v2 }
 0x478   :  { %3910 = vrcp.f32 %v2018_v41 }
 0x479   :  { %3912 = vrcp.f32 %v2019_v40 }
 0x482   :  { %v3911_v43 = vpop.eup %3910 }
 0x483   :  { %v3913_v1 = vpop.eup %3912  ;;  %v2027_v0 = vrot.slane %v3911_v43, %v5038_v23 }
 0x484   :  { %v2031_v15 = vrot.slane %v3913_v1, %v5038_v23 }
 0x485   :  { %v2032_v8 = vmul.f32 %v2027_v0, %v4299_v48 }
 0x486   :  { %v2033_v34 = vmul.f32 %v2031_v15, %v4302_v27 }
 0x488   :  { %v3784_v32 = vpack.c.bf16 %v2033_v34, %v2032_v8 }
 0x48a   :  { %2042 = vst [vmem:[#allocation5] sm:$0xff] %v3784_v32  ;;  %v5633_v32 = vld [vmem:[#allocation9_spill] sm:$0xff] }
 0x4cc   :  { %v5044_v14 = vpop.f32.mrb[4].mxu1 }
 0x4cd   :  { %v2754_v17 = vrot.slane %v5044_v14, 4  ;;  %v5047_v39 = vpop.f32.mrb[5].mxu1 }
 0x4ce   :  { %v2760_v5 = vrot.slane %v5047_v39, 4  ;;  %v2749_v58 = vpop.f32.mrb[6].mxu1 }
 0x4cf   :  { %v2755_v10 = vadd.f32 %v2754_v17, %v5044_v14  ;;  %v2769_v46 = vmax.f32 %v5044_v14, %v2754_v17  ;;  %v2750_v59 = vpop.f32.mrb[7].mxu1 }
 0x4d0   :  { %v2761_v48 = vadd.f32 %v2760_v5, %v5047_v39  ;;  %v2775_v27 = vmax.f32 %v5047_v39, %v2760_v5 }
 0x4d1   :  { %v2756_v3 = vrot.slane %v2755_v10, 2  ;;  %v2770_v26 = vrot.slane %v2769_v46, 2 }
 0x4d2   :  { %v2762_v29 = vrot.slane %v2761_v48, 2  ;;  %v2776_v63 = vrot.slane %v2775_v27, 2 }
 0x4d3   :  { %v2757_v4 = vadd.f32 %v2756_v3, %v2755_v10  ;;  %v2771_v21 = vmax.f32 %v2769_v46, %v2770_v26  ;;  %v5634_v10 = vld [vmem:[#allocation10_spill] sm:$0xff] }
 0x4d4   :  { %v2763_v61 = vadd.f32 %v2762_v29, %v2761_v48  ;;  %v2777_v20 = vmax.f32 %v2775_v27, %v2776_v63  ;;  %v5636_v29 = vld [vmem:[#allocation12_spill] sm:$0xff] }
 0x4d5   :  { %v2758_v52 = vrot.slane %v2757_v4, 1  ;;  %v2772_v9 = vrot.slane %v2771_v21, 1 }
 0x4d6   :  { %v2764_v18 = vrot.slane %v2763_v61, 1  ;;  %v2778_v51 = vrot.slane %v2777_v20, 1 }
 0x4d7   :  { %v2759_v50 = vadd.f32 %v2758_v52, %v2757_v4  ;;  %v2773_v60 = vmax.f32 %v2771_v21, %v2772_v9  ;;  %v5637_v4 = vld [vmem:[#allocation13_spill] sm:$0xff] }
 0x4d8   :  { %v2765_v25 = vadd.f32 %v2764_v18, %v2763_v61  ;;  %v2779_v24 = vmax.f32 %v2777_v20, %v2778_v51  ;;  %v5638_v18 = vld [vmem:[#allocation14_spill] sm:$0xff] }
 0x4d9   :  { %v2766_v38 = vmul.f32 0.125, %v2759_v50  ;;  %v5639_v50 = vld [vmem:[#allocation15_spill] sm:$0xff] }
 0x4da   :  { %v2767_v7 = vmul.f32 0.125, %v2765_v25 }
 0x4db   :  { %v2780_v30 = vsel %vm5631_vm0, %v2766_v38, %v2773_v60  ;;  %vm5651_vm0 = vcmask 900096  }
 0x4dc   :  { %v2781_v19 = vsel %vm5632_vm7, %v2767_v7, %v2779_v24  ;;  %v5640_v7 = vld [vmem:[#allocation16_spill] sm:$0xff]  ;;  %vm5652_vm7 = vcmask 801792  }
 0x4dd   :  { %v2784_v53 = vcombine.low %v2780_v30, %v2781_v19 }
 0x4df   :  { %3776 = vst.sshfl [vmem:[#allocation3 + $0x2] sm:$0x33 pattern:$0x76325410] %v2784_v53  ;;  %v5641_v53 = vld [vmem:[#allocation17_spill] sm:$0xff] }
 0x4e6   :  { %v2856_v6 = vld [vmem:[#allocation3] sm:$0x3f] }
 0x4e7   :  { %v2825_v37 = vld [vmem:[#allocation3] sm:$0x3f]  ;;  %v5057_v55 = vmul.f32 %v2856_v6, %v4331_v12 }
 0x4e8   :  { %v2982_v31 = vld [vmem:[#allocation3] sm:$0x3f]  ;;  %v5060_v33 = vmul.f32 %v2825_v37, %v4328_v49 }
 0x4e9   :  { %v2951_v44 = vld [vmem:[#allocation3] sm:$0x3f]  ;;  %v5064_v28 = vrot.slane %v5057_v55, %v4015_v13  ;;  %v5069_v2 = vmul.f32 %v2982_v31, %v4345_v36 }
 0x4ea   :  { %v2842_v45 = vrot.slane %v5060_v33, %v4015_v13  ;;  %v5072_v41 = vmul.f32 %v2951_v44, %v4341_v57  ;;  %v3077_v40 = vld [vmem:[#allocation3] sm:$0x3f] }
 0x4eb   :  { %v2794_v12 = vld [vmem:[#allocation3] sm:$0x3f]  ;;  %2878 = vrot.lane.b32.xlu0 %v5064_v28, %s3971_s26  ;;  %v5079_v49 = vrot.slane %v5069_v2, %v4015_v13  ;;  %v5084_v36 = vmul.f32 %v3077_v40, %v4356_v22  ;;  %v5642_v40 = vld [vmem:[#allocation18_spill] sm:$0xff] }
 0x4ec   :  { %2848 = vrot.lane.b32.xlu1 %v2842_v45, %s3973_s28  ;;  %v2968_v43 = vrot.slane %v5072_v41, %v4015_v13  ;;  %v2795_v57 = vmul.f32 %v2794_v12, %v4370_v56  ;;  %v3187_v1 = vld [vmem:[#allocation3 + $0x2] sm:$0x3f] }
 0x4ed   :  { %v2920_v0 = vld [vmem:[#allocation3] sm:$0x3f]  ;;  %v3094_v15 = vrot.slane %v5084_v36, %v4015_v13  ;;  %v5094_v34 = vmul.f32 %v3187_v1, %v4379_v35 }
 0x4ee   :  { %v2804_v8 = vrot.slane %v2795_v57, %v4015_v13  ;;  %v5097_v22 = vmul.f32 %v2920_v0, %v5633_v32  ;;  %v3344_v17 = vld [vmem:[#allocation3 + $0x2] sm:$0x3f] }
 0x4ef   :  { %3004 = vrot.lane.b32.xlu0 %v5079_v49, %s3958_s22  ;;  %v3108_v56 = vld [vmem:[#allocation3] sm:$0x3f]  ;;  %v3204_v5 = vrot.slane %v5094_v34, %v4015_v13  ;;  %v5108_v46 = vmul.f32 %v3344_v17, %v5634_v10 }
 0x4f0   :  { %2974 = vrot.lane.b32.xlu1 %v2968_v43, %s3972_s27  ;;  %v5105_v58 = vrot.slane %v5097_v22, %v4015_v13  ;;  %v5635_v35 = vld [vmem:[#allocation11_spill] sm:$0xff]  ;;  %v2797_v43 = vcombine.high %v2795_v57, %v2795_v57 }
 0x4f1   :  { %v5111_v59 = vmul.f32 %v3108_v56, %v5635_v35  ;;  %v3470_v48 = vld [vmem:[#allocation3 + $0x2] sm:$0x3f]  ;;  %v5118_v3 = vrot.slane %v5108_v46, %v4015_v13 }
 0x4f2   :  { %v3218_v27 = vld [vmem:[#allocation3 + $0x2] sm:$0x3f]  ;;  %v5125_v63 = vmul.f32 %v3470_v48, %v5636_v29  ;;  %v2811_v17 = vrot.slane %v2797_v43, %v4015_v13  ;;  %v2812_v48 = vcombine.high %v2804_v8, %v2804_v8 }
 0x4f3   :  { %2813 = vrot.lane.b32.xlu0 %v2804_v8, %s3975_s6  ;;  %v5122_v26 = vrot.slane %v5111_v59, %v4015_v13  ;;  %v5128_v21 = vmul.f32 %v3218_v27, %v5637_v4  ;;  %v3282_v61 = vld [vmem:[#allocation3 + $0x2] sm:$0x3f]  ;;  %v2923_v27 = vcombine.high %v5097_v22, %v5097_v22 }
 0x4f4   :  { %3100 = vrot.lane.b32.xlu1 %v3094_v15, %s3969_s15  ;;  %v3046_v20 = vld [vmem:[#allocation3] sm:$0x3f]  ;;  %v5136_v52 = vrot.slane %v5125_v63, %v4015_v13  ;;  %v5143_v51 = vmul.f32 %v3282_v61, %v5638_v18 }
 0x4f5   :  { %v5140_v9 = vrot.slane %v5128_v21, %v4015_v13  ;;  %v5146_v25 = vmul.f32 %v3046_v20, %v5639_v50  ;;  %v3408_v38 = vld [vmem:[#allocation3 + $0x2] sm:$0x3f]  ;;  %v2937_v50 = vrot.slane %v2923_v27, %v4015_v13 }
 0x4f6   :  { %v3313_v60 = vld [vmem:[#allocation3 + $0x2] sm:$0x3f]  ;;  %v5153_v24 = vmul.f32 %v3408_v38, %v5640_v7  ;;  %v5157_v30 = vrot.slane %v5143_v51, %v4015_v13 }
 0x4f7   :  { %2939 = vrot.lane.b32.xlu0 %v5105_v58, %s3974_s5  ;;  %v5161_v19 = vrot.slane %v5146_v25, %v4015_v13  ;;  %v5164_v6 = vmul.f32 %v3313_v60, %v5641_v53  ;;  %v3439_v37 = vld [vmem:[#allocation3 + $0x2] sm:$0x3f]  ;;  %v2828_v60 = vcombine.low %v5060_v33, %v5060_v33  ;;  %v2874_v33 = vcombine.low %v5064_v28, %v5064_v28 }
 0x4f8   :  { %3210 = vrot.lane.b32.xlu1 %v3204_v5, %s3954_s18  ;;  %v2888_v31 = vld [vmem:[#allocation3] sm:$0x3f]  ;;  %v5172_v44 = vrot.slane %v5153_v24, %v4015_v13  ;;  %v5177_v12 = vmul.f32 %v3439_v37, %v5642_v40  ;;  %v5644_v5 = vld [vmem:[#allocation8_spill] sm:$0xff]  ;;  %v2954_v37 = vcombine.low %v5072_v41, %v5072_v41  ;;  %v3000_v41 = vcombine.low %v5079_v49, %v5079_v49 }
 0x4f9   :  { %v3330_v45 = vrot.slane %v5164_v6, %v4015_v13  ;;  %v5643_v1 = vld [vmem:[#allocation19_spill] sm:$0xff]  ;;  %v5214_v53 = vrot.slane %v2828_v60, %v4015_v13  ;;  %v2859_v60 = vcombine.high %v5057_v55, %v5057_v55 }
 0x4fa   :  { %v2889_v0 = vmul.f32 %v2888_v31, %v5643_v1  ;;  %v3172_v15 = vld [vmem:[#allocation3 + $0x2] sm:$0xf]  ;;  %v3456_v32 = vrot.slane %v5177_v12, %v4015_v13 }
 0x4fb   :  { %3130 = vrot.lane.b32.xlu0 %v5122_v26, %s3968_s14  ;;  %v3173_v10 = vmul.f32 %v3172_v15, %v5644_v5  ;;  %v3014_v35 = vld [vmem:[#allocation3] sm:$0x3f] }
 0x4fc   :  { %3366 = vrot.lane.b32.xlu1 %v5118_v3, %s3952_s0  ;;  %v2905_v56 = vrot.slane %v2889_v0, %v4015_v13  ;;  %v2891_v4 = vcombine.low %v2889_v0, %v2889_v0  ;;  %v3015_v61 = vmul.f32 %v3014_v35, %v4550_v47  ;;  %v2938_v47 = vcombine.high %v5105_v58, %v5105_v58  ;;  %v3140_v31 = vld [vmem:[#allocation3] sm:$0x3f] }
 0x4fd   :  { %v3181_v57 = vrot.slane %v3173_v10, %v4015_v13  ;;  %3777 = vst.sshfl [vmem:[#allocation4 + $0x30] sm:$0x3 pattern:$0x76325410] %v3173_v10  ;;  %v5225_v58 = vrot.slane %v2954_v37, %v4015_v13  ;;  %v3141_v40 = vmul.f32 %v3140_v31, %v4582_v54  ;;  %v3250_v43 = vld [vmem:[#allocation3 + $0x2] sm:$0x3f]  ;;  %v3064_v54 = vcombine.high %v5161_v19, %v5161_v19 }
 0x4fe   :  { %v2907_v29 = vcombine.low %v2905_v56, %v2905_v56  ;;  %v5197_v18 = vrot.slane %v2891_v4, %v4015_v13  ;;  %v3031_v8 = vrot.slane %v3015_v61, %v4015_v13  ;;  %v3017_v38 = vcombine.low %v3015_v61, %v3015_v61  ;;  %v3376_v10 = vld [vmem:[#allocation3 + $0x2] sm:$0x3f] }
 0x4ff   :  { %3240 = vrot.lane.b32.xlu0 %v5140_v9, %s3967_s13  ;;  %v3182_v20 = vcombine.high %v3181_v57, %v3181_v57  ;;  %v3157_v28 = vrot.slane %v3141_v40, %v4015_v13  ;;  %v3251_v0 = vmul.f32 %v3250_v43, %v4600_v16  ;;  %v3143_v15 = vcombine.low %v3141_v40, %v3141_v40 }
 0x500   :  { %3492 = vrot.lane.b32.xlu1 %v5136_v52, %s3961_s30  ;;  %v3033_v22 = vcombine.low %v3031_v8, %v3031_v8  ;;  %v5211_v7 = vrot.slane %v3017_v38, %v4015_v13  ;;  %v3080_v56 = vcombine.low %v5084_v36, %v5084_v36  ;;  %v3126_v36 = vcombine.low %v5122_v26, %v5122_v26 }
 0x501   :  { %3186 = vst [vmem:[#allocation4 + $0x38] sm:$0x3] %v3182_v20  ;;  %v5246_v49 = vrot.slane %v3143_v15, %v4015_v13  ;;  %v3253_v16 = vcombine.low %v3251_v0, %v3251_v0  ;;  %v3236_v35 = vcombine.low %v5140_v9, %v5140_v9  ;;  %v3190_v57 = vcombine.low %v5094_v34, %v5094_v34  ;;  %v3502_v9 = vld [vmem:[#allocation3 + $0x2] sm:$0x3f] }
 0x502   :  { %v5257_v5 = vrot.slane %v3080_v56, %v4015_v13  ;;  %v3285_v26 = vcombine.high %v5143_v51, %v5143_v51  ;;  %v3503_v20 = vmul.f32 %v3502_v9, %v4656_v11  ;;  %v3316_v38 = vcombine.low %v5164_v6, %v5164_v6 }
 0x503   :  { %3065 = vrot.lane.b32.xlu0 %v5161_v19, %s3957_s21  ;;  %v5254_v19 = vrot.slane %v3253_v16, %v4015_v13  ;;  %v5273_v27 = vrot.slane %v3190_v57, %v4015_v13  ;;  %v3488_v37 = vcombine.low %v5136_v52, %v5136_v52  ;;  %v2985_v6 = vcombine.high %v5069_v2, %v5069_v2 }
 0x504   :  { %3301 = vrot.lane.b32.xlu1 %v5157_v30, %s3953_s17  ;;  %v3505_v8 = vcombine.low %v3503_v20, %v3503_v20  ;;  %v3323_v31 = vrot.slane %v3316_v38, %v4015_v13  ;;  %v2843_v52 = vcombine.high %v5214_v53, %v5214_v53  ;;  %v2969_v2 = vcombine.high %v5225_v58, %v5225_v58 }
 0x505   :  { %v2999_v40 = vrot.slane %v2985_v6, %v4015_v13  ;;  %v2906_v43 = vcombine.low %v5197_v18, %v5197_v18  ;;  %v3473_v56 = vcombine.high %v5125_v63, %v5125_v63 }
 0x506   :  { %v5299_v11 = vrot.slane %v3505_v8, %v4015_v13 }
 0x507   :  { %3336 = vrot.lane.b32.xlu0 %v3330_v45, %s3951_s16  ;;  %v3049_v45 = vcombine.high %v5146_v25, %v5146_v25  ;;  %v3159_v25 = vcombine.low %v3157_v28, %v3157_v28 }
 0x508   :  { %3427 = vrot.lane.b32.xlu1 %v5172_v44, %s3965_s9 }
 0x509   :  { %v3063_v1 = vrot.slane %v3049_v45, %v4015_v13 }
 0x50b   :  { %3462 = vrot.lane.b32.xlu0 %v3456_v32, %s3963_s7  ;;  %v3267_v32 = vrot.slane %v3251_v0, %v4015_v13  ;;  %v3205_v0 = vcombine.high %v5273_v27, %v5273_v27 }
 0x50c   :  { %2817 = vrot.lane.b32.xlu1 %v2811_v17, %s3975_s6 }
 0x50d   :  { %v3269_v17 = vcombine.low %v3267_v32, %v3267_v32  ;;  %v3268_v32 = vcombine.low %v5254_v19, %v5254_v19 }
 0x50f   :  { %2815 = vrot.lane.b32.xlu0 %v2812_v48, %s3975_s6  ;;  %v3377_v48 = vmul.f32 %v3376_v10, %v4633_v42  ;;  %v3299_v42 = vrot.slane %v3285_v26, %v4015_v13 }
 0x510   :  { %2912 = vrot.lane.b32.xlu1 %v2907_v29, %s3970_s25  ;;  %v3300_v29 = vcombine.high %v5157_v30, %v5157_v30  ;;  %v3426_v30 = vcombine.high %v5172_v44, %v5172_v44 }
 0x511   :  { %v3379_v4 = vcombine.low %v3377_v48, %v3377_v48  ;;  %v3393_v61 = vrot.slane %v3377_v48, %v4015_v13 }
 0x513   :  { %2910 = vrot.lane.b32.xlu0 %v5197_v18, %s3970_s25  ;;  %v5284_v34 = vrot.slane %v3379_v4, %v4015_v13  ;;  %v3395_v51 = vcombine.low %v3393_v61, %v3393_v61 }
 0x514   :  { %2943 = vrot.lane.b32.xlu1 %v2937_v50, %s3974_s5  ;;  %v3411_v50 = vcombine.high %v5153_v24, %v5153_v24  ;;  %v3362_v24 = vcombine.low %v5118_v3, %v5118_v3  ;;  %v2873_v3 = vrot.slane %v2859_v60, %v4015_v13 }
 0x515   :  { %v3394_v4 = vcombine.low %v5284_v34, %v5284_v34 }
 0x516   :  { %v2875_v45 = vcombine.low %v2873_v3, %v2873_v3 }
 0x517   :  { %2941 = vrot.lane.b32.xlu0 %v2938_v47, %s3974_s5  ;;  %v3425_v47 = vrot.slane %v3411_v50, %v4015_v13 }
 0x518   :  { %3038 = vrot.lane.b32.xlu1 %v3033_v22, %s3956_s20  ;;  %v3519_v22 = vrot.slane %v3503_v20, %v4015_v13  ;;  %v3520_v20 = vcombine.low %v5299_v11, %v5299_v11 }
 0x51a   :  { %v3521_v44 = vcombine.low %v3519_v22, %v3519_v22 }
 0x51b   :  { %3036 = vrot.lane.b32.xlu0 %v5211_v7, %s3956_s20 }
 0x51c   :  { %2844 = vrot.lane.b32.xlu1 %v5214_v53, %s3973_s28  ;;  %v3095_v53 = vcombine.high %v5257_v5, %v5257_v5 }
 0x51f   :  { %2876 = vrot.lane.b32.xlu0 %v2874_v33, %s3971_s26  ;;  %v3442_v33 = vcombine.low %v5177_v12, %v5177_v12  ;;  %v3001_v12 = vcombine.low %v2999_v40, %v2999_v40 }
 0x520   :  { %2970 = vrot.lane.b32.xlu1 %v5225_v58, %s3972_s27  ;;  %v3221_v58 = vcombine.high %v5128_v21, %v5128_v21 }
 0x521   :  { %v3449_v55 = vrot.slane %v3442_v33, %v4015_v13 }
 0x523   :  { %3002 = vrot.lane.b32.xlu0 %v3000_v41, %s3958_s22  ;;  %v3111_v41 = vcombine.high %v5111_v59, %v5111_v59  ;;  %v3457_v9 = vcombine.high %v3449_v55, %v3449_v55 }
 0x524   :  { %3069 = vrot.lane.b32.xlu1 %v3063_v1, %s3957_s21  ;;  %v3032_v1 = vcombine.low %v5211_v7, %v5211_v7  ;;  %v3347_v7 = vcombine.high %v5108_v46, %v5108_v46 }
 0x525   :  { %v3125_v28 = vrot.slane %v3111_v41, %v4015_v13 }
 0x526   :  { %v3361_v16 = vrot.slane %v3347_v7, %v4015_v13 }
 0x527   :  { %3067 = vrot.lane.b32.xlu0 %v3064_v54, %s3957_s21  ;;  %v3127_v54 = vcombine.low %v3125_v28, %v3125_v28 }
 0x528   :  { %3164 = vrot.lane.b32.xlu1 %v3159_v25, %s3955_s19  ;;  %v3235_v25 = vrot.slane %v3221_v58, %v4015_v13  ;;  %v3363_v10 = vcombine.low %v3361_v16, %v3361_v16 }
 0x52b   :  { %3162 = vrot.lane.b32.xlu0 %v5246_v49, %s3955_s19 }
 0x52c   :  { %3274 = vrot.lane.b32.xlu1 %v3269_v17, %s3966_s10  ;;  %v3237_v17 = vcombine.low %v3235_v25, %v3235_v25 }
 0x52f   :  { %3272 = vrot.lane.b32.xlu0 %v5254_v19, %s3966_s10  ;;  %v3534_v19 = vld [vmem:[#allocation3 + $0x2] sm:$0x3f] }
 0x530   :  { %3096 = vrot.lane.b32.xlu1 %v5257_v5, %s3969_s15 }
 0x533   :  { %3128 = vrot.lane.b32.xlu0 %v3126_v36, %s3968_s14  ;;  %v3158_v36 = vcombine.low %v5246_v49, %v5246_v49 }
 0x534   :  { %3238 = vrot.lane.b32.xlu1 %v3236_v35, %s3967_s13  ;;  %v3487_v35 = vrot.slane %v3473_v56, %v4015_v13 }
 0x536   :  { %v3489_v48 = vcombine.low %v3487_v35, %v3487_v35 }
 0x537   :  { %3206 = vrot.lane.b32.xlu0 %v5273_v27, %s3954_s18  ;;  %v3331_v27 = vcombine.high %v3323_v31, %v3323_v31 }
 0x538   :  { %3303 = vrot.lane.b32.xlu1 %v3300_v29, %s3953_s17  ;;  %v3535_v29 = vmul.f32 %v3534_v19, %v4754_v62 }
 0x53b   :  { %3305 = vrot.lane.b32.xlu0 %v3299_v42, %s3953_s17  ;;  %v3544_v42 = vrot.slane %v3535_v29, %v4015_v13 }
 0x53c   :  { %3398 = vrot.lane.b32.xlu1 %v5284_v34, %s3962_s4 }
 0x53f   :  { %3400 = vrot.lane.b32.xlu0 %v3395_v51, %s3962_s4  ;;  %v3552_v51 = vcombine.high %v3544_v42, %v3544_v42 }
 0x540   :  { %3429 = vrot.lane.b32.xlu1 %v3426_v30, %s3965_s9  ;;  %v3537_v30 = vcombine.high %v3535_v29, %v3535_v29 }
 0x542   :  { %v3551_v8 = vrot.slane %v3537_v30, %v4015_v13 }
 0x543   :  { %3431 = vrot.lane.b32.xlu0 %v3425_v47, %s3965_s9 }
 0x544   :  { %3524 = vrot.lane.b32.xlu1 %v5299_v11, %s3960_s29 }
 0x547   :  { %3526 = vrot.lane.b32.xlu0 %v3521_v44, %s3960_s29 }
 0x548   :  { %3364 = vrot.lane.b32.xlu1 %v3362_v24, %s3952_s0 }
 0x54b   :  { %3332 = vrot.lane.b32.xlu0 %v3323_v31, %s3951_s16 }
 0x54c   :  { %3490 = vrot.lane.b32.xlu1 %v3488_v37, %s3961_s30 }
 0x54f   :  { %3458 = vrot.lane.b32.xlu0 %v3449_v55, %s3963_s7 }
 0x550   :  { %2880 = vrot.lane.b32.xlu1 %v2875_v45, %s3971_s26 }
 0x553   :  { %2846 = vrot.lane.b32.xlu0 %v2843_v52, %s3973_s28 }
 0x554   :  { %3006 = vrot.lane.b32.xlu1 %v3001_v12, %s3958_s22 }
 0x557   :  { %2972 = vrot.lane.b32.xlu0 %v2969_v2, %s3972_s27 }
 0x558   :  { %2908 = vrot.lane.b32.xlu1 %v2906_v43, %s3970_s25 }
 0x55b   :  { %3098 = vrot.lane.b32.xlu0 %v3095_v53, %s3969_s15 }
 0x55c   :  { %3034 = vrot.lane.b32.xlu1 %v3032_v1, %s3956_s20 }
 0x55d   :  { %v5348_v59 = vpop.permute.xlu0 %2878 }
 0x55e   :  { %v5350_v18 = vpop.permute.xlu1 %2848 }
 0x55f   :  { %3208 = vrot.lane.b32.xlu0 %v3205_v0, %s3954_s18 }
 0x560   :  { %3132 = vrot.lane.b32.xlu1 %v3127_v54, %s3968_s14 }
 0x561   :  { %v5359_v21 = vpop.permute.xlu0 %3004 }
 0x562   :  { %v5361_v15 = vpop.permute.xlu1 %2974 }
 0x563   :  { %3270 = vrot.lane.b32.xlu0 %v3268_v32, %s3966_s10 }
 0x564   :  { %3242 = vrot.lane.b32.xlu1 %v3237_v17, %s3967_s13 }
 0x565   :  { %v2814_v5 = vpop.permute.xlu0 %2813 }
 0x566   :  { %v5370_v46 = vpop.permute.xlu1 %3100 }
 0x567   :  { %3368 = vrot.lane.b32.xlu0 %v3363_v10, %s3952_s0 }
 0x568   :  { %3160 = vrot.lane.b32.xlu1 %v3158_v36, %s3955_s19 }
 0x569   :  { %v2940_v63 = vpop.permute.xlu0 %2939 }
 0x56a   :  { %v5377_v57 = vpop.permute.xlu1 %3210 }
 0x56b   :  { %3494 = vrot.lane.b32.xlu0 %v3489_v48, %s3961_s30 }
 0x56c   :  { %3334 = vrot.lane.b32.xlu1 %v3331_v27, %s3951_s16 }
 0x56d   :  { %v5384_v49 = vpop.permute.xlu0 %3130 }
 0x56e   :  { %v5382_v26 = vpop.permute.xlu1 %3366 }
 0x56f   :  { %3396 = vrot.lane.b32.xlu0 %v3394_v4, %s3962_s4 }
 0x570   :  { %3460 = vrot.lane.b32.xlu1 %v3457_v9, %s3963_s7 }
 0x571   :  { %v5393_v62 = vpop.permute.xlu0 %3240 }
 0x572   :  { %v5391_v61 = vpop.permute.xlu1 %3492 }
 0x573   :  { %3522 = vrot.lane.b32.xlu0 %v3520_v20, %s3960_s29 }
 0x574   :  { %3555 = vrot.lane.b32.xlu1 %v3552_v51, %s3964_s8 }
 0x575   :  { %v3066_v50 = vpop.permute.xlu0 %3065 }
 0x576   :  { %v3302_v34 = vpop.permute.xlu1 %3301 }
 0x577   :  { %3557 = vrot.lane.b32.xlu0 %v3551_v8, %s3964_s8 }
 0x578   :  { %3553 = vrot.lane.b32.xlu1 %v3544_v42, %s3964_s8 }
 0x579   :  { %v5404_v22 = vpop.permute.xlu0 %3336 }
 0x57a   :  { %v5402_v47 = vpop.permute.xlu1 %3427 }
 0x57d   :  { %v5406_v44 = vpop.permute.xlu0 %3462 }
 0x57e   :  { %v2818_v11 = vpop.permute.xlu1 %2817 }
 0x581   :  { %v2816_v24 = vpop.permute.xlu0 %2815 }
 0x582   :  { %v2913_v38 = vpop.permute.xlu1 %2912  ;;  %v2819_v60 = vsel %vm5645_vm5, %v2814_v5, %v2816_v24  ;;  %v2820_v37 = vsel %vm5646_vm15, %v2816_v24, %v2818_v11  ;;  %vm5653_vm5 = vmmov %vm5652_vm7  ;;  %vm5654_vm15 = vcmask 777216  }
 0x583   :  { %2823 = vst [vmem:[#allocation4] sm:$0x3] %v2819_v60  ;;  %2824 = vst [vmem:[#allocation4 + $0x8] sm:$0x3] %v2820_v37 }
 0x585   :  { %v5410_v13 = vpop.permute.xlu0 %2910 }
 0x586   :  { %v2944_v31 = vpop.permute.xlu1 %2943  ;;  %v2915_v33 = vsel %vm1137_vm14, %v5410_v13, %v2913_v38 }
 0x587   :  { %2919 = vst [vmem:[#allocation4 + $0x8] sm:$0xc0] %v2915_v33 }
 0x589   :  { %v2942_v3 = vpop.permute.xlu0 %2941 }
 0x58a   :  { %v3039_v6 = vpop.permute.xlu1 %3038  ;;  %v2945_v55 = vsel %vm5647_vm6, %v2940_v63, %v2942_v3  ;;  %v2946_v45 = vsel %vm5648_vm3, %v2942_v3, %v2944_v31  ;;  %vm5655_vm6 = vcmask 908288   ;;  %vm5656_vm3 = vcmask 785408  }
 0x58b   :  { %2949 = vst [vmem:[#allocation4 + $0x10] sm:$0x3] %v2945_v55  ;;  %2950 = vst [vmem:[#allocation4 + $0x18] sm:$0x3] %v2946_v45 }
 0x58d   :  { %v5416_v40 = vpop.permute.xlu0 %3036 }
 0x58e   :  { %v5418_v52 = vpop.permute.xlu1 %2844  ;;  %v3041_v12 = vsel %vm182_vm9, %v5416_v40, %v3039_v6 }
 0x58f   :  { %3045 = vst [vmem:[#allocation4 + $0x18] sm:$0xc0] %v3041_v12 }
 0x591   :  { %v2877_v2 = vpop.permute.xlu0 %2876 }
 0x592   :  { %v5422_v43 = vpop.permute.xlu1 %2970  ;;  %v2882_v41 = vsel %vm1088_vm10, %v2877_v2, %v5348_v59 }
 0x593   :  { %2886 = vst [vmem:[#allocation4] sm:$0x30] %v2882_v41 }
 0x595   :  { %v3003_v53 = vpop.permute.xlu0 %3002 }
 0x596   :  { %v3070_v1 = vpop.permute.xlu1 %3069  ;;  %v3008_v28 = vsel %vm260_vm13, %v3003_v53, %v5359_v21 }
 0x597   :  { %3012 = vst [vmem:[#allocation4 + $0x10] sm:$0x30] %v3008_v28 }
 0x599   :  { %v3068_v58 = vpop.permute.xlu0 %3067 }
 0x59a   :  { %v3165_v0 = vpop.permute.xlu1 %3164  ;;  %v3071_v54 = vsel %vm356_vm11, %v3066_v50, %v3068_v58  ;;  %v3072_v25 = vsel %vm356_vm11, %v3068_v58, %v3070_v1  ;;  %vm5649_vm11 = vcmask 924672  }
 0x59b   :  { %3075 = vst [vmem:[#allocation4 + $0x20] sm:$0x3] %v3071_v54  ;;  %3076 = vst [vmem:[#allocation4 + $0x28] sm:$0x3] %v3072_v25 }
 0x59c   :  { %vm5650_vm4 = vmmov %vm5649_vm11 }
 0x59d   :  { %v5430_v7 = vpop.permute.xlu0 %3162 }
 0x59e   :  { %v3275_v32 = vpop.permute.xlu1 %3274  ;;  %v3167_v17 = vsel %vm444_vm8, %v5430_v7, %v3165_v0 }
 0x59f   :  { %3171 = vst [vmem:[#allocation4 + $0x28] sm:$0xc0] %v3167_v17 }
 0x5a1   :  { %v5434_v16 = vpop.permute.xlu0 %3272 }
 0x5a2   :  { %v3097_v56 = vpop.permute.xlu1 %3096  ;;  %v3277_v5 = vsel %vm1350_vm1, %v5434_v16, %v3275_v32 }
 0x5a3   :  { %3281 = vst [vmem:[#allocation4 + $0x38] sm:$0xc0] %v3277_v5 }
 0x5a5   :  { %v3129_v10 = vpop.permute.xlu0 %3128 }
 0x5a6   :  { %v3239_v36 = vpop.permute.xlu1 %3238  ;;  %v3134_v35 = vsel %vm1416_vm2, %v3129_v10, %v5384_v49 }
 0x5a7   :  { %v3244_v19 = vsel %vm1388_vm12, %v3239_v36, %v5393_v62  ;;  %3138 = vst [vmem:[#allocation4 + $0x20] sm:$0x30] %v3134_v35 }
 0x5a8   :  { %3248 = vst [vmem:[#allocation4 + $0x30] sm:$0x30] %v3244_v19 }
 0x5a9   :  { %v3207_v63 = vpop.permute.xlu0 %3206 }
 0x5aa   :  { %v3304_v48 = vpop.permute.xlu1 %3303 }
 0x5ab   :  { %v3307_v27 = vsel %vm5649_vm11, %v3302_v34, %v3304_v48  ;;  %vm5657_vm11 = vcmask 269312  }
 0x5ac   :  { %3311 = vst [vmem:[#allocation4 + $0x40] sm:$0x3] %v3307_v27 }
 0x5ad   :  { %v3306_v29 = vpop.permute.xlu0 %3305 }
 0x5ae   :  { %v5443_v4 = vpop.permute.xlu1 %3398  ;;  %v3308_v9 = vsel %vm5650_vm4, %v3304_v48, %v3306_v29  ;;  %vm5658_vm4 = vmmov %vm5657_vm11 }
 0x5af   :  { %3312 = vst [vmem:[#allocation4 + $0x48] sm:$0x3] %v3308_v9 }
 0x5b1   :  { %v3401_v42 = vpop.permute.xlu0 %3400 }
 0x5b2   :  { %v3430_v20 = vpop.permute.xlu1 %3429  ;;  %v3403_v51 = vsel %vm5651_vm0, %v5443_v4, %v3401_v42  ;;  %vm5659_vm0 = vcmask 146432  }
 0x5b3   :  { %v3433_v30 = vsel %vm5652_vm7, %v5402_v47, %v3430_v20  ;;  %3407 = vst [vmem:[#allocation4 + $0x48] sm:$0xc0] %v3403_v51 }
 0x5b4   :  { %3437 = vst [vmem:[#allocation4 + $0x50] sm:$0x3] %v3433_v30 }
 0x5b5   :  { %v3432_v50 = vpop.permute.xlu0 %3431 }
 0x5b6   :  { %v5450_v8 = vpop.permute.xlu1 %3524  ;;  %v3434_v34 = vsel %vm5653_vm5, %v3430_v20, %v3432_v50  ;;  %vm5663_vm5 = vcmask 1039360  }
 0x5b7   :  { %3438 = vst [vmem:[#allocation4 + $0x58] sm:$0x3] %v3434_v34 }
 0x5b9   :  { %v3527_v11 = vpop.permute.xlu0 %3526 }
 0x5ba   :  { %v3365_v24 = vpop.permute.xlu1 %3364  ;;  %v3529_v38 = vsel %vm5654_vm15, %v5450_v8, %v3527_v11  ;;  %vm5670_vm15 = vcmask 793600  }
 0x5bb   :  { %v3370_v60 = vsel %vm5655_vm6, %v3365_v24, %v5382_v26  ;;  %3533 = vst [vmem:[#allocation4 + $0x58] sm:$0xc0] %v3529_v38 }
 0x5bc   :  { %3374 = vst [vmem:[#allocation4 + $0x40] sm:$0x30] %v3370_v60 }
 0x5bd   :  { %v5457_v37 = vpop.permute.xlu0 %3332 }
 0x5be   :  { %v3491_v47 = vpop.permute.xlu1 %3490 }
 0x5bf   :  { %v3496_v31 = vsel %vm5656_vm3, %v3491_v47, %v5391_v61 }
 0x5c0   :  { %3500 = vst [vmem:[#allocation4 + $0x50] sm:$0x30] %v3496_v31 }
 0x5c1   :  { %v5461_v33 = vpop.permute.xlu0 %3458 }
 0x5c2   :  { %v2881_v3 = vpop.permute.xlu1 %2880 }
 0x5c3   :  { %v2883_v6 = vsel %vm1088_vm10, %v5348_v59, %v2881_v3  ;;  %vm5660_vm10 = vmmov %vm5659_vm0 }
 0x5c4   :  { %2887 = vst [vmem:[#allocation4 + $0x8] sm:$0x30] %v2883_v6 }
 0x5c5   :  { %v2847_v55 = vpop.permute.xlu0 %2846 }
 0x5c6   :  { %v3007_v45 = vpop.permute.xlu1 %3006  ;;  %v2850_v12 = vsel %vm5657_vm11, %v5418_v52, %v2847_v55  ;;  %v2851_v2 = vsel %vm5658_vm4, %v2847_v55, %v5350_v18  ;;  %vm5673_vm11 = vcmask 769024  }
 0x5c7   :  { %v3009_v41 = vsel %vm260_vm13, %v5359_v21, %v3007_v45  ;;  %2854 = vst [vmem:[#allocation4] sm:$0xc] %v2850_v12  ;;  %2855 = vst [vmem:[#allocation4 + $0x8] sm:$0xc] %v2851_v2  ;;  %vm5661_vm13 = vcmask 113664  }
 0x5c8   :  { %3013 = vst [vmem:[#allocation4 + $0x18] sm:$0x30] %v3009_v41  ;;  %vm5662_vm7 = vmmov %vm5661_vm13  ;;  %v3922_v41 = vld [vmem:[%s5535_s2] sm:$0x1]  ;;  %s3976_s2 = smov [#allocation5]  }
 0x5c9   :  { %v2973_v53 = vpop.permute.xlu0 %2972  ;;  %vm5674_vm4 = vmmov %vm5673_vm11  ;;  %s3693_s0 = sshll.u32 %s3976_s2, 4  ;;  %s3694_s0 = int_to_ptr.vmem [resolvable:$true] %s3693_s0 }
 0x5ca   :  { %v2909_v1 = vpop.permute.xlu1 %2908  ;;  %v2976_v59 = vsel %vm5659_vm0, %v5422_v43, %v2973_v53  ;;  %v2977_v28 = vsel %vm5660_vm10, %v2973_v53, %v5361_v15  ;;  %vm5675_vm0 = vcmask 1042432   ;;  %s3923_s17 = scalar_lea.vmem %s3694_s0, 256  ;;  %p3928_p1 = scmp.lt.s32.totalorder %s3694_s0, %s3694_s0 }
 0x5cb   :  { %v2914_v52 = vsel %vm1137_vm14, %v2909_v1, %v5410_v13  ;;  %2980 = vst [vmem:[#allocation4 + $0x10] sm:$0xc] %v2976_v59  ;;  %2981 = vst [vmem:[#allocation4 + $0x18] sm:$0xc] %v2977_v28  ;;  %p3924_p0 = scmp.ne.s32.totalorder %s3694_s0, %s3923_s17  ;;  %p3929_p2 = scmp.lt.s32.totalorder %s3923_s17, %s3923_s17 }
 0x5cc   :  { %2918 = vst [vmem:[#allocation4] sm:$0xc0] %v2914_v52  ;;  %vm5664_vm14 = vmmov %vm5663_vm5 }
 0x5cd   :  { %v3099_v18 = vpop.permute.xlu0 %3098  ;;  %vm5676_vm10 = vmmov %vm5675_vm0  ;;  %p3930_p3 = por %p3929_p2, %p3928_p1 }
 0x5ce   :  { %v3035_v58 = vpop.permute.xlu1 %3034  ;;  %v3102_v21 = vsel %vm5661_vm13, %v3097_v56, %v3099_v18  ;;  %v3103_v0 = vsel %vm5662_vm7, %v3099_v18, %v5370_v46  ;;  %v3566_v17 = vld [vmem:[#allocation4 + $0x8] sm:$0xff]  ;;  %vm5677_vm13 = vcmask 416768  }
 0x5cf   :  { %v3040_v54 = vsel %vm182_vm9, %v3035_v58, %v5416_v40  ;;  %3106 = vst [vmem:[#allocation4 + $0x20] sm:$0xc] %v3102_v21  ;;  %3107 = vst [vmem:[#allocation4 + $0x28] sm:$0xc] %v3103_v0  ;;  %p3931_p4 = pnand %p3930_p3, %p3924_p0 }
 0x5d0   :  { %3044 = vst [vmem:[#allocation4 + $0x10] sm:$0xc0] %v3040_v54  ;;  %vm5665_vm9 = vmmov %vm5655_vm6 }
 0x5d1   :  { %v3209_v15 = vpop.permute.xlu0 %3208  ;;  %vm5671_vm6 = vmmov %vm5670_vm15 }
 0x5d2   :  { %v3133_v43 = vpop.permute.xlu1 %3132  ;;  %v3212_v13 = vsel %vm5663_vm5, %v3207_v63, %v3209_v15  ;;  %v3213_v25 = vsel %vm5664_vm14, %v3209_v15, %v5377_v57  ;;  %v3568_v56 = vld [vmem:[#allocation4 + $0x18] sm:$0xff] }
 0x5d3   :  { %v3135_v32 = vsel %vm1416_vm2, %v5384_v49, %v3133_v43  ;;  %3216 = vst [vmem:[#allocation4 + $0x30] sm:$0xc] %v3212_v13  ;;  %3217 = vst [vmem:[#allocation4 + $0x38] sm:$0xc] %v3213_v25  ;;  %v3798_v46 = vpack.c.bf16 %v3568_v56, %v3566_v17  ;;  %v3565_v35 = vld [vmem:[#allocation4] sm:$0xff] }
 0x5d4   :  { %3139 = vst [vmem:[#allocation4 + $0x28] sm:$0x30] %v3135_v32 }
 0x5d5   :  { %v3271_v40 = vpop.permute.xlu0 %3270  ;;  %3799 = vmatprep.subr.bf16.mxu0 %v3798_v46 }
 0x5d6   :  { %v3243_v5 = vpop.permute.xlu1 %3242  ;;  %v3276_v10 = vsel %vm1350_vm1, %v3271_v40, %v5434_v16  ;;  %vm5667_vm1 = vcmask 916480  }
 0x5d7   :  { %v3245_v36 = vsel %vm1388_vm12, %v5393_v62, %v3243_v5  ;;  %v3567_v57 = vld [vmem:[#allocation4 + $0x10] sm:$0xff]  ;;  %3280 = vst [vmem:[#allocation4 + $0x30] sm:$0xc0] %v3276_v10  ;;  %vm5666_vm12 = vmmov %vm5656_vm3  ;;  %vm5672_vm3 = vcmask 777216  }
 0x5d8   :  { %3249 = vst [vmem:[#allocation4 + $0x38] sm:$0x30] %v3245_v36  ;;  %v3800_v49 = vpack.c.bf16 %v3567_v57, %v3565_v35  ;;  %vm5668_vm2 = vmmov %vm5667_vm1 }
 0x5d9   :  { %v3369_v19 = vpop.permute.xlu0 %3368 }
 0x5da   :  { %3801 = vmatpush1.bf16.msra.mxu0 %v3800_v49  ;;  %v3161_v63 = vpop.permute.xlu1 %3160  ;;  %v3371_v48 = vsel %vm5665_vm9, %v5382_v26, %v3369_v19 }
 0x5db   :  { %v3166_v27 = vsel %vm444_vm8, %v3161_v63, %v5430_v7  ;;  %3375 = vst [vmem:[#allocation4 + $0x48] sm:$0x30] %v3371_v48  ;;  %v3570_v20 = vld [vmem:[#allocation4 + $0x28] sm:$0xff]  ;;  %vm5669_vm8 = vcmask 900096  }
 0x5dc   :  { %3170 = vst [vmem:[#allocation4 + $0x20] sm:$0xc0] %v3166_v27 }
 0x5dd   :  { %v3495_v16 = vpop.permute.xlu0 %3494 }
 0x5de   :  { %v3335_v29 = vpop.permute.xlu1 %3334  ;;  %v3497_v62 = vsel %vm5666_vm12, %v5391_v61, %v3495_v16 }
 0x5df   :  { %v3338_v9 = vsel %vm5667_vm1, %v5457_v37, %v3335_v29  ;;  %v3339_v42 = vsel %vm5668_vm2, %v3335_v29, %v5404_v22  ;;  %v3572_v51 = vld [vmem:[#allocation4 + $0x38] sm:$0xff]  ;;  %3501 = vst [vmem:[#allocation4 + $0x58] sm:$0x30] %v3497_v62  ;;  %v3571_v22 = vld [vmem:[#allocation4 + $0x30] sm:$0xff] }
 0x5e0   :  { %3342 = vst [vmem:[#allocation4 + $0x40] sm:$0xc] %v3338_v9  ;;  %3343 = vst [vmem:[#allocation4 + $0x48] sm:$0xc] %v3339_v42  ;;  %v3802_v26 = vpack.c.bf16 %v3572_v51, %v3570_v20 }
 0x5e1   :  { %v3397_v7 = vpop.permute.xlu0 %3396 }
 0x5e2   :  { %3803 = vmatprep.subr.bf16.mxu0 %v3802_v26  ;;  %v3461_v30 = vpop.permute.xlu1 %3460  ;;  %v3402_v50 = vsel %vm5669_vm8, %v3397_v7, %v5443_v4 }
 0x5e3   :  { %v3464_v61 = vsel %vm5670_vm15, %v5461_v33, %v3461_v30  ;;  %v3465_v34 = vsel %vm5671_vm6, %v3461_v30, %v5406_v44  ;;  %v3569_v11 = vld [vmem:[#allocation4 + $0x20] sm:$0xff]  ;;  %3406 = vst [vmem:[#allocation4 + $0x40] sm:$0xc0] %v3402_v50 }
 0x5e4   :  { %3468 = vst [vmem:[#allocation4 + $0x50] sm:$0xc] %v3464_v61  ;;  %3469 = vst [vmem:[#allocation4 + $0x58] sm:$0xc] %v3465_v34  ;;  %v3804_v24 = vpack.c.bf16 %v3571_v22, %v3569_v11 }
 0x5e5   :  { %v3523_v38 = vpop.permute.xlu0 %3522 }
 0x5e6   :  { %3805 = vmatpush1.bf16.msra.mxu0 %v3804_v24  ;;  %v3556_v60 = vpop.permute.xlu1 %3555  ;;  %v3528_v37 = vsel %vm5672_vm3, %v3523_v38, %v5450_v8 }
 0x5e7   :  { %3532 = vst [vmem:[#allocation4 + $0x50] sm:$0xc0] %v3528_v37  ;;  %v3574_v44 = vld [vmem:[#allocation4 + $0x48] sm:$0xff] }
 0x5e9   :  { %v3558_v4 = vpop.permute.xlu0 %3557 }
 0x5ea   :  { %v3554_v47 = vpop.permute.xlu1 %3553  ;;  %v3560_v31 = vsel %vm5673_vm11, %v3556_v60, %v3558_v4  ;;  %v3573_v55 = vld [vmem:[#allocation4 + $0x40] sm:$0xff] }
 0x5eb   :  { %v3559_v33 = vsel %vm5674_vm4, %v3554_v47, %v3556_v60  ;;  %v3576_v3 = vld [vmem:[#allocation4 + $0x58] sm:$0xff]  ;;  %3564 = vst [vmem:[#allocation4 + $0x68] sm:$0x3] %v3560_v31 }
 0x5ec   :  { %3563 = vst [vmem:[#allocation4 + $0x60] sm:$0x3] %v3559_v33  ;;  %v3806_v6 = vpack.c.bf16 %v3576_v3, %v3574_v44 }
 0x5ee   :  { %3807 = vmatprep.subr.bf16.mxu0 %v3806_v6  ;;  %v3575_v45 = vld [vmem:[#allocation4 + $0x50] sm:$0xff] }
 0x5ef   :  { %v3808_v12 = vpack.c.bf16 %v3575_v45, %v3573_v55 }
 0x5f1   :  { %3809 = vmatpush1.bf16.msra.mxu0 %v3808_v12 }
 0x5f2   :  { %v3578_v2 = vld [vmem:[#allocation4 + $0x68] sm:$0x7] }
 0x5f3   :  { %3778 = vmatprep.subr.msk.mxu0 %vm5675_vm0, %v3578_v2  ;;  %v3577_v8 = vld [vmem:[#allocation4 + $0x60] sm:$0x7] }
 0x5f5   :  { %3779 = vmatpush1.msk.msra.mxu0 %vm5676_vm10, %v3577_v8 }
 0x5f6   :  { %3780 = vmatmul.mubr.msk.f32.vlgmr.msra.gmra.mrb[4].mxu0 %vm5677_vm13, %v3922_v41 }
 0x6c9   :  { %v3651_v53 = vpop.f32.mrb[4].mxu0 }
 0x6ca   :  { %v3781_v1 = vmul.f32 -1.442695, %v3651_v53  ;;  %v3653_v59 = vpop.f32.mrb[5].mxu0 }
 0x6cb   :  { %v3782_v28 = vmul.f32 -1.442695, %v3653_v59 }
 0x6cc   :  { %3914 = vpow2.f32 %v3781_v1 }
 0x6cd   :  { %3916 = vpow2.f32 %v3782_v28 }
 0x6d6   :  { %v3915_v52 = vpop.eup %3914 }
 0x6d7   :  { %v3917_v18 = vpop.eup %3916  ;;  %v3662_v58 = vadd.f32 1.0, %v3915_v52 }
 0x6d8   :  { %v3663_v21 = vadd.f32 1.0, %v3917_v18 }
 0x6d9   :  { %3918 = vrcp.f32 %v3662_v58 }
 0x6da   :  { %3920 = vrcp.f32 %v3663_v21 }
 0x6e3   :  { %v3919_v0 = vpop.eup %3918 }
 0x6e4   :  { %v3921_v54 = vpop.eup %3920  ;;  %v3671_v15 = vrot.slane %v3919_v0, %v5038_v23 }
 0x6e5   :  { %v3675_v43 = vrot.slane %v3921_v54, %v5038_v23 }
 0x6e6   :  { %v3676_v13 = vmul.f32 %v3671_v15, %v5044_v14 }
 0x6e7   :  { %v3677_v25 = vmul.f32 %v3675_v43, %v5047_v39 }
 0x6e9   :  { %v3785_v32 = vpack.c.bf16 %v3677_v25, %v3676_v13 }
 0x6eb   :  { %3687 = vst [vmem:[#allocation5 + $0x8] sm:$0xff] %v3785_v32 }
 0x6ec   :  { %3934 = shalt.err (!%p3931_p4)
}
 0x6ed   :  { %s3935_s20 = scalar_lea.hbm %s5536_s3, 256 }
 0x6ee   :  { %p3936_p5 = scmp.ne.s32.totalorder %s5536_s3, %s3935_s20  ;;  %p3939_p6 = scmp.lt.u32.totalorder %s3935_s20, %s5536_s3 }
 0x6f0   :  { %p3941_p7 = pnand %p3939_p6, %p3936_p5 }
 0x6f2   :  { %3944 = shalt.err (!%p3941_p7)
}
 0x6f3   :  { %s3977_s4 = smov 128   ;;  %s3978_s7 = smov 8  }
 0x6f4   :  { %3699 = dma.vmem_to_hbm [thread:$0]  %s3694_s0, 256, %s5536_s3, [#allocation6], %s3977_s4, %s3977_s4, %s3978_s7  }
 0x6f5   :  { %3945 = dma.done.wait [#allocation6], 256  }
 0x6f6   :  { %3946 = vsyncadd [#allocation6], 4294967040 }
 0x6f7   :  { %3703 = vsyncpa [#allocation6], 1 }

</bundles_post_ra>
